<compile_context>
chip_gen: v7x
topology: tpu7x:2x2x1
jax: 0.10.0
libtpu: 0.0.40
codegen_flags: <defaults>
</compile_context>

<pallas_src>
import functools

import jax
import jax.numpy as jnp
from jax import lax
from jax.experimental import pallas as pl
from jax.experimental.pallas import tpu as pltpu


def _basic_block_kernel(xpad_ref, w1_ref, b1_ref, w2_ref, b2_ref,
                        o_ref, hpad_ref, *, H, W):
    """Fully fused BasicBlock for one batch element.

    xpad_ref : (1, H+2, W+2, Cin)   zero-padded input (also supplies identity)
    w1_ref   : (9, Cin, Cmid)       conv1 weights, BN1 scale pre-folded
    b1_ref   : (1, Cmid)            folded BN1 bias
    w2_ref   : (9, Cmid, Cout)      conv2 weights, BN2 scale pre-folded
    b2_ref   : (1, Cout)            folded BN2 bias
    o_ref    : (1, H*W, Cout)       output
    hpad_ref : (H+2, W+2, Cmid)     VMEM scratch: padded intermediate h
    """
    HW = H * W
    Cin = xpad_ref.shape[-1]
    Cmid = w1_ref.shape[-1]
    Cout = w2_ref.shape[-1]

    # ---- conv1 (BN1 scale folded into weights) + bias + ReLU -------------
    # The nine 3x3 taps are static in-VMEM slices of the padded input; each
    # tap feeds one MXU matmul accumulated in f32.
    acc1 = jnp.zeros((HW, Cmid), jnp.float32)
    for kh in range(3):                       # static unroll over 3x3 taps
        for kw in range(3):
            tap = xpad_ref[0, kh:kh + H, kw:kw + W, :].reshape(HW, Cin)
            acc1 = acc1 + jnp.dot(tap, w1_ref[kh * 3 + kw],
                                  preferred_element_type=jnp.float32)
    h = jnp.maximum(acc1 + b1_ref[...], 0.0)          # (HW, Cmid) f32

    # Stage h zero-padded in VMEM so conv2's taps are plain static slices.
    # h never round-trips through HBM.
    hpad_ref[...] = jnp.zeros_like(hpad_ref)
    hpad_ref[1:H + 1, 1:W + 1, :] = h.reshape(H, W, Cmid)

    # ---- conv2 (BN2 scale folded into weights) + bias + identity + ReLU --
    acc2 = jnp.zeros((HW, Cout), jnp.float32)
    for kh in range(3):
        for kw in range(3):
            tap = hpad_ref[kh:kh + H, kw:kw + W, :].reshape(HW, Cmid)
            acc2 = acc2 + jnp.dot(tap, w2_ref[kh * 3 + kw],
                                  preferred_element_type=jnp.float32)

    # Identity residual = centre window of the padded input (no extra DMA).
    identity = xpad_ref[0, 1:H + 1, 1:W + 1, :].reshape(HW, Cin)
    out = acc2 + b2_ref[...] + identity.astype(jnp.float32)
    o_ref[0] = jnp.maximum(out, 0.0).astype(o_ref.dtype)


def basic_block_fused(x_nhwc, w1_9, b1, w2_9, b2):
    """relu(conv2(relu(conv1(x)+b1))+b2 + x), BN scales folded into w. NHWC."""
    N, H, W, Cin = x_nhwc.shape
    Cmid = w1_9.shape[-1]
    Cout = w2_9.shape[-1]
    assert Cin == Cout, "identity residual requires inplanes == planes"
    HW = H * W

    # Single zero-pad of the activation (the only wrapper-side data prep).
    xpad = jnp.pad(x_nhwc, ((0, 0), (1, 1), (1, 1), (0, 0)))

    # VMEM budget: double-buffered input/output blocks + weights + h scratch.
    itemsize = jnp.dtype(x_nhwc.dtype).itemsize
    block_bytes = (
        2 * (H + 2) * (W + 2) * Cin * itemsize      # padded input (2 bufs)
        + 2 * HW * Cout * itemsize                  # output (2 bufs)
        + 2 * 9 * (Cin * Cmid + Cmid * Cout) * 4    # weights
        + (H + 2) * (W + 2) * Cmid * 4              # intermediate-h scratch
    )
    vmem_limit = int(min(max(4 * block_bytes, 16 << 20), 64 << 20))

    kernel = functools.partial(_basic_block_kernel, H=H, W=W)

    out = pl.pallas_call(
        kernel,
        out_shape=jax.ShapeDtypeStruct((N, HW, Cout), x_nhwc.dtype),
        grid_spec=pltpu.PrefetchScalarGridSpec(
            num_scalar_prefetch=0,
            grid=(N,),
            in_specs=[
                pl.BlockSpec((1, H + 2, W + 2, Cin), lambda n: (n, 0, 0, 0)),
                pl.BlockSpec((9, Cin, Cmid), lambda n: (0, 0, 0)),
                pl.BlockSpec((1, Cmid), lambda n: (0, 0)),
                pl.BlockSpec((9, Cmid, Cout), lambda n: (0, 0, 0)),
                pl.BlockSpec((1, Cout), lambda n: (0, 0)),
            ],
            out_specs=pl.BlockSpec((1, HW, Cout), lambda n: (n, 0, 0)),
            scratch_shapes=[pltpu.VMEM((H + 2, W + 2, Cmid), jnp.float32)],
        ),
        compiler_params=pltpu.CompilerParams(
            dimension_semantics=("parallel",),
            vmem_limit_bytes=vmem_limit,
        ),
    )(xpad, w1_9, b1.reshape(1, Cmid), w2_9, b2.reshape(1, Cout))
    return out.reshape(N, H, W, Cout)


def _fold_bn_into_conv(w_hwio, gamma, beta, mean, var, eps=1e-5):
    """Fold eval-mode BN affine into the conv: returns (w9, bias)."""
    scale = gamma / jnp.sqrt(var + eps)          # (Cout,)
    bias = beta - mean * scale                   # (Cout,)
    cin, cout = w_hwio.shape[2], w_hwio.shape[3]
    w9 = (w_hwio * scale[None, None, None, :]).reshape(9, cin, cout)
    return w9, bias


def init_basic_block_params(key, inplanes, planes):
    """Deterministic synthetic parameters (shapes match nn.BasicBlock)."""
    ks = jax.random.split(key, 10)
    p = {}
    # conv weights in PyTorch OIHW layout, kept as HWIO for the kernel.
    w1 = jax.random.normal(ks[0], (planes, inplanes, 3, 3), jnp.float32) * 0.1
    w2 = jax.random.normal(ks[1], (planes, planes, 3, 3), jnp.float32) * 0.1
    p["w1_hwio"] = jnp.transpose(w1, (2, 3, 1, 0))
    p["w2_hwio"] = jnp.transpose(w2, (2, 3, 1, 0))
    # BatchNorm params / running stats (eval-mode semantics).
    p["bn1"] = (jax.random.uniform(ks[2], (planes,), minval=0.5, maxval=1.5),
                jax.random.normal(ks[3], (planes,)) * 0.1,
                jax.random.normal(ks[4], (planes,)) * 0.1,
                jax.random.uniform(ks[5], (planes,), minval=0.5, maxval=1.5))
    p["bn2"] = (jax.random.uniform(ks[6], (planes,), minval=0.5, maxval=1.5),
                jax.random.normal(ks[7], (planes,)) * 0.1,
                jax.random.normal(ks[8], (planes,)) * 0.1,
                jax.random.uniform(ks[9], (planes,), minval=0.5, maxval=1.5))
    return p


@jax.jit
def basic_block_forward(x_nchw, params):
    """BasicBlock forward: relu(bn2(conv2(relu(bn1(conv1(x))))) + x)."""
    x = jnp.transpose(x_nchw, (0, 2, 3, 1))      # NCHW -> NHWC
    w1_9, b1 = _fold_bn_into_conv(params["w1_hwio"], *params["bn1"])
    w2_9, b2 = _fold_bn_into_conv(params["w2_hwio"], *params["bn2"])
    out = basic_block_fused(x, w1_9, b1, w2_9, b2)
    return jnp.transpose(out, (0, 3, 1, 2))      # NHWC -> NCHW


def basic_block_reference(x_nchw, params):
    """Pure-JAX reference (lax.conv) for correctness checking."""
    def _fold(gamma, beta, mean, var, eps=1e-5):
        s = gamma / jnp.sqrt(var + eps)
        return s, beta - mean * s

    dn = ("NCHW", "HWIO", "NCHW")
    s1, b1 = _fold(*params["bn1"])
    s2, b2 = _fold(*params["bn2"])

    out = lax.conv_general_dilated(x_nchw, params["w1_hwio"], (1, 1),
                                   ((1, 1), (1, 1)), dimension_numbers=dn)
    out = out * s1[None, :, None, None] + b1[None, :, None, None]
    out = jnp.maximum(out, 0.0)
    out = lax.conv_general_dilated(out, params["w2_hwio"], (1, 1),
                                   ((1, 1), (1, 1)), dimension_numbers=dn)
    out = out * s2[None, :, None, None] + b2[None, :, None, None]
    out = jnp.maximum(out + x_nchw, 0.0)
    return out


if __name__ == "__main__":
    key = jax.random.PRNGKey(0)
    k_x, k_p = jax.random.split(key)

    N, C, H, W = 2, 8, 16, 16          # inplanes = planes = 8, stride = 1
    x = jax.random.normal(k_x, (N, C, H, W), jnp.float32)
    params = init_basic_block_params(k_p, inplanes=C, planes=C)

    out = jax.block_until_ready(basic_block_forward(x, params))

    ref = basic_block_reference(x, params)
    assert out.shape == (N, C, H, W)
    assert jnp.allclose(out, ref, atol=1e-4, rtol=1e-4), "mismatch vs reference"

    print("KERNEL_OK")
</pallas_src>

<mosaic_0001>
module attributes {stable_mosaic.version = 11 : i64} {
  func.func @_basic_block_kernel(%arg0: i32, %arg1: memref<1x18x18x8xf32, #tpu.memory_space<vmem>>, %arg2: memref<9x8x8xf32, #tpu.memory_space<vmem>>, %arg3: memref<1x8xf32, #tpu.memory_space<vmem>>, %arg4: memref<9x8x8xf32, #tpu.memory_space<vmem>>, %arg5: memref<1x8xf32, #tpu.memory_space<vmem>>, %arg6: memref<1x256x8xf32, #tpu.memory_space<vmem>>, %arg7: memref<18x18x8xf32, #tpu.memory_space<vmem>>) attributes {dimension_semantics = [#tpu.dimension_semantics<parallel>], iteration_bounds = array<i64: 2>, scalar_prefetch = 0 : i64, scratch_operands = 1 : i64, tpu.core_type = #tpu.core_type<tc>, window_params = [{transform_indices = @transform_0, window_bounds = array<i64: 1, 18, 18, 8>}, {pipeline_mode = #tpu.pipeline_mode<synchronous>, transform_indices = @transform_1, window_bounds = array<i64: 9, 8, 8>}, {pipeline_mode = #tpu.pipeline_mode<synchronous>, transform_indices = @transform_2, window_bounds = array<i64: 1, 8>}, {pipeline_mode = #tpu.pipeline_mode<synchronous>, transform_indices = @transform_3, window_bounds = array<i64: 9, 8, 8>}, {pipeline_mode = #tpu.pipeline_mode<synchronous>, transform_indices = @transform_4, window_bounds = array<i64: 1, 8>}, {transform_indices = @transform_5, window_bounds = array<i64: 1, 256, 8>}]} {
    %cst = arith.constant 0.000000e+00 : f32
    %0 = vector.broadcast %cst : f32 to vector<256x8xf32>
    %c0 = arith.constant 0 : index
    %c0_0 = arith.constant 0 : index
    %c0_1 = arith.constant 0 : index
    %c0_2 = arith.constant 0 : index
    %1 = vector.load %arg1[%c0, %c0_0, %c0_1, %c0_2] : memref<1x18x18x8xf32, #tpu.memory_space<vmem>>, vector<1x16x16x8xf32>
    %2 = vector.shape_cast %1 : vector<1x16x16x8xf32> to vector<16x16x8xf32>
    %3 = vector.shape_cast %2 : vector<16x16x8xf32> to vector<256x8xf32>
    %c0_3 = arith.constant 0 : index
    %c0_4 = arith.constant 0 : index
    %c0_5 = arith.constant 0 : index
    %4 = vector.load %arg2[%c0_3, %c0_4, %c0_5] : memref<9x8x8xf32, #tpu.memory_space<vmem>>, vector<1x8x8xf32>
    %5 = vector.shape_cast %4 : vector<1x8x8xf32> to vector<8x8xf32>
    %cst_6 = arith.constant dense<0.000000e+00> : vector<256x8xf32>
    %6 = tpu.matmul %3, %5, %cst_6 {dimension_numbers = #tpu.dot_dimension_numbers<[1], [0], [0], [1], [0, 0, 1, 1], [], []>} : vector<256x8xf32>, vector<8x8xf32>, vector<256x8xf32> -> vector<256x8xf32>
    %7 = arith.addf %0, %6 : vector<256x8xf32>
    %c0_7 = arith.constant 0 : index
    %c0_8 = arith.constant 0 : index
    %c1 = arith.constant 1 : index
    %c0_9 = arith.constant 0 : index
    %8 = vector.load %arg1[%c0_7, %c0_8, %c1, %c0_9] : memref<1x18x18x8xf32, #tpu.memory_space<vmem>>, vector<1x16x16x8xf32>
    %9 = vector.shape_cast %8 : vector<1x16x16x8xf32> to vector<16x16x8xf32>
    %10 = vector.shape_cast %9 : vector<16x16x8xf32> to vector<256x8xf32>
    %c1_10 = arith.constant 1 : index
    %c0_11 = arith.constant 0 : index
    %c0_12 = arith.constant 0 : index
    %11 = vector.load %arg2[%c1_10, %c0_11, %c0_12] : memref<9x8x8xf32, #tpu.memory_space<vmem>>, vector<1x8x8xf32>
    %12 = vector.shape_cast %11 : vector<1x8x8xf32> to vector<8x8xf32>
    %cst_13 = arith.constant dense<0.000000e+00> : vector<256x8xf32>
    %13 = tpu.matmul %10, %12, %cst_13 {dimension_numbers = #tpu.dot_dimension_numbers<[1], [0], [0], [1], [0, 0, 1, 1], [], []>} : vector<256x8xf32>, vector<8x8xf32>, vector<256x8xf32> -> vector<256x8xf32>
    %14 = arith.addf %7, %13 : vector<256x8xf32>
    %c0_14 = arith.constant 0 : index
    %c0_15 = arith.constant 0 : index
    %c2 = arith.constant 2 : index
    %c0_16 = arith.constant 0 : index
    %15 = vector.load %arg1[%c0_14, %c0_15, %c2, %c0_16] : memref<1x18x18x8xf32, #tpu.memory_space<vmem>>, vector<1x16x16x8xf32>
    %16 = vector.shape_cast %15 : vector<1x16x16x8xf32> to vector<16x16x8xf32>
    %17 = vector.shape_cast %16 : vector<16x16x8xf32> to vector<256x8xf32>
    %c2_17 = arith.constant 2 : index
    %c0_18 = arith.constant 0 : index
    %c0_19 = arith.constant 0 : index
    %18 = vector.load %arg2[%c2_17, %c0_18, %c0_19] : memref<9x8x8xf32, #tpu.memory_space<vmem>>, vector<1x8x8xf32>
    %19 = vector.shape_cast %18 : vector<1x8x8xf32> to vector<8x8xf32>
    %cst_20 = arith.constant dense<0.000000e+00> : vector<256x8xf32>
    %20 = tpu.matmul %17, %19, %cst_20 {dimension_numbers = #tpu.dot_dimension_numbers<[1], [0], [0], [1], [0, 0, 1, 1], [], []>} : vector<256x8xf32>, vector<8x8xf32>, vector<256x8xf32> -> vector<256x8xf32>
    %21 = arith.addf %14, %20 : vector<256x8xf32>
    %c0_21 = arith.constant 0 : index
    %c1_22 = arith.constant 1 : index
    %c0_23 = arith.constant 0 : index
    %c0_24 = arith.constant 0 : index
    %22 = vector.load %arg1[%c0_21, %c1_22, %c0_23, %c0_24] : memref<1x18x18x8xf32, #tpu.memory_space<vmem>>, vector<1x16x16x8xf32>
    %23 = vector.shape_cast %22 : vector<1x16x16x8xf32> to vector<16x16x8xf32>
    %24 = vector.shape_cast %23 : vector<16x16x8xf32> to vector<256x8xf32>
    %c3 = arith.constant 3 : index
    %c0_25 = arith.constant 0 : index
    %c0_26 = arith.constant 0 : index
    %25 = vector.load %arg2[%c3, %c0_25, %c0_26] : memref<9x8x8xf32, #tpu.memory_space<vmem>>, vector<1x8x8xf32>
    %26 = vector.shape_cast %25 : vector<1x8x8xf32> to vector<8x8xf32>
    %cst_27 = arith.constant dense<0.000000e+00> : vector<256x8xf32>
    %27 = tpu.matmul %24, %26, %cst_27 {dimension_numbers = #tpu.dot_dimension_numbers<[1], [0], [0], [1], [0, 0, 1, 1], [], []>} : vector<256x8xf32>, vector<8x8xf32>, vector<256x8xf32> -> vector<256x8xf32>
    %28 = arith.addf %21, %27 : vector<256x8xf32>
    %c0_28 = arith.constant 0 : index
    %c1_29 = arith.constant 1 : index
    %c1_30 = arith.constant 1 : index
    %c0_31 = arith.constant 0 : index
    %29 = vector.load %arg1[%c0_28, %c1_29, %c1_30, %c0_31] : memref<1x18x18x8xf32, #tpu.memory_space<vmem>>, vector<1x16x16x8xf32>
    %30 = vector.shape_cast %29 : vector<1x16x16x8xf32> to vector<16x16x8xf32>
    %31 = vector.shape_cast %30 : vector<16x16x8xf32> to vector<256x8xf32>
    %c4 = arith.constant 4 : index
    %c0_32 = arith.constant 0 : index
    %c0_33 = arith.constant 0 : index
    %32 = vector.load %arg2[%c4, %c0_32, %c0_33] : memref<9x8x8xf32, #tpu.memory_space<vmem>>, vector<1x8x8xf32>
    %33 = vector.shape_cast %32 : vector<1x8x8xf32> to vector<8x8xf32>
    %cst_34 = arith.constant dense<0.000000e+00> : vector<256x8xf32>
    %34 = tpu.matmul %31, %33, %cst_34 {dimension_numbers = #tpu.dot_dimension_numbers<[1], [0], [0], [1], [0, 0, 1, 1], [], []>} : vector<256x8xf32>, vector<8x8xf32>, vector<256x8xf32> -> vector<256x8xf32>
    %35 = arith.addf %28, %34 : vector<256x8xf32>
    %c0_35 = arith.constant 0 : index
    %c1_36 = arith.constant 1 : index
    %c2_37 = arith.constant 2 : index
    %c0_38 = arith.constant 0 : index
    %36 = vector.load %arg1[%c0_35, %c1_36, %c2_37, %c0_38] : memref<1x18x18x8xf32, #tpu.memory_space<vmem>>, vector<1x16x16x8xf32>
    %37 = vector.shape_cast %36 : vector<1x16x16x8xf32> to vector<16x16x8xf32>
    %38 = vector.shape_cast %37 : vector<16x16x8xf32> to vector<256x8xf32>
    %c5 = arith.constant 5 : index
    %c0_39 = arith.constant 0 : index
    %c0_40 = arith.constant 0 : index
    %39 = vector.load %arg2[%c5, %c0_39, %c0_40] : memref<9x8x8xf32, #tpu.memory_space<vmem>>, vector<1x8x8xf32>
    %40 = vector.shape_cast %39 : vector<1x8x8xf32> to vector<8x8xf32>
    %cst_41 = arith.constant dense<0.000000e+00> : vector<256x8xf32>
    %41 = tpu.matmul %38, %40, %cst_41 {dimension_numbers = #tpu.dot_dimension_numbers<[1], [0], [0], [1], [0, 0, 1, 1], [], []>} : vector<256x8xf32>, vector<8x8xf32>, vector<256x8xf32> -> vector<256x8xf32>
    %42 = arith.addf %35, %41 : vector<256x8xf32>
    %c0_42 = arith.constant 0 : index
    %c2_43 = arith.constant 2 : index
    %c0_44 = arith.constant 0 : index
    %c0_45 = arith.constant 0 : index
    %43 = vector.load %arg1[%c0_42, %c2_43, %c0_44, %c0_45] : memref<1x18x18x8xf32, #tpu.memory_space<vmem>>, vector<1x16x16x8xf32>
    %44 = vector.shape_cast %43 : vector<1x16x16x8xf32> to vector<16x16x8xf32>
    %45 = vector.shape_cast %44 : vector<16x16x8xf32> to vector<256x8xf32>
    %c6 = arith.constant 6 : index
    %c0_46 = arith.constant 0 : index
    %c0_47 = arith.constant 0 : index
    %46 = vector.load %arg2[%c6, %c0_46, %c0_47] : memref<9x8x8xf32, #tpu.memory_space<vmem>>, vector<1x8x8xf32>
    %47 = vector.shape_cast %46 : vector<1x8x8xf32> to vector<8x8xf32>
    %cst_48 = arith.constant dense<0.000000e+00> : vector<256x8xf32>
    %48 = tpu.matmul %45, %47, %cst_48 {dimension_numbers = #tpu.dot_dimension_numbers<[1], [0], [0], [1], [0, 0, 1, 1], [], []>} : vector<256x8xf32>, vector<8x8xf32>, vector<256x8xf32> -> vector<256x8xf32>
    %49 = arith.addf %42, %48 : vector<256x8xf32>
    %c0_49 = arith.constant 0 : index
    %c2_50 = arith.constant 2 : index
    %c1_51 = arith.constant 1 : index
    %c0_52 = arith.constant 0 : index
    %50 = vector.load %arg1[%c0_49, %c2_50, %c1_51, %c0_52] : memref<1x18x18x8xf32, #tpu.memory_space<vmem>>, vector<1x16x16x8xf32>
    %51 = vector.shape_cast %50 : vector<1x16x16x8xf32> to vector<16x16x8xf32>
    %52 = vector.shape_cast %51 : vector<16x16x8xf32> to vector<256x8xf32>
    %c7 = arith.constant 7 : index
    %c0_53 = arith.constant 0 : index
    %c0_54 = arith.constant 0 : index
    %53 = vector.load %arg2[%c7, %c0_53, %c0_54] : memref<9x8x8xf32, #tpu.memory_space<vmem>>, vector<1x8x8xf32>
    %54 = vector.shape_cast %53 : vector<1x8x8xf32> to vector<8x8xf32>
    %cst_55 = arith.constant dense<0.000000e+00> : vector<256x8xf32>
    %55 = tpu.matmul %52, %54, %cst_55 {dimension_numbers = #tpu.dot_dimension_numbers<[1], [0], [0], [1], [0, 0, 1, 1], [], []>} : vector<256x8xf32>, vector<8x8xf32>, vector<256x8xf32> -> vector<256x8xf32>
    %56 = arith.addf %49, %55 : vector<256x8xf32>
    %c0_56 = arith.constant 0 : index
    %c2_57 = arith.constant 2 : index
    %c2_58 = arith.constant 2 : index
    %c0_59 = arith.constant 0 : index
    %57 = vector.load %arg1[%c0_56, %c2_57, %c2_58, %c0_59] : memref<1x18x18x8xf32, #tpu.memory_space<vmem>>, vector<1x16x16x8xf32>
    %58 = vector.shape_cast %57 : vector<1x16x16x8xf32> to vector<16x16x8xf32>
    %59 = vector.shape_cast %58 : vector<16x16x8xf32> to vector<256x8xf32>
    %c8 = arith.constant 8 : index
    %c0_60 = arith.constant 0 : index
    %c0_61 = arith.constant 0 : index
    %60 = vector.load %arg2[%c8, %c0_60, %c0_61] : memref<9x8x8xf32, #tpu.memory_space<vmem>>, vector<1x8x8xf32>
    %61 = vector.shape_cast %60 : vector<1x8x8xf32> to vector<8x8xf32>
    %cst_62 = arith.constant dense<0.000000e+00> : vector<256x8xf32>
    %62 = tpu.matmul %59, %61, %cst_62 {dimension_numbers = #tpu.dot_dimension_numbers<[1], [0], [0], [1], [0, 0, 1, 1], [], []>} : vector<256x8xf32>, vector<8x8xf32>, vector<256x8xf32> -> vector<256x8xf32>
    %63 = arith.addf %56, %62 : vector<256x8xf32>
    %c0_63 = arith.constant 0 : index
    %c0_64 = arith.constant 0 : index
    %64 = vector.load %arg3[%c0_63, %c0_64] : memref<1x8xf32, #tpu.memory_space<vmem>>, vector<1x8xf32>
    %65 = vector.broadcast %64 : vector<1x8xf32> to vector<256x8xf32>
    %66 = arith.addf %63, %65 : vector<256x8xf32>
    %cst_65 = arith.constant 0.000000e+00 : f32
    %67 = vector.broadcast %cst_65 : f32 to vector<256x8xf32>
    %68 = arith.maximumf %66, %67 : vector<256x8xf32>
    %cst_66 = arith.constant 0.000000e+00 : f32
    %69 = vector.broadcast %cst_66 : f32 to vector<18x18x8xf32>
    %c0_67 = arith.constant 0 : index
    %c0_68 = arith.constant 0 : index
    %c0_69 = arith.constant 0 : index
    %70 = vector.load %arg7[%c0_67, %c0_68, %c0_69] : memref<18x18x8xf32, #tpu.memory_space<vmem>>, vector<18x18x8xf32>
    tpu.vector_store %arg7[%c0_67, %c0_68, %c0_69], %69 {strides = array<i32>} : memref<18x18x8xf32, #tpu.memory_space<vmem>>, vector<18x18x8xf32>,
    %71 = vector.shape_cast %68 : vector<256x8xf32> to vector<16x16x8xf32>
    %c1_70 = arith.constant 1 : index
    %c1_71 = arith.constant 1 : index
    %c0_72 = arith.constant 0 : index
    %72 = vector.load %arg7[%c1_70, %c1_71, %c0_72] : memref<18x18x8xf32, #tpu.memory_space<vmem>>, vector<16x16x8xf32>
    tpu.vector_store %arg7[%c1_70, %c1_71, %c0_72], %71 {strides = array<i32>} : memref<18x18x8xf32, #tpu.memory_space<vmem>>, vector<16x16x8xf32>,
    %cst_73 = arith.constant 0.000000e+00 : f32
    %73 = vector.broadcast %cst_73 : f32 to vector<256x8xf32>
    %c0_74 = arith.constant 0 : index
    %c0_75 = arith.constant 0 : index
    %c0_76 = arith.constant 0 : index
    %74 = vector.load %arg7[%c0_74, %c0_75, %c0_76] : memref<18x18x8xf32, #tpu.memory_space<vmem>>, vector<16x16x8xf32>
    %75 = vector.shape_cast %74 : vector<16x16x8xf32> to vector<256x8xf32>
    %c0_77 = arith.constant 0 : index
    %c0_78 = arith.constant 0 : index
    %c0_79 = arith.constant 0 : index
    %76 = vector.load %arg4[%c0_77, %c0_78, %c0_79] : memref<9x8x8xf32, #tpu.memory_space<vmem>>, vector<1x8x8xf32>
    %77 = vector.shape_cast %76 : vector<1x8x8xf32> to vector<8x8xf32>
    %cst_80 = arith.constant dense<0.000000e+00> : vector<256x8xf32>
    %78 = tpu.matmul %75, %77, %cst_80 {dimension_numbers = #tpu.dot_dimension_numbers<[1], [0], [0], [1], [0, 0, 1, 1], [], []>} : vector<256x8xf32>, vector<8x8xf32>, vector<256x8xf32> -> vector<256x8xf32>
    %79 = arith.addf %73, %78 : vector<256x8xf32>
    %c0_81 = arith.constant 0 : index
    %c1_82 = arith.constant 1 : index
    %c0_83 = arith.constant 0 : index
    %80 = vector.load %arg7[%c0_81, %c1_82, %c0_83] : memref<18x18x8xf32, #tpu.memory_space<vmem>>, vector<16x16x8xf32>
    %81 = vector.shape_cast %80 : vector<16x16x8xf32> to vector<256x8xf32>
    %c1_84 = arith.constant 1 : index
    %c0_85 = arith.constant 0 : index
    %c0_86 = arith.constant 0 : index
    %82 = vector.load %arg4[%c1_84, %c0_85, %c0_86] : memref<9x8x8xf32, #tpu.memory_space<vmem>>, vector<1x8x8xf32>
    %83 = vector.shape_cast %82 : vector<1x8x8xf32> to vector<8x8xf32>
    %cst_87 = arith.constant dense<0.000000e+00> : vector<256x8xf32>
    %84 = tpu.matmul %81, %83, %cst_87 {dimension_numbers = #tpu.dot_dimension_numbers<[1], [0], [0], [1], [0, 0, 1, 1], [], []>} : vector<256x8xf32>, vector<8x8xf32>, vector<256x8xf32> -> vector<256x8xf32>
    %85 = arith.addf %79, %84 : vector<256x8xf32>
    %c0_88 = arith.constant 0 : index
    %c2_89 = arith.constant 2 : index
    %c0_90 = arith.constant 0 : index
    %86 = vector.load %arg7[%c0_88, %c2_89, %c0_90] : memref<18x18x8xf32, #tpu.memory_space<vmem>>, vector<16x16x8xf32>
    %87 = vector.shape_cast %86 : vector<16x16x8xf32> to vector<256x8xf32>
    %c2_91 = arith.constant 2 : index
    %c0_92 = arith.constant 0 : index
    %c0_93 = arith.constant 0 : index
    %88 = vector.load %arg4[%c2_91, %c0_92, %c0_93] : memref<9x8x8xf32, #tpu.memory_space<vmem>>, vector<1x8x8xf32>
    %89 = vector.shape_cast %88 : vector<1x8x8xf32> to vector<8x8xf32>
    %cst_94 = arith.constant dense<0.000000e+00> : vector<256x8xf32>
    %90 = tpu.matmul %87, %89, %cst_94 {dimension_numbers = #tpu.dot_dimension_numbers<[1], [0], [0], [1], [0, 0, 1, 1], [], []>} : vector<256x8xf32>, vector<8x8xf32>, vector<256x8xf32> -> vector<256x8xf32>
    %91 = arith.addf %85, %90 : vector<256x8xf32>
    %c1_95 = arith.constant 1 : index
    %c0_96 = arith.constant 0 : index
    %c0_97 = arith.constant 0 : index
    %92 = vector.load %arg7[%c1_95, %c0_96, %c0_97] : memref<18x18x8xf32, #tpu.memory_space<vmem>>, vector<16x16x8xf32>
    %93 = vector.shape_cast %92 : vector<16x16x8xf32> to vector<256x8xf32>
    %c3_98 = arith.constant 3 : index
    %c0_99 = arith.constant 0 : index
    %c0_100 = arith.constant 0 : index
    %94 = vector.load %arg4[%c3_98, %c0_99, %c0_100] : memref<9x8x8xf32, #tpu.memory_space<vmem>>, vector<1x8x8xf32>
    %95 = vector.shape_cast %94 : vector<1x8x8xf32> to vector<8x8xf32>
    %cst_101 = arith.constant dense<0.000000e+00> : vector<256x8xf32>
    %96 = tpu.matmul %93, %95, %cst_101 {dimension_numbers = #tpu.dot_dimension_numbers<[1], [0], [0], [1], [0, 0, 1, 1], [], []>} : vector<256x8xf32>, vector<8x8xf32>, vector<256x8xf32> -> vector<256x8xf32>
    %97 = arith.addf %91, %96 : vector<256x8xf32>
    %c1_102 = arith.constant 1 : index
    %c1_103 = arith.constant 1 : index
    %c0_104 = arith.constant 0 : index
    %98 = vector.load %arg7[%c1_102, %c1_103, %c0_104] : memref<18x18x8xf32, #tpu.memory_space<vmem>>, vector<16x16x8xf32>
    %99 = vector.shape_cast %98 : vector<16x16x8xf32> to vector<256x8xf32>
    %c4_105 = arith.constant 4 : index
    %c0_106 = arith.constant 0 : index
    %c0_107 = arith.constant 0 : index
    %100 = vector.load %arg4[%c4_105, %c0_106, %c0_107] : memref<9x8x8xf32, #tpu.memory_space<vmem>>, vector<1x8x8xf32>
    %101 = vector.shape_cast %100 : vector<1x8x8xf32> to vector<8x8xf32>
    %cst_108 = arith.constant dense<0.000000e+00> : vector<256x8xf32>
    %102 = tpu.matmul %99, %101, %cst_108 {dimension_numbers = #tpu.dot_dimension_numbers<[1], [0], [0], [1], [0, 0, 1, 1], [], []>} : vector<256x8xf32>, vector<8x8xf32>, vector<256x8xf32> -> vector<256x8xf32>
    %103 = arith.addf %97, %102 : vector<256x8xf32>
    %c1_109 = arith.constant 1 : index
    %c2_110 = arith.constant 2 : index
    %c0_111 = arith.constant 0 : index
    %104 = vector.load %arg7[%c1_109, %c2_110, %c0_111] : memref<18x18x8xf32, #tpu.memory_space<vmem>>, vector<16x16x8xf32>
    %105 = vector.shape_cast %104 : vector<16x16x8xf32> to vector<256x8xf32>
    %c5_112 = arith.constant 5 : index
    %c0_113 = arith.constant 0 : index
    %c0_114 = arith.constant 0 : index
    %106 = vector.load %arg4[%c5_112, %c0_113, %c0_114] : memref<9x8x8xf32, #tpu.memory_space<vmem>>, vector<1x8x8xf32>
    %107 = vector.shape_cast %106 : vector<1x8x8xf32> to vector<8x8xf32>
    %cst_115 = arith.constant dense<0.000000e+00> : vector<256x8xf32>
    %108 = tpu.matmul %105, %107, %cst_115 {dimension_numbers = #tpu.dot_dimension_numbers<[1], [0], [0], [1], [0, 0, 1, 1], [], []>} : vector<256x8xf32>, vector<8x8xf32>, vector<256x8xf32> -> vector<256x8xf32>
    %109 = arith.addf %103, %108 : vector<256x8xf32>
    %c2_116 = arith.constant 2 : index
    %c0_117 = arith.constant 0 : index
    %c0_118 = arith.constant 0 : index
    %110 = vector.load %arg7[%c2_116, %c0_117, %c0_118] : memref<18x18x8xf32, #tpu.memory_space<vmem>>, vector<16x16x8xf32>
    %111 = vector.shape_cast %110 : vector<16x16x8xf32> to vector<256x8xf32>
    %c6_119 = arith.constant 6 : index
    %c0_120 = arith.constant 0 : index
    %c0_121 = arith.constant 0 : index
    %112 = vector.load %arg4[%c6_119, %c0_120, %c0_121] : memref<9x8x8xf32, #tpu.memory_space<vmem>>, vector<1x8x8xf32>
    %113 = vector.shape_cast %112 : vector<1x8x8xf32> to vector<8x8xf32>
    %cst_122 = arith.constant dense<0.000000e+00> : vector<256x8xf32>
    %114 = tpu.matmul %111, %113, %cst_122 {dimension_numbers = #tpu.dot_dimension_numbers<[1], [0], [0], [1], [0, 0, 1, 1], [], []>} : vector<256x8xf32>, vector<8x8xf32>, vector<256x8xf32> -> vector<256x8xf32>
    %115 = arith.addf %109, %114 : vector<256x8xf32>
    %c2_123 = arith.constant 2 : index
    %c1_124 = arith.constant 1 : index
    %c0_125 = arith.constant 0 : index
    %116 = vector.load %arg7[%c2_123, %c1_124, %c0_125] : memref<18x18x8xf32, #tpu.memory_space<vmem>>, vector<16x16x8xf32>
    %117 = vector.shape_cast %116 : vector<16x16x8xf32> to vector<256x8xf32>
    %c7_126 = arith.constant 7 : index
    %c0_127 = arith.constant 0 : index
    %c0_128 = arith.constant 0 : index
    %118 = vector.load %arg4[%c7_126, %c0_127, %c0_128] : memref<9x8x8xf32, #tpu.memory_space<vmem>>, vector<1x8x8xf32>
    %119 = vector.shape_cast %118 : vector<1x8x8xf32> to vector<8x8xf32>
    %cst_129 = arith.constant dense<0.000000e+00> : vector<256x8xf32>
    %120 = tpu.matmul %117, %119, %cst_129 {dimension_numbers = #tpu.dot_dimension_numbers<[1], [0], [0], [1], [0, 0, 1, 1], [], []>} : vector<256x8xf32>, vector<8x8xf32>, vector<256x8xf32> -> vector<256x8xf32>
    %121 = arith.addf %115, %120 : vector<256x8xf32>
    %c2_130 = arith.constant 2 : index
    %c2_131 = arith.constant 2 : index
    %c0_132 = arith.constant 0 : index
    %122 = vector.load %arg7[%c2_130, %c2_131, %c0_132] : memref<18x18x8xf32, #tpu.memory_space<vmem>>, vector<16x16x8xf32>
    %123 = vector.shape_cast %122 : vector<16x16x8xf32> to vector<256x8xf32>
    %c8_133 = arith.constant 8 : index
    %c0_134 = arith.constant 0 : index
    %c0_135 = arith.constant 0 : index
    %124 = vector.load %arg4[%c8_133, %c0_134, %c0_135] : memref<9x8x8xf32, #tpu.memory_space<vmem>>, vector<1x8x8xf32>
    %125 = vector.shape_cast %124 : vector<1x8x8xf32> to vector<8x8xf32>
    %cst_136 = arith.constant dense<0.000000e+00> : vector<256x8xf32>
    %126 = tpu.matmul %123, %125, %cst_136 {dimension_numbers = #tpu.dot_dimension_numbers<[1], [0], [0], [1], [0, 0, 1, 1], [], []>} : vector<256x8xf32>, vector<8x8xf32>, vector<256x8xf32> -> vector<256x8xf32>
    %127 = arith.addf %121, %126 : vector<256x8xf32>
    %c0_137 = arith.constant 0 : index
    %c1_138 = arith.constant 1 : index
    %c1_139 = arith.constant 1 : index
    %c0_140 = arith.constant 0 : index
    %128 = vector.load %arg1[%c0_137, %c1_138, %c1_139, %c0_140] : memref<1x18x18x8xf32, #tpu.memory_space<vmem>>, vector<1x16x16x8xf32>
    %129 = vector.shape_cast %128 : vector<1x16x16x8xf32> to vector<16x16x8xf32>
    %130 = vector.shape_cast %129 : vector<16x16x8xf32> to vector<256x8xf32>
    %c0_141 = arith.constant 0 : index
    %c0_142 = arith.constant 0 : index
    %131 = vector.load %arg5[%c0_141, %c0_142] : memref<1x8xf32, #tpu.memory_space<vmem>>, vector<1x8xf32>
    %132 = vector.broadcast %131 : vector<1x8xf32> to vector<256x8xf32>
    %133 = arith.addf %127, %132 : vector<256x8xf32>
    %134 = arith.addf %133, %130 : vector<256x8xf32>
    %cst_143 = arith.constant 0.000000e+00 : f32
    %135 = vector.broadcast %cst_143 : f32 to vector<256x8xf32>
    %136 = arith.maximumf %134, %135 : vector<256x8xf32>
    %c0_144 = arith.constant 0 : index
    %c0_145 = arith.constant 0 : index
    %c0_146 = arith.constant 0 : index
    %137 = vector.load %arg6[%c0_144, %c0_145, %c0_146] : memref<1x256x8xf32, #tpu.memory_space<vmem>>, vector<1x256x8xf32>
    %138 = vector.shape_cast %137 : vector<1x256x8xf32> to vector<256x8xf32>
    %139 = vector.shape_cast %136 : vector<256x8xf32> to vector<1x256x8xf32>
    tpu.vector_store %arg6[%c0_144, %c0_145, %c0_146], %139 {strides = array<i32>} : memref<1x256x8xf32, #tpu.memory_space<vmem>>, vector<1x256x8xf32>,
    return
  }
  func.func @transform_0(%arg0: i32) -> (i32, i32, i32, i32) {
    %c0_i32 = arith.constant 0 : i32
    %c0_i32_0 = arith.constant 0 : i32
    %c0_i32_1 = arith.constant 0 : i32
    %c0_i32_2 = arith.constant 0 : i32
    return %arg0, %c0_i32, %c0_i32_0, %c0_i32_1 : i32, i32, i32, i32
  }
  func.func @transform_1(%arg0: i32) -> (i32, i32, i32) {
    %c0_i32 = arith.constant 0 : i32
    %c0_i32_0 = arith.constant 0 : i32
    %c0_i32_1 = arith.constant 0 : i32
    %c0_i32_2 = arith.constant 0 : i32
    return %c0_i32, %c0_i32_0, %c0_i32_1 : i32, i32, i32
  }
  func.func @transform_2(%arg0: i32) -> (i32, i32) {
    %c0_i32 = arith.constant 0 : i32
    %c0_i32_0 = arith.constant 0 : i32
    %c0_i32_1 = arith.constant 0 : i32
    return %c0_i32, %c0_i32_0 : i32, i32
  }
  func.func @transform_3(%arg0: i32) -> (i32, i32, i32) {
    %c0_i32 = arith.constant 0 : i32
    %c0_i32_0 = arith.constant 0 : i32
    %c0_i32_1 = arith.constant 0 : i32
    %c0_i32_2 = arith.constant 0 : i32
    return %c0_i32, %c0_i32_0, %c0_i32_1 : i32, i32, i32
  }
  func.func @transform_4(%arg0: i32) -> (i32, i32) {
    %c0_i32 = arith.constant 0 : i32
    %c0_i32_0 = arith.constant 0 : i32
    %c0_i32_1 = arith.constant 0 : i32
    return %c0_i32, %c0_i32_0 : i32, i32
  }
  func.func @transform_5(%arg0: i32) -> (i32, i32, i32) {
    %c0_i32 = arith.constant 0 : i32
    %c0_i32_0 = arith.constant 0 : i32
    %c0_i32_1 = arith.constant 0 : i32
    return %arg0, %c0_i32, %c0_i32_0 : i32, i32, i32
  }
}

</mosaic_0001>

<bundles_post_ra>
// kernel: basic_block_forward.1
= control target key start
LH: loop header
LB: loop body
LE: loop exit
PB: predicated region body
PF: predicated region fallthrough
CT: control target
= control target key end

     0   :  { %s10330_s18 = smov 0   ;;  %s12299_s0 = inlined_call_operand.vmem [shape: f32[2,18,18,8], index: 0, kind: input, shape index: {}]   ;;  %s12300_s1 = inlined_call_operand.vmem [shape: f32[9,8,8], index: 1, kind: input, shape index: {}]   ;;  %s12301_s2 = inlined_call_operand.vmem [shape: f32[1,8], index: 2, kind: input, shape index: {}]   ;;  %s12302_s3 = inlined_call_operand.vmem [shape: f32[9,8,8], index: 3, kind: input, shape index: {}]   ;;  %s12303_s4 = inlined_call_operand.vmem [shape: f32[1,8], index: 4, kind: input, shape index: {}]   ;;  %s12304_s5 = inlined_call_operand.vmem [shape: f32[2,256,8], index: 5, kind: output, shape index: {}]  }
   0x1 LB: > { %s7446_s19 = sadd.s32 4294967295, %s10297_s18   ;;  %p7450_p0 = scmp.ge.s32.totalorder %s10297_s18, 1  ;;  %s10297_s18 = sphi %s10330_s18, %s15_s18  }
   0x2   : > { %p187_p1 = scmp.lt.s32.totalorder %s10297_s18, 3 }
   0x4   : > { %p188_p2 = pnand %p7450_p0, %p187_p1 }
   0x6   : > { %191 = sbr.rel (%p188_p2) target bundleno = 1547 (0x60b), region = 40 }
   0xd   : > { %v7454_v0 = vld [vmem:[%s12300_s1 + $0x8] sm:$0xff]  ;;  %p215_p3 = scmp.lt.s32.totalorder %s7446_s19, 1  ;;  %v257_v1 = vld [vmem:[%s12300_s1] sm:$0xff]  ;;  %vm292_vm0 = vcmask 64512   ;;  %v10361_v5 = vld [vmem:[%s12300_s1 + $0x10] sm:$0xff]  ;;  %vm3719_vm1 = vcmask 58368  }
   0xe   : > { %8869 = vmatprep.subr.mxu0 %v7454_v0  ;;  %v10521_v38 = vld [vmem:[%s12300_s1 + $0x18] sm:$0xff] }
   0xf   : > { %8870 = vmatpush3.msra.mxu0 %v7454_v0  ;;  %s12590_s19 = smov (!%p215_p3, %s7446_s19), 1 }
  0x10   : > { %8919 = vmatprep.subr.mxu0 %v257_v1  ;;  %s10281_s24 = smul.u32 432, %s12590_s19  ;;  %s8274_s17 = sshll.u32 %s12590_s19, 8 }
  0x11   : > { %s12170_s22 = scalar_lea.vmem %s12304_s5, %s8274_s17 }
  0x12   : > { %s10350_s27 = scalar_lea.vmem %s12299_s0, %s10281_s24 }
  0x13   : > { %v258_v2 = vld [vmem:[%s10350_s27 + $0x1] sm:$0xff]  ;;  %v259_v3 = vld [vmem:[%s10350_s27 + $0x9] sm:$0xff]  ;;  %v10355_v4 = vld [vmem:[%s10350_s27 + $0x19] sm:$0xff] }
  0x14   : > { %8871 = vmatprep.mubr.msk.f32.mxu0 %vm292_vm0, %v258_v2  ;;  %v10367_v6 = vld [vmem:[%s10350_s27 + $0x21] sm:$0xff]  ;;  %v10370_v7 = vld [vmem:[%s10350_s27 + $0x31] sm:$0xff]  ;;  %v10378_v8 = vld [vmem:[%s10350_s27 + $0x39] sm:$0xff] }
  0x15   : > { %8872 = vmatmul.mubr.msk.f32.vlgmr.msra.gmra.mrb[0].mxu0 %vm292_vm0, %v259_v3  ;;  %v10381_v9 = vld [vmem:[%s10350_s27 + $0x49] sm:$0xff]  ;;  %v10388_v10 = vld [vmem:[%s10350_s27 + $0x51] sm:$0xff]  ;;  %v10391_v11 = vld [vmem:[%s10350_s27 + $0x61] sm:$0xff] }
  0x16   : > { %8920 = vmatpush3.msra.mxu0 %v257_v1  ;;  %8874 = vmatprep.mubr.msk.f32.mxu0 %vm292_vm0, %v10355_v4  ;;  %v10398_v12 = vld [vmem:[%s10350_s27 + $0x69] sm:$0xff]  ;;  %v10401_v13 = vld [vmem:[%s10350_s27 + $0x79] sm:$0xff]  ;;  %v10408_v14 = vld [vmem:[%s10350_s27 + $0x81] sm:$0xff] }
  0x17   : > { %8969 = vmatprep.subr.mxu0 %v10361_v5  ;;  %v10411_v15 = vld [vmem:[%s10350_s27 + $0x91] sm:$0xff]  ;;  %v10418_v16 = vld [vmem:[%s10350_s27 + $0x99] sm:$0xff]  ;;  %v10421_v17 = vld [vmem:[%s10350_s27 + $0xa9] sm:$0xff] }
  0x18   : > { %v10428_v18 = vld [vmem:[%s10350_s27 + $0xb1] sm:$0xff]  ;;  %v10431_v19 = vld [vmem:[%s10350_s27 + $0xc1] sm:$0xff]  ;;  %v10438_v20 = vld [vmem:[%s10350_s27 + $0xc9] sm:$0xff] }
  0x19   : > { %8875 = vmatmul.mubr.msk.f32.gmra.mrb[2].mxu0 %vm292_vm0, %v10367_v6  ;;  %v10441_v21 = vld [vmem:[%s10350_s27 + $0xd9] sm:$0xff]  ;;  %v10448_v22 = vld [vmem:[%s10350_s27 + $0xe1] sm:$0xff]  ;;  %v10451_v23 = vld [vmem:[%s10350_s27 + $0xf1] sm:$0xff] }
  0x1a   : > { %8877 = vmatprep.mubr.msk.f32.mxu0 %vm292_vm0, %v10370_v7  ;;  %v10458_v24 = vld [vmem:[%s10350_s27 + $0xf9] sm:$0xff]  ;;  %v10461_v25 = vld [vmem:[%s10350_s27 + $0x109] sm:$0xff]  ;;  %v10468_v26 = vld [vmem:[%s10350_s27 + $0x111] sm:$0xff] }
  0x1b   : > { %v10471_v27 = vld [vmem:[%s10350_s27 + $0x121] sm:$0xff]  ;;  %v10478_v28 = vld [vmem:[%s10350_s27 + $0x129] sm:$0xff]  ;;  %v10481_v29 = vld [vmem:[%s10350_s27 + $0x139] sm:$0xff] }
  0x1c   : > { %12422 = vst [vmem:[#allocation3_spill] sm:$0xff] %v10471_v27  ;;  %12423 = vst [vmem:[#allocation4_spill] sm:$0xff] %v10478_v28  ;;  %v10488_v30 = vld [vmem:[%s10350_s27 + $0x141] sm:$0xff]  ;;  %v10491_v31 = vld [vmem:[%s10350_s27 + $0x151] sm:$0xff] }
  0x1d   : > { %8878 = vmatmul.mubr.msk.f32.gmra.mrb[4].mxu0 %vm292_vm0, %v10378_v8  ;;  %12424 = vst [vmem:[#allocation5_spill] sm:$0xff] %v10481_v29  ;;  %12425 = vst [vmem:[#allocation6_spill] sm:$0xff] %v10488_v30  ;;  %v10498_v32 = vld [vmem:[%s10350_s27 + $0x159] sm:$0xff]  ;;  %v10501_v33 = vld [vmem:[%s10350_s27 + $0x169] sm:$0xff] }
  0x1e   : > { %8880 = vmatprep.mubr.msk.f32.mxu0 %vm292_vm0, %v10381_v9  ;;  %12426 = vst [vmem:[#allocation7_spill] sm:$0xff] %v10491_v31  ;;  %12427 = vst [vmem:[#allocation8_spill] sm:$0xff] %v10498_v32  ;;  %v10508_v34 = vld [vmem:[%s10350_s27 + $0x171] sm:$0xff]  ;;  %v225_v35 = vld [vmem:[%s10350_s27] sm:$0xff] }
  0x1f   : > { %12428 = vst [vmem:[#allocation9_spill] sm:$0xff] %v10501_v33  ;;  %12429 = vst [vmem:[#allocation10_spill] sm:$0xff] %v10508_v34  ;;  %v226_v36 = vld [vmem:[%s10350_s27 + $0x8] sm:$0xff]  ;;  %v10516_v37 = vld [vmem:[%s10350_s27 + $0x18] sm:$0xff] }
  0x20   : > { %v10528_v39 = vld [vmem:[%s10350_s27 + $0x20] sm:$0xff]  ;;  %v10531_v40 = vld [vmem:[%s10350_s27 + $0x30] sm:$0xff]  ;;  %v10539_v41 = vld [vmem:[%s10350_s27 + $0x38] sm:$0xff] }
  0x21   : > { %8881 = vmatmul.mubr.msk.f32.gmra.mrb[6].mxu0 %vm292_vm0, %v10388_v10  ;;  %v10542_v42 = vld [vmem:[%s10350_s27 + $0x48] sm:$0xff]  ;;  %v10549_v43 = vld [vmem:[%s10350_s27 + $0x50] sm:$0xff]  ;;  %v10552_v44 = vld [vmem:[%s10350_s27 + $0x60] sm:$0xff] }
  0x22   : > { %8883 = vmatprep.mubr.msk.f32.mxu0 %vm292_vm0, %v10391_v11  ;;  %v10559_v45 = vld [vmem:[%s10350_s27 + $0x68] sm:$0xff]  ;;  %v10562_v46 = vld [vmem:[%s10350_s27 + $0x78] sm:$0xff]  ;;  %v10569_v47 = vld [vmem:[%s10350_s27 + $0x80] sm:$0xff] }
  0x23   : > { %v10572_v48 = vld [vmem:[%s10350_s27 + $0x90] sm:$0xff]  ;;  %v10579_v49 = vld [vmem:[%s10350_s27 + $0x98] sm:$0xff]  ;;  %v10582_v50 = vld [vmem:[%s10350_s27 + $0xa8] sm:$0xff] }
  0x24   : > { %v10589_v51 = vld [vmem:[%s10350_s27 + $0xb0] sm:$0xff]  ;;  %v10592_v52 = vld [vmem:[%s10350_s27 + $0xc0] sm:$0xff]  ;;  %v10599_v53 = vld [vmem:[%s10350_s27 + $0xc8] sm:$0xff] }
  0x25   : > { %8884 = vmatmul.mubr.msk.f32.gmra.mrb[8].mxu0 %vm292_vm0, %v10398_v12  ;;  %v10602_v54 = vld [vmem:[%s10350_s27 + $0xd8] sm:$0xff]  ;;  %v10609_v55 = vld [vmem:[%s10350_s27 + $0xe0] sm:$0xff]  ;;  %v10612_v56 = vld [vmem:[%s10350_s27 + $0xf0] sm:$0xff] }
  0x26   : > { %8886 = vmatprep.mubr.msk.f32.mxu0 %vm292_vm0, %v10401_v13  ;;  %v10619_v57 = vld [vmem:[%s10350_s27 + $0xf8] sm:$0xff]  ;;  %v10622_v58 = vld [vmem:[%s10350_s27 + $0x108] sm:$0xff]  ;;  %v10629_v59 = vld [vmem:[%s10350_s27 + $0x110] sm:$0xff] }
  0x27   : > { %v10632_v60 = vld [vmem:[%s10350_s27 + $0x120] sm:$0xff]  ;;  %v10639_v61 = vld [vmem:[%s10350_s27 + $0x128] sm:$0xff]  ;;  %v10642_v62 = vld [vmem:[%s10350_s27 + $0x138] sm:$0xff] }
  0x28   : > { %v10649_v63 = vld [vmem:[%s10350_s27 + $0x140] sm:$0xff]  ;;  %v10652_v0 = vld [vmem:[%s10350_s27 + $0x150] sm:$0xff]  ;;  %v10659_v1 = vld [vmem:[%s10350_s27 + $0x158] sm:$0xff] }
  0x29   : > { %8887 = vmatmul.mubr.msk.f32.gmra.mrb[10].mxu0 %vm292_vm0, %v10408_v14  ;;  %v10662_v2 = vld [vmem:[%s10350_s27 + $0x168] sm:$0xff]  ;;  %v10669_v3 = vld [vmem:[%s10350_s27 + $0x170] sm:$0xff] }
  0x2a   : > { %8889 = vmatprep.mubr.msk.f32.mxu0 %vm292_vm0, %v10411_v15 }
  0x2d   : > { %8890 = vmatmul.mubr.msk.f32.gmra.mrb[12].mxu0 %vm292_vm0, %v10418_v16 }
  0x2e   : > { %8892 = vmatprep.mubr.msk.f32.mxu0 %vm292_vm0, %v10421_v17 }
  0x31   : > { %8893 = vmatmul.mubr.msk.f32.gmra.mrb[14].mxu0 %vm292_vm0, %v10428_v18 }
  0x32   : > { %8895 = vmatprep.mubr.msk.f32.mxu0 %vm292_vm0, %v10431_v19 }
  0x35   : > { %8896 = vmatmul.mubr.msk.f32.gmra.mrb[16].mxu0 %vm292_vm0, %v10438_v20 }
  0x36   : > { %8898 = vmatprep.mubr.msk.f32.mxu0 %vm292_vm0, %v10441_v21 }
  0x39   : > { %8899 = vmatmul.mubr.msk.f32.gmra.mrb[18].mxu0 %vm292_vm0, %v10448_v22 }
  0x3a   : > { %8901 = vmatprep.mubr.msk.f32.mxu0 %vm292_vm0, %v10451_v23 }
  0x3d   : > { %8902 = vmatmul.mubr.msk.f32.gmra.mrb[20].mxu0 %vm292_vm0, %v10458_v24 }
  0x3e   : > { %8904 = vmatprep.mubr.msk.f32.mxu0 %vm292_vm0, %v10461_v25 }
  0x41   : > { %8905 = vmatmul.mubr.msk.f32.gmra.mrb[22].mxu0 %vm292_vm0, %v10468_v26 }
  0x42   : > { %8907 = vmatprep.mubr.msk.f32.mxu0 %vm292_vm0, %v10471_v27 }
  0x45   : > { %8908 = vmatmul.mubr.msk.f32.gmra.mrb[24].mxu0 %vm292_vm0, %v10478_v28 }
  0x46   : > { %8910 = vmatprep.mubr.msk.f32.mxu0 %vm292_vm0, %v10481_v29 }
  0x49   : > { %8911 = vmatmul.mubr.msk.f32.gmra.mrb[26].mxu0 %vm292_vm0, %v10488_v30 }
  0x4a   : > { %8913 = vmatprep.mubr.msk.f32.mxu0 %vm292_vm0, %v10491_v31 }
  0x4d   : > { %8914 = vmatmul.mubr.msk.f32.gmra.mrb[28].mxu0 %vm292_vm0, %v10498_v32  ;;  %v10713_v32 = vld [vmem:[%s10350_s27 + $0x62] sm:$0xff] }
  0x4e   : > { %8916 = vmatprep.mubr.msk.f32.mxu0 %vm292_vm0, %v10501_v33  ;;  %v10692_v33 = vld [vmem:[%s10350_s27 + $0x32] sm:$0xff]  ;;  %12436 = vst [vmem:[#allocation17_spill] sm:$0xff] %v10713_v32 }
  0x4f   : > { %12432 = vst [vmem:[#allocation13_spill] sm:$0xff] %v10692_v33 }
  0x51   : > { %8917 = vmatmul.mubr.msk.f32.gmra.mrb[30].mxu0 %vm292_vm0, %v10508_v34  ;;  %v10682_v34 = vld [vmem:[%s12300_s1 + $0x20] sm:$0xff] }
  0x52   : > { %8921 = vmatprep.mubr.msk.f32.mxu0 %vm292_vm0, %v225_v35  ;;  %v936_v35 = vld [vmem:[%s10350_s27 + $0xa] sm:$0xff] }
  0x55   : > { %8922 = vmatmul.mubr.msk.f32.vlgmr.msra.gmra.mrb[0].mxu0 %vm292_vm0, %v226_v36  ;;  %v10677_v36 = vld [vmem:[%s10350_s27 + $0x1a] sm:$0xff] }
  0x56   : > { %8970 = vmatpush3.msra.mxu0 %v10361_v5  ;;  %8924 = vmatprep.mubr.msk.f32.mxu0 %vm292_vm0, %v10516_v37  ;;  %v935_v5 = vld [vmem:[%s10350_s27 + $0x2] sm:$0xff]  ;;  %12430 = vst [vmem:[#allocation11_spill] sm:$0xff] %v10677_v36 }
  0x57   : > { %9019 = vmatprep.subr.mxu0 %v10521_v38 }
  0x59   : > { %8925 = vmatmul.mubr.msk.f32.gmra.mrb[2].mxu0 %vm292_vm0, %v10528_v39 }
  0x5a   : > { %8927 = vmatprep.mubr.msk.f32.mxu0 %vm292_vm0, %v10531_v40 }
  0x5d   : > { %8928 = vmatmul.mubr.msk.f32.gmra.mrb[4].mxu0 %vm292_vm0, %v10539_v41 }
  0x5e   : > { %8930 = vmatprep.mubr.msk.f32.mxu0 %vm292_vm0, %v10542_v42 }
  0x61   : > { %8931 = vmatmul.mubr.msk.f32.gmra.mrb[6].mxu0 %vm292_vm0, %v10549_v43 }
  0x62   : > { %8933 = vmatprep.mubr.msk.f32.mxu0 %vm292_vm0, %v10552_v44 }
  0x65   : > { %8934 = vmatmul.mubr.msk.f32.gmra.mrb[8].mxu0 %vm292_vm0, %v10559_v45 }
  0x66   : > { %8936 = vmatprep.mubr.msk.f32.mxu0 %vm292_vm0, %v10562_v46 }
  0x69   : > { %8937 = vmatmul.mubr.msk.f32.gmra.mrb[10].mxu0 %vm292_vm0, %v10569_v47 }
  0x6a   : > { %8939 = vmatprep.mubr.msk.f32.mxu0 %vm292_vm0, %v10572_v48 }
  0x6d   : > { %8940 = vmatmul.mubr.msk.f32.gmra.mrb[12].mxu0 %vm292_vm0, %v10579_v49 }
  0x6e   : > { %8942 = vmatprep.mubr.msk.f32.mxu0 %vm292_vm0, %v10582_v50 }
  0x71   : > { %8943 = vmatmul.mubr.msk.f32.gmra.mrb[14].mxu0 %vm292_vm0, %v10589_v51 }
  0x72   : > { %8945 = vmatprep.mubr.msk.f32.mxu0 %vm292_vm0, %v10592_v52 }
  0x75   : > { %8946 = vmatmul.mubr.msk.f32.gmra.mrb[16].mxu0 %vm292_vm0, %v10599_v53 }
  0x76   : > { %8948 = vmatprep.mubr.msk.f32.mxu0 %vm292_vm0, %v10602_v54 }
  0x79   : > { %8949 = vmatmul.mubr.msk.f32.gmra.mrb[18].mxu0 %vm292_vm0, %v10609_v55 }
  0x7a   : > { %8951 = vmatprep.mubr.msk.f32.mxu0 %vm292_vm0, %v10612_v56 }
  0x7d   : > { %8952 = vmatmul.mubr.msk.f32.gmra.mrb[20].mxu0 %vm292_vm0, %v10619_v57 }
  0x7e   : > { %8954 = vmatprep.mubr.msk.f32.mxu0 %vm292_vm0, %v10622_v58 }
  0x81   : > { %8955 = vmatmul.mubr.msk.f32.gmra.mrb[22].mxu0 %vm292_vm0, %v10629_v59 }
  0x82   : > { %8957 = vmatprep.mubr.msk.f32.mxu0 %vm292_vm0, %v10632_v60 }
  0x85   : > { %8958 = vmatmul.mubr.msk.f32.gmra.mrb[24].mxu0 %vm292_vm0, %v10639_v61 }
  0x86   : > { %8960 = vmatprep.mubr.msk.f32.mxu0 %vm292_vm0, %v10642_v62 }
  0x89   : > { %8961 = vmatmul.mubr.msk.f32.gmra.mrb[26].mxu0 %vm292_vm0, %v10649_v63 }
  0x8a   : > { %8963 = vmatprep.mubr.msk.f32.mxu0 %vm292_vm0, %v10652_v0 }
  0x8d   : > { %8964 = vmatmul.mubr.msk.f32.gmra.mrb[28].mxu0 %vm292_vm0, %v10659_v1 }
  0x8e   : > { %8966 = vmatprep.mubr.msk.f32.mxu0 %vm292_vm0, %v10662_v2 }
  0x91   : > { %8967 = vmatmul.mubr.msk.f32.gmra.mrb[30].mxu0 %vm292_vm0, %v10669_v3 }
  0x92   : > { %8971 = vmatprep.mubr.msk.f32.mxu0 %vm292_vm0, %v935_v5  ;;  %v10689_v5 = vld [vmem:[%s10350_s27 + $0x22] sm:$0xff] }
  0x93   : > { %12431 = vst [vmem:[#allocation12_spill] sm:$0xff] %v10689_v5 }
  0x95   : > { %8972 = vmatmul.mubr.msk.f32.vlgmr.msra.gmra.mrb[0].mxu0 %vm292_vm0, %v936_v35  ;;  %v10700_v35 = vld [vmem:[%s10350_s27 + $0x3a] sm:$0xff] }
  0x96   : > { %9020 = vmatpush3.msra.mxu0 %v10521_v38  ;;  %8974 = vmatprep.mubr.msk.f32.mxu0 %vm292_vm0, %v10677_v36  ;;  %12433 = vst [vmem:[#allocation14_spill] sm:$0xff] %v10700_v35  ;;  %v10703_v38 = vld [vmem:[%s10350_s27 + $0x4a] sm:$0xff]  ;;  %v10710_v36 = vld [vmem:[%s10350_s27 + $0x52] sm:$0xff] }
  0x97   : > { %9069 = vmatprep.subr.mxu0 %v10682_v34  ;;  %12434 = vst [vmem:[#allocation15_spill] sm:$0xff] %v10703_v38  ;;  %12435 = vst [vmem:[#allocation16_spill] sm:$0xff] %v10710_v36 }
  0x99   : > { %8975 = vmatmul.mubr.msk.f32.gmra.mrb[2].mxu0 %vm292_vm0, %v10689_v5  ;;  %v10723_v5 = vld [vmem:[%s10350_s27 + $0x7a] sm:$0xff] }
  0x9a   : > { %8977 = vmatprep.mubr.msk.f32.mxu0 %vm292_vm0, %v10692_v33  ;;  %v10720_v33 = vld [vmem:[%s10350_s27 + $0x6a] sm:$0xff]  ;;  %12438 = vst [vmem:[#allocation19_spill] sm:$0xff] %v10723_v5 }
  0x9b   : > { %12437 = vst [vmem:[#allocation18_spill] sm:$0xff] %v10720_v33 }
  0x9d   : > { %8978 = vmatmul.mubr.msk.f32.gmra.mrb[4].mxu0 %vm292_vm0, %v10700_v35  ;;  %v10733_v35 = vld [vmem:[%s10350_s27 + $0x92] sm:$0xff] }
  0x9e   : > { %8980 = vmatprep.mubr.msk.f32.mxu0 %vm292_vm0, %v10703_v38  ;;  %v10730_v38 = vld [vmem:[%s10350_s27 + $0x82] sm:$0xff]  ;;  %12440 = vst [vmem:[#allocation21_spill] sm:$0xff] %v10733_v35 }
  0x9f   : > { %12439 = vst [vmem:[#allocation20_spill] sm:$0xff] %v10730_v38 }
  0xa1   : > { %8981 = vmatmul.mubr.msk.f32.gmra.mrb[6].mxu0 %vm292_vm0, %v10710_v36  ;;  %v10743_v36 = vld [vmem:[%s10350_s27 + $0xaa] sm:$0xff] }
  0xa2   : > { %8983 = vmatprep.mubr.msk.f32.mxu0 %vm292_vm0, %v10713_v32  ;;  %v10740_v32 = vld [vmem:[%s10350_s27 + $0x9a] sm:$0xff]  ;;  %12442 = vst [vmem:[#allocation23_spill] sm:$0xff] %v10743_v36 }
  0xa3   : > { %12441 = vst [vmem:[#allocation22_spill] sm:$0xff] %v10740_v32 }
  0xa5   : > { %8984 = vmatmul.mubr.msk.f32.gmra.mrb[8].mxu0 %vm292_vm0, %v10720_v33  ;;  %v10753_v33 = vld [vmem:[%s10350_s27 + $0xc2] sm:$0xff] }
  0xa6   : > { %8986 = vmatprep.mubr.msk.f32.mxu0 %vm292_vm0, %v10723_v5  ;;  %v10750_v5 = vld [vmem:[%s10350_s27 + $0xb2] sm:$0xff]  ;;  %12444 = vst [vmem:[#allocation25_spill] sm:$0xff] %v10753_v33 }
  0xa7   : > { %12443 = vst [vmem:[#allocation24_spill] sm:$0xff] %v10750_v5 }
  0xa9   : > { %8987 = vmatmul.mubr.msk.f32.gmra.mrb[10].mxu0 %vm292_vm0, %v10730_v38  ;;  %v10763_v38 = vld [vmem:[%s10350_s27 + $0xda] sm:$0xff] }
  0xaa   : > { %8989 = vmatprep.mubr.msk.f32.mxu0 %vm292_vm0, %v10733_v35  ;;  %v10760_v35 = vld [vmem:[%s10350_s27 + $0xca] sm:$0xff]  ;;  %12446 = vst [vmem:[#allocation27_spill] sm:$0xff] %v10763_v38 }
  0xab   : > { %12445 = vst [vmem:[#allocation26_spill] sm:$0xff] %v10760_v35 }
  0xad   : > { %8990 = vmatmul.mubr.msk.f32.gmra.mrb[12].mxu0 %vm292_vm0, %v10740_v32  ;;  %v10773_v32 = vld [vmem:[%s10350_s27 + $0xf2] sm:$0xff] }
  0xae   : > { %8992 = vmatprep.mubr.msk.f32.mxu0 %vm292_vm0, %v10743_v36  ;;  %v10770_v36 = vld [vmem:[%s10350_s27 + $0xe2] sm:$0xff]  ;;  %12448 = vst [vmem:[#allocation29_spill] sm:$0xff] %v10773_v32 }
  0xaf   : > { %12447 = vst [vmem:[#allocation28_spill] sm:$0xff] %v10770_v36 }
  0xb1   : > { %8993 = vmatmul.mubr.msk.f32.gmra.mrb[14].mxu0 %vm292_vm0, %v10750_v5  ;;  %v10783_v5 = vld [vmem:[%s10350_s27 + $0x10a] sm:$0xff] }
  0xb2   : > { %8995 = vmatprep.mubr.msk.f32.mxu0 %vm292_vm0, %v10753_v33  ;;  %v10780_v33 = vld [vmem:[%s10350_s27 + $0xfa] sm:$0xff]  ;;  %12450 = vst [vmem:[#allocation31_spill] sm:$0xff] %v10783_v5 }
  0xb3   : > { %12449 = vst [vmem:[#allocation30_spill] sm:$0xff] %v10780_v33 }
  0xb5   : > { %8996 = vmatmul.mubr.msk.f32.gmra.mrb[16].mxu0 %vm292_vm0, %v10760_v35  ;;  %v10793_v35 = vld [vmem:[%s10350_s27 + $0x122] sm:$0xff] }
  0xb6   : > { %8998 = vmatprep.mubr.msk.f32.mxu0 %vm292_vm0, %v10763_v38  ;;  %v10790_v38 = vld [vmem:[%s10350_s27 + $0x112] sm:$0xff]  ;;  %12452 = vst [vmem:[#allocation33_spill] sm:$0xff] %v10793_v35 }
  0xb7   : > { %12451 = vst [vmem:[#allocation32_spill] sm:$0xff] %v10790_v38 }
  0xb9   : > { %8999 = vmatmul.mubr.msk.f32.gmra.mrb[18].mxu0 %vm292_vm0, %v10770_v36  ;;  %v10803_v36 = vld [vmem:[%s10350_s27 + $0x13a] sm:$0xff] }
  0xba   : > { %9001 = vmatprep.mubr.msk.f32.mxu0 %vm292_vm0, %v10773_v32  ;;  %v10800_v32 = vld [vmem:[%s10350_s27 + $0x12a] sm:$0xff]  ;;  %12453 = vst [vmem:[#allocation34_spill] sm:$0xff] %v10803_v36 }
  0xbd   : > { %9002 = vmatmul.mubr.msk.f32.gmra.mrb[20].mxu0 %vm292_vm0, %v10780_v33  ;;  %v10813_v33 = vld [vmem:[%s10350_s27 + $0x152] sm:$0xff] }
  0xbe   : > { %9004 = vmatprep.mubr.msk.f32.mxu0 %vm292_vm0, %v10783_v5  ;;  %v10810_v5 = vld [vmem:[%s10350_s27 + $0x142] sm:$0xff]  ;;  %12454 = vst [vmem:[#allocation35_spill] sm:$0xff] %v10813_v33 }
  0xc1   : > { %9005 = vmatmul.mubr.msk.f32.gmra.mrb[22].mxu0 %vm292_vm0, %v10790_v38  ;;  %v10823_v38 = vld [vmem:[%s10350_s27 + $0x16a] sm:$0xff] }
  0xc2   : > { %9007 = vmatprep.mubr.msk.f32.mxu0 %vm292_vm0, %v10793_v35  ;;  %v10820_v35 = vld [vmem:[%s10350_s27 + $0x15a] sm:$0xff]  ;;  %12455 = vst [vmem:[#allocation36_spill] sm:$0xff] %v10823_v38 }
  0xc5   : > { %9008 = vmatmul.mubr.msk.f32.gmra.mrb[24].mxu0 %vm292_vm0, %v10800_v32 }
  0xc6   : > { %9010 = vmatprep.mubr.msk.f32.mxu0 %vm292_vm0, %v10803_v36  ;;  %v10830_v36 = vld [vmem:[%s10350_s27 + $0x172] sm:$0xff] }
  0xc9   : > { %9011 = vmatmul.mubr.msk.f32.gmra.mrb[26].mxu0 %vm292_vm0, %v10810_v5 }
  0xca   : > { %9013 = vmatprep.mubr.msk.f32.mxu0 %vm292_vm0, %v10813_v33  ;;  %v7714_v33 = vld [vmem:[%s12300_s1 + $0x28] sm:$0xff] }
  0xcd   : > { %9014 = vmatmul.mubr.msk.f32.gmra.mrb[28].mxu0 %vm292_vm0, %v10820_v35 }
  0xce   : > { %9016 = vmatprep.mubr.msk.f32.mxu0 %vm292_vm0, %v10823_v38 }
  0xd1   : > { %9017 = vmatmul.mubr.msk.f32.gmra.mrb[30].mxu0 %vm292_vm0, %v10830_v36 }
  0xd2   : > { %9021 = vmatprep.mubr.msk.f32.mxu0 %vm292_vm0, %v10516_v37  ;;  %v10904_v37 = vld [vmem:[%s10350_s27 + $0x188] sm:$0xff] }
  0xd5   : > { %9022 = vmatmul.mubr.msk.f32.vlgmr.msra.gmra.mrb[0].mxu0 %vm292_vm0, %v10528_v39  ;;  %v7779_v39 = vld [vmem:[%s12300_s1 + $0x30] sm:$0xff] }
  0xd6   : > { %9070 = vmatpush3.msra.mxu0 %v10682_v34  ;;  %9024 = vmatprep.mubr.msk.f32.mxu0 %vm292_vm0, %v10531_v40  ;;  %v10897_v34 = vld [vmem:[%s10350_s27 + $0x180] sm:$0xff] }
  0xd7   : > { %9119 = vmatprep.subr.mxu0 %v7714_v33 }
  0xd9   : > { %9025 = vmatmul.mubr.msk.f32.gmra.mrb[2].mxu0 %vm292_vm0, %v10539_v41 }
  0xda   : > { %9027 = vmatprep.mubr.msk.f32.mxu0 %vm292_vm0, %v10542_v42 }
  0xdd   : > { %9028 = vmatmul.mubr.msk.f32.gmra.mrb[4].mxu0 %vm292_vm0, %v10549_v43 }
  0xde   : > { %9030 = vmatprep.mubr.msk.f32.mxu0 %vm292_vm0, %v10552_v44 }
  0xe1   : > { %9031 = vmatmul.mubr.msk.f32.gmra.mrb[6].mxu0 %vm292_vm0, %v10559_v45 }
  0xe2   : > { %9033 = vmatprep.mubr.msk.f32.mxu0 %vm292_vm0, %v10562_v46 }
  0xe5   : > { %9034 = vmatmul.mubr.msk.f32.gmra.mrb[8].mxu0 %vm292_vm0, %v10569_v47 }
  0xe6   : > { %9036 = vmatprep.mubr.msk.f32.mxu0 %vm292_vm0, %v10572_v48 }
  0xe9   : > { %9037 = vmatmul.mubr.msk.f32.gmra.mrb[10].mxu0 %vm292_vm0, %v10579_v49 }
  0xea   : > { %9039 = vmatprep.mubr.msk.f32.mxu0 %vm292_vm0, %v10582_v50 }
  0xed   : > { %9040 = vmatmul.mubr.msk.f32.gmra.mrb[12].mxu0 %vm292_vm0, %v10589_v51 }
  0xee   : > { %9042 = vmatprep.mubr.msk.f32.mxu0 %vm292_vm0, %v10592_v52 }
  0xf1   : > { %9043 = vmatmul.mubr.msk.f32.gmra.mrb[14].mxu0 %vm292_vm0, %v10599_v53 }
  0xf2   : > { %9045 = vmatprep.mubr.msk.f32.mxu0 %vm292_vm0, %v10602_v54 }
  0xf5   : > { %9046 = vmatmul.mubr.msk.f32.gmra.mrb[16].mxu0 %vm292_vm0, %v10609_v55 }
  0xf6   : > { %9048 = vmatprep.mubr.msk.f32.mxu0 %vm292_vm0, %v10612_v56 }
  0xf9   : > { %9049 = vmatmul.mubr.msk.f32.gmra.mrb[18].mxu0 %vm292_vm0, %v10619_v57 }
  0xfa   : > { %9051 = vmatprep.mubr.msk.f32.mxu0 %vm292_vm0, %v10622_v58 }
  0xfd   : > { %9052 = vmatmul.mubr.msk.f32.gmra.mrb[20].mxu0 %vm292_vm0, %v10629_v59 }
  0xfe   : > { %9054 = vmatprep.mubr.msk.f32.mxu0 %vm292_vm0, %v10632_v60 }
 0x101   : > { %9055 = vmatmul.mubr.msk.f32.gmra.mrb[22].mxu0 %vm292_vm0, %v10639_v61 }
 0x102   : > { %9057 = vmatprep.mubr.msk.f32.mxu0 %vm292_vm0, %v10642_v62 }
 0x105   : > { %9058 = vmatmul.mubr.msk.f32.gmra.mrb[24].mxu0 %vm292_vm0, %v10649_v63 }
 0x106   : > { %9060 = vmatprep.mubr.msk.f32.mxu0 %vm292_vm0, %v10652_v0 }
 0x109   : > { %9061 = vmatmul.mubr.msk.f32.gmra.mrb[26].mxu0 %vm292_vm0, %v10659_v1 }
 0x10a   : > { %9063 = vmatprep.mubr.msk.f32.mxu0 %vm292_vm0, %v10662_v2 }
 0x10d   : > { %9064 = vmatmul.mubr.msk.f32.gmra.mrb[28].mxu0 %vm292_vm0, %v10669_v3 }
 0x10e   : > { %9066 = vmatprep.mubr.msk.f32.mxu0 %vm292_vm0, %v10897_v34 }
 0x111   : > { %9067 = vmatmul.mubr.msk.f32.gmra.mrb[30].mxu0 %vm292_vm0, %v10904_v37 }
 0x112   : > { %9071 = vmatprep.mubr.msk.f32.mxu0 %vm292_vm0, %v10355_v4  ;;  %v12456_v4 = vld [vmem:[#allocation8_spill] sm:$0xff] }
 0x115   : > { %9072 = vmatmul.mubr.msk.f32.vlgmr.msra.gmra.mrb[0].mxu0 %vm292_vm0, %v10367_v6  ;;  %v12457_v6 = vld [vmem:[#allocation9_spill] sm:$0xff] }
 0x116   : > { %9120 = vmatpush3.msra.mxu0 %v7714_v33  ;;  %9074 = vmatprep.mubr.msk.f32.mxu0 %vm292_vm0, %v10370_v7  ;;  %v10970_v33 = vld [vmem:[%s10350_s27 + $0x181] sm:$0xff] }
 0x117   : > { %9169 = vmatprep.subr.mxu0 %v7779_v39  ;;  %12458 = vst [vmem:[#allocation37_spill] sm:$0xff] %v10970_v33 }
 0x119   : > { %9075 = vmatmul.mubr.msk.f32.gmra.mrb[2].mxu0 %vm292_vm0, %v10378_v8 }
 0x11a   : > { %9077 = vmatprep.mubr.msk.f32.mxu0 %vm292_vm0, %v10381_v9 }
 0x11d   : > { %9078 = vmatmul.mubr.msk.f32.gmra.mrb[4].mxu0 %vm292_vm0, %v10388_v10 }
 0x11e   : > { %9080 = vmatprep.mubr.msk.f32.mxu0 %vm292_vm0, %v10391_v11 }
 0x121   : > { %9081 = vmatmul.mubr.msk.f32.gmra.mrb[6].mxu0 %vm292_vm0, %v10398_v12 }
 0x122   : > { %9083 = vmatprep.mubr.msk.f32.mxu0 %vm292_vm0, %v10401_v13 }
 0x125   : > { %9084 = vmatmul.mubr.msk.f32.gmra.mrb[8].mxu0 %vm292_vm0, %v10408_v14 }
 0x126   : > { %9086 = vmatprep.mubr.msk.f32.mxu0 %vm292_vm0, %v10411_v15 }
 0x129   : > { %9087 = vmatmul.mubr.msk.f32.gmra.mrb[10].mxu0 %vm292_vm0, %v10418_v16 }
 0x12a   : > { %9089 = vmatprep.mubr.msk.f32.mxu0 %vm292_vm0, %v10421_v17 }
 0x12d   : > { %9090 = vmatmul.mubr.msk.f32.gmra.mrb[12].mxu0 %vm292_vm0, %v10428_v18 }
 0x12e   : > { %9092 = vmatprep.mubr.msk.f32.mxu0 %vm292_vm0, %v10431_v19 }
 0x131   : > { %9093 = vmatmul.mubr.msk.f32.gmra.mrb[14].mxu0 %vm292_vm0, %v10438_v20 }
 0x132   : > { %9095 = vmatprep.mubr.msk.f32.mxu0 %vm292_vm0, %v10441_v21 }
 0x135   : > { %9096 = vmatmul.mubr.msk.f32.gmra.mrb[16].mxu0 %vm292_vm0, %v10448_v22 }
 0x136   : > { %9098 = vmatprep.mubr.msk.f32.mxu0 %vm292_vm0, %v10451_v23 }
 0x139   : > { %9099 = vmatmul.mubr.msk.f32.gmra.mrb[18].mxu0 %vm292_vm0, %v10458_v24 }
 0x13a   : > { %9101 = vmatprep.mubr.msk.f32.mxu0 %vm292_vm0, %v10461_v25 }
 0x13d   : > { %9102 = vmatmul.mubr.msk.f32.gmra.mrb[20].mxu0 %vm292_vm0, %v10468_v26 }
 0x13e   : > { %9104 = vmatprep.mubr.msk.f32.mxu0 %vm292_vm0, %v10471_v27  ;;  %v12459_v27 = vld [vmem:[#allocation10_spill] sm:$0xff] }
 0x141   : > { %9105 = vmatmul.mubr.msk.f32.gmra.mrb[22].mxu0 %vm292_vm0, %v10478_v28  ;;  %v12468_v28 = vld [vmem:[#allocation18_spill] sm:$0xff] }
 0x142   : > { %9107 = vmatprep.mubr.msk.f32.mxu0 %vm292_vm0, %v10481_v29  ;;  %v10977_v29 = vld [vmem:[%s10350_s27 + $0x189] sm:$0xff] }
 0x143   : > { %12460 = vst [vmem:[#allocation38_spill] sm:$0xff] %v10977_v29 }
 0x145   : > { %9108 = vmatmul.mubr.msk.f32.gmra.mrb[24].mxu0 %vm292_vm0, %v10488_v30  ;;  %v12465_v30 = vld [vmem:[#allocation15_spill] sm:$0xff] }
 0x146   : > { %9110 = vmatprep.mubr.msk.f32.mxu0 %vm292_vm0, %v10491_v31  ;;  %v12461_v31 = vld [vmem:[#allocation11_spill] sm:$0xff] }
 0x149   : > { %9111 = vmatmul.mubr.msk.f32.gmra.mrb[26].mxu0 %vm292_vm0, %v12456_v4  ;;  %v12462_v4 = vld [vmem:[#allocation12_spill] sm:$0xff] }
 0x14a   : > { %9113 = vmatprep.mubr.msk.f32.mxu0 %vm292_vm0, %v12457_v6  ;;  %v7844_v6 = vld [vmem:[%s12300_s1 + $0x38] sm:$0xff] }
 0x14d   : > { %9114 = vmatmul.mubr.msk.f32.gmra.mrb[28].mxu0 %vm292_vm0, %v12459_v27  ;;  %v12463_v27 = vld [vmem:[#allocation13_spill] sm:$0xff] }
 0x14e   : > { %9116 = vmatprep.mubr.msk.f32.mxu0 %vm292_vm0, %v10970_v33  ;;  %v12464_v33 = vld [vmem:[#allocation14_spill] sm:$0xff] }
 0x151   : > { %9117 = vmatmul.mubr.msk.f32.gmra.mrb[30].mxu0 %vm292_vm0, %v10977_v29  ;;  %v12466_v29 = vld [vmem:[#allocation16_spill] sm:$0xff] }
 0x152   : > { %9121 = vmatprep.mubr.msk.f32.mxu0 %vm292_vm0, %v12461_v31  ;;  %v12467_v31 = vld [vmem:[#allocation17_spill] sm:$0xff] }
 0x155   : > { %9122 = vmatmul.mubr.msk.f32.vlgmr.msra.gmra.mrb[0].mxu0 %vm292_vm0, %v12462_v4  ;;  %v12470_v4 = vld [vmem:[#allocation20_spill] sm:$0xff] }
 0x156   : > { %9170 = vmatpush3.msra.mxu0 %v7779_v39  ;;  %9124 = vmatprep.mubr.msk.f32.mxu0 %vm292_vm0, %v12463_v27  ;;  %v12469_v39 = vld [vmem:[#allocation19_spill] sm:$0xff]  ;;  %v12471_v27 = vld [vmem:[#allocation21_spill] sm:$0xff] }
 0x157   : > { %9219 = vmatprep.subr.mxu0 %v7844_v6 }
 0x159   : > { %9125 = vmatmul.mubr.msk.f32.gmra.mrb[2].mxu0 %vm292_vm0, %v12464_v33  ;;  %v12472_v33 = vld [vmem:[#allocation22_spill] sm:$0xff] }
 0x15a   : > { %9127 = vmatprep.mubr.msk.f32.mxu0 %vm292_vm0, %v12465_v30  ;;  %v12473_v30 = vld [vmem:[#allocation23_spill] sm:$0xff] }
 0x15d   : > { %9128 = vmatmul.mubr.msk.f32.gmra.mrb[4].mxu0 %vm292_vm0, %v12466_v29  ;;  %v12474_v29 = vld [vmem:[#allocation24_spill] sm:$0xff] }
 0x15e   : > { %9130 = vmatprep.mubr.msk.f32.mxu0 %vm292_vm0, %v12467_v31  ;;  %v12475_v31 = vld [vmem:[#allocation25_spill] sm:$0xff] }
 0x161   : > { %9131 = vmatmul.mubr.msk.f32.gmra.mrb[6].mxu0 %vm292_vm0, %v12468_v28 }
 0x162   : > { %9133 = vmatprep.mubr.msk.f32.mxu0 %vm292_vm0, %v12469_v39  ;;  %v12476_v39 = vld [vmem:[#allocation26_spill] sm:$0xff] }
 0x165   : > { %9134 = vmatmul.mubr.msk.f32.gmra.mrb[8].mxu0 %vm292_vm0, %v12470_v4  ;;  %v12477_v4 = vld [vmem:[#allocation27_spill] sm:$0xff] }
 0x166   : > { %9136 = vmatprep.mubr.msk.f32.mxu0 %vm292_vm0, %v12471_v27  ;;  %v12478_v27 = vld [vmem:[#allocation28_spill] sm:$0xff] }
 0x169   : > { %9137 = vmatmul.mubr.msk.f32.gmra.mrb[10].mxu0 %vm292_vm0, %v12472_v33  ;;  %v12479_v33 = vld [vmem:[#allocation29_spill] sm:$0xff] }
 0x16a   : > { %9139 = vmatprep.mubr.msk.f32.mxu0 %vm292_vm0, %v12473_v30  ;;  %v12480_v30 = vld [vmem:[#allocation30_spill] sm:$0xff] }
 0x16d   : > { %9140 = vmatmul.mubr.msk.f32.gmra.mrb[12].mxu0 %vm292_vm0, %v12474_v29  ;;  %v12481_v29 = vld [vmem:[#allocation31_spill] sm:$0xff] }
 0x16e   : > { %9142 = vmatprep.mubr.msk.f32.mxu0 %vm292_vm0, %v12475_v31  ;;  %v12482_v31 = vld [vmem:[#allocation32_spill] sm:$0xff] }
 0x171   : > { %9143 = vmatmul.mubr.msk.f32.gmra.mrb[14].mxu0 %vm292_vm0, %v12476_v39  ;;  %v12483_v39 = vld [vmem:[#allocation33_spill] sm:$0xff] }
 0x172   : > { %9145 = vmatprep.mubr.msk.f32.mxu0 %vm292_vm0, %v12477_v4  ;;  %v12484_v4 = vld [vmem:[#allocation34_spill] sm:$0xff] }
 0x175   : > { %9146 = vmatmul.mubr.msk.f32.gmra.mrb[16].mxu0 %vm292_vm0, %v12478_v27 }
 0x176   : > { %9148 = vmatprep.mubr.msk.f32.mxu0 %vm292_vm0, %v12479_v33  ;;  %v12485_v33 = vld [vmem:[#allocation35_spill] sm:$0xff] }
 0x179   : > { %9149 = vmatmul.mubr.msk.f32.gmra.mrb[18].mxu0 %vm292_vm0, %v12480_v30 }
 0x17a   : > { %9151 = vmatprep.mubr.msk.f32.mxu0 %vm292_vm0, %v12481_v29 }
 0x17d   : > { %9152 = vmatmul.mubr.msk.f32.gmra.mrb[20].mxu0 %vm292_vm0, %v12482_v31  ;;  %v11043_v31 = vld [vmem:[%s10350_s27 + $0x182] sm:$0xff] }
 0x17e   : > { %9154 = vmatprep.mubr.msk.f32.mxu0 %vm292_vm0, %v12483_v39 }
 0x181   : > { %9155 = vmatmul.mubr.msk.f32.gmra.mrb[22].mxu0 %vm292_vm0, %v10800_v32 }
 0x182   : > { %9157 = vmatprep.mubr.msk.f32.mxu0 %vm292_vm0, %v12484_v4  ;;  %v11050_v4 = vld [vmem:[%s10350_s27 + $0x18a] sm:$0xff] }
 0x185   : > { %9158 = vmatmul.mubr.msk.f32.gmra.mrb[24].mxu0 %vm292_vm0, %v10810_v5 }
 0x186   : > { %9160 = vmatprep.mubr.msk.f32.mxu0 %vm292_vm0, %v12485_v33 }
 0x189   : > { %9161 = vmatmul.mubr.msk.f32.gmra.mrb[26].mxu0 %vm292_vm0, %v10820_v35 }
 0x18a   : > { %9163 = vmatprep.mubr.msk.f32.mxu0 %vm292_vm0, %v10823_v38  ;;  %v7909_v38 = vld [vmem:[%s12300_s1 + $0x40] sm:$0xff] }
 0x18d   : > { %9164 = vmatmul.mubr.msk.f32.gmra.mrb[28].mxu0 %vm292_vm0, %v10830_v36 }
 0x18e   : > { %9166 = vmatprep.mubr.msk.f32.mxu0 %vm292_vm0, %v11043_v31 }
 0x191   : > { %9167 = vmatmul.mubr.msk.f32.gmra.mrb[30].mxu0 %vm292_vm0, %v11050_v4 }
 0x192   : > { %9171 = vmatprep.mubr.msk.f32.mxu0 %vm292_vm0, %v10531_v40  ;;  %v7777_v40 = vld [vmem:[%s10350_s27 + $0x198] sm:$0xff] }
 0x195   : > { %9172 = vmatmul.mubr.msk.f32.vlgmr.msra.gmra.mrb[0].mxu0 %vm292_vm0, %v10539_v41  ;;  %v7778_v41 = vld [vmem:[%s10350_s27 + $0x1a0] sm:$0xff] }
 0x196   : > { %9220 = vmatpush3.msra.mxu0 %v7844_v6  ;;  %9174 = vmatprep.mubr.msk.f32.mxu0 %vm292_vm0, %v10542_v42  ;;  %v12504_v42 = vld [vmem:[#allocation22_spill] sm:$0xff] }
 0x197   : > { %9269 = vmatprep.subr.mxu0 %v7909_v38 }
 0x199   : > { %9175 = vmatmul.mubr.msk.f32.gmra.mrb[2].mxu0 %vm292_vm0, %v10549_v43  ;;  %v12505_v43 = vld [vmem:[#allocation23_spill] sm:$0xff] }
 0x19a   : > { %9177 = vmatprep.mubr.msk.f32.mxu0 %vm292_vm0, %v10552_v44  ;;  %v12506_v44 = vld [vmem:[#allocation24_spill] sm:$0xff] }
 0x19d   : > { %9178 = vmatmul.mubr.msk.f32.gmra.mrb[4].mxu0 %vm292_vm0, %v10559_v45  ;;  %v12507_v45 = vld [vmem:[#allocation25_spill] sm:$0xff] }
 0x19e   : > { %9180 = vmatprep.mubr.msk.f32.mxu0 %vm292_vm0, %v10562_v46  ;;  %v12509_v46 = vld [vmem:[#allocation27_spill] sm:$0xff] }
 0x1a1   : > { %9181 = vmatmul.mubr.msk.f32.gmra.mrb[6].mxu0 %vm292_vm0, %v10569_v47  ;;  %v12510_v47 = vld [vmem:[#allocation29_spill] sm:$0xff] }
 0x1a2   : > { %9183 = vmatprep.mubr.msk.f32.mxu0 %vm292_vm0, %v10572_v48  ;;  %v12511_v48 = vld [vmem:[#allocation32_spill] sm:$0xff] }
 0x1a5   : > { %9184 = vmatmul.mubr.msk.f32.gmra.mrb[8].mxu0 %vm292_vm0, %v10579_v49  ;;  %v10299_v49 = vmov 0.0  }
 0x1a6   : > { %9186 = vmatprep.mubr.msk.f32.mxu0 %vm292_vm0, %v10582_v50  ;;  %3722 = vst.msk [vmem:[#allocation2 + $0x20] sm:$0xff] %vm292_vm0, %v10299_v49  ;;  %3717 = vst.msk [vmem:[#allocation2] sm:$0xff] %vm292_vm0, %v10299_v49  ;;  %v7943_v50 = vld [vmem:[%s12302_s3 + $0x8] sm:$0xff] }
 0x1a7   : > { %3718 = vst.msk [vmem:[#allocation2 + $0x8] sm:$0xff] %vm292_vm0, %v10299_v49  ;;  %3721 = vst.msk [vmem:[#allocation2 + $0x18] sm:$0xff] %vm292_vm0, %v10299_v49  ;;  %9319 = vmatprep.subr.mxu1 %v7943_v50 }
 0x1a8   : > { %3724 = vst.msk [vmem:[#allocation2 + $0x30] sm:$0xff] %vm292_vm0, %v10299_v49  ;;  %3725 = vst.msk [vmem:[#allocation2 + $0x38] sm:$0xff] %vm292_vm0, %v10299_v49  ;;  %9320 = vmatpush3.msra.mxu1 %v7943_v50 }
 0x1a9   : > { %9187 = vmatmul.mubr.msk.f32.gmra.mrb[10].mxu0 %vm292_vm0, %v10589_v51  ;;  %3727 = vst.msk [vmem:[#allocation2 + $0x48] sm:$0xff] %vm292_vm0, %v10299_v49  ;;  %3728 = vst.msk [vmem:[#allocation2 + $0x50] sm:$0xff] %vm292_vm0, %v10299_v49 }
 0x1aa   : > { %9189 = vmatprep.mubr.msk.f32.mxu0 %vm292_vm0, %v10592_v52  ;;  %3730 = vst.msk [vmem:[#allocation2 + $0x60] sm:$0xff] %vm292_vm0, %v10299_v49  ;;  %3731 = vst.msk [vmem:[#allocation2 + $0x68] sm:$0xff] %vm292_vm0, %v10299_v49 }
 0x1ab   : > { %3733 = vst.msk [vmem:[#allocation2 + $0x78] sm:$0xff] %vm292_vm0, %v10299_v49  ;;  %3734 = vst.msk [vmem:[#allocation2 + $0x80] sm:$0xff] %vm292_vm0, %v10299_v49 }
 0x1ac   : > { %3736 = vst.msk [vmem:[#allocation2 + $0x90] sm:$0xff] %vm292_vm0, %v10299_v49  ;;  %3737 = vst.msk [vmem:[#allocation2 + $0x98] sm:$0xff] %vm292_vm0, %v10299_v49 }
 0x1ad   : > { %9190 = vmatmul.mubr.msk.f32.gmra.mrb[12].mxu0 %vm292_vm0, %v10599_v53  ;;  %3739 = vst.msk [vmem:[#allocation2 + $0xa8] sm:$0xff] %vm292_vm0, %v10299_v49  ;;  %3740 = vst.msk [vmem:[#allocation2 + $0xb0] sm:$0xff] %vm292_vm0, %v10299_v49  ;;  %v3837_v53 = vld [vmem:[%s12302_s3] sm:$0xff] }
 0x1ae   : > { %9192 = vmatprep.mubr.msk.f32.mxu0 %vm292_vm0, %v10602_v54  ;;  %3742 = vst.msk [vmem:[#allocation2 + $0xc0] sm:$0xff] %vm292_vm0, %v10299_v49  ;;  %3743 = vst.msk [vmem:[#allocation2 + $0xc8] sm:$0xff] %vm292_vm0, %v10299_v49  ;;  %v3838_v51 = vld [vmem:[#allocation2 + $0x1] sm:$0xff]  ;;  %9369 = vmatprep.subr.mxu1 %v3837_v53  ;;  %v11314_v54 = vld [vmem:[%s12302_s3 + $0x10] sm:$0xff] }
 0x1af   : > { %3745 = vst.msk [vmem:[#allocation2 + $0xd8] sm:$0xff] %vm292_vm0, %v10299_v49  ;;  %3746 = vst.msk [vmem:[#allocation2 + $0xe0] sm:$0xff] %vm292_vm0, %v10299_v49  ;;  %9321 = vmatprep.mubr.msk.f32.mxu1 %vm292_vm0, %v3838_v51 }
 0x1b0   : > { %3748 = vst.msk [vmem:[#allocation2 + $0xf0] sm:$0xff] %vm292_vm0, %v10299_v49  ;;  %3749 = vst.msk [vmem:[#allocation2 + $0xf8] sm:$0xff] %vm292_vm0, %v10299_v49 }
 0x1b1   : > { %9193 = vmatmul.mubr.msk.f32.gmra.mrb[14].mxu0 %vm292_vm0, %v10609_v55  ;;  %3751 = vst.msk [vmem:[#allocation2 + $0x108] sm:$0xff] %vm292_vm0, %v10299_v49  ;;  %3752 = vst.msk [vmem:[#allocation2 + $0x110] sm:$0xff] %vm292_vm0, %v10299_v49  ;;  %v11320_v55 = vld [vmem:[%s12301_s2] ss:$0 sm:$0xff] }
 0x1b2   : > { %9195 = vmatprep.mubr.msk.f32.mxu0 %vm292_vm0, %v10612_v56  ;;  %3754 = vst.msk [vmem:[#allocation2 + $0x120] sm:$0xff] %vm292_vm0, %v10299_v49  ;;  %3755 = vst.msk [vmem:[#allocation2 + $0x128] sm:$0xff] %vm292_vm0, %v10299_v49 }
 0x1b3   : > { %3757 = vst.msk [vmem:[#allocation2 + $0x138] sm:$0xff] %vm292_vm0, %v10299_v49  ;;  %3758 = vst.msk [vmem:[#allocation2 + $0x140] sm:$0xff] %vm292_vm0, %v10299_v49 }
 0x1b4   : > { %3760 = vst.msk [vmem:[#allocation2 + $0x150] sm:$0xff] %vm292_vm0, %v10299_v49  ;;  %3761 = vst.msk [vmem:[#allocation2 + $0x158] sm:$0xff] %vm292_vm0, %v10299_v49 }
 0x1b5   : > { %9196 = vmatmul.mubr.msk.f32.gmra.mrb[16].mxu0 %vm292_vm0, %v10619_v57  ;;  %3763 = vst.msk [vmem:[#allocation2 + $0x168] sm:$0xff] %vm292_vm0, %v10299_v49  ;;  %3764 = vst.msk [vmem:[#allocation2 + $0x170] sm:$0xff] %vm292_vm0, %v10299_v49 }
 0x1b6   : > { %9198 = vmatprep.mubr.msk.f32.mxu0 %vm292_vm0, %v10622_v58  ;;  %3766 = vst.msk [vmem:[#allocation2 + $0x180] sm:$0xff] %vm292_vm0, %v10299_v49  ;;  %3767 = vst.msk [vmem:[#allocation2 + $0x188] sm:$0xff] %vm292_vm0, %v10299_v49 }
 0x1b7   : > { %3769 = vst.msk [vmem:[#allocation2 + $0x198] sm:$0xff] %vm292_vm0, %v10299_v49  ;;  %3770 = vst.msk [vmem:[#allocation2 + $0x1a0] sm:$0xff] %vm292_vm0, %v10299_v49 }
 0x1b8   : > { %3723 = vst.msk [vmem:[#allocation2 + $0x28] sm:$0x3] %vm3719_vm1, %v10299_v49  ;;  %3720 = vst.msk [vmem:[#allocation2 + $0x10] sm:$0x3] %vm3719_vm1, %v10299_v49 }
 0x1b9   : > { %9199 = vmatmul.mubr.msk.f32.gmra.mrb[18].mxu0 %vm292_vm0, %v10629_v59  ;;  %3726 = vst.msk [vmem:[#allocation2 + $0x40] sm:$0x3] %vm3719_vm1, %v10299_v49  ;;  %3729 = vst.msk [vmem:[#allocation2 + $0x58] sm:$0x3] %vm3719_vm1, %v10299_v49 }
 0x1ba   : > { %9201 = vmatprep.mubr.msk.f32.mxu0 %vm292_vm0, %v10632_v60  ;;  %3732 = vst.msk [vmem:[#allocation2 + $0x70] sm:$0x3] %vm3719_vm1, %v10299_v49  ;;  %3735 = vst.msk [vmem:[#allocation2 + $0x88] sm:$0x3] %vm3719_vm1, %v10299_v49 }
 0x1bb   : > { %3738 = vst.msk [vmem:[#allocation2 + $0xa0] sm:$0x3] %vm3719_vm1, %v10299_v49  ;;  %3741 = vst.msk [vmem:[#allocation2 + $0xb8] sm:$0x3] %vm3719_vm1, %v10299_v49 }
 0x1bc   : > { %3744 = vst.msk [vmem:[#allocation2 + $0xd0] sm:$0x3] %vm3719_vm1, %v10299_v49  ;;  %3747 = vst.msk [vmem:[#allocation2 + $0xe8] sm:$0x3] %vm3719_vm1, %v10299_v49 }
 0x1bd   : > { %9202 = vmatmul.mubr.msk.f32.gmra.mrb[20].mxu0 %vm292_vm0, %v10639_v61  ;;  %3750 = vst.msk [vmem:[#allocation2 + $0x100] sm:$0x3] %vm3719_vm1, %v10299_v49  ;;  %3753 = vst.msk [vmem:[#allocation2 + $0x118] sm:$0x3] %vm3719_vm1, %v10299_v49 }
 0x1be   : > { %9204 = vmatprep.mubr.msk.f32.mxu0 %vm292_vm0, %v10642_v62  ;;  %3756 = vst.msk [vmem:[#allocation2 + $0x130] sm:$0x3] %vm3719_vm1, %v10299_v49  ;;  %3759 = vst.msk [vmem:[#allocation2 + $0x148] sm:$0x3] %vm3719_vm1, %v10299_v49 }
 0x1bf   : > { %3762 = vst.msk [vmem:[#allocation2 + $0x160] sm:$0x3] %vm3719_vm1, %v10299_v49  ;;  %3765 = vst.msk [vmem:[#allocation2 + $0x178] sm:$0x3] %vm3719_vm1, %v10299_v49  ;;  %v3839_v52 = vld [vmem:[#allocation2 + $0x9] sm:$0xff] }
 0x1c0   : > { %3768 = vst.msk [vmem:[#allocation2 + $0x190] sm:$0x3] %vm3719_vm1, %v10299_v49  ;;  %3771 = vst.msk [vmem:[#allocation2 + $0x1a8] sm:$0x3] %vm3719_vm1, %v10299_v49  ;;  %9322 = vmatmul.mubr.msk.f32.vlgmr.msra.gmra.mrb[0].mxu1 %vm292_vm0, %v3839_v52 }
 0x1c1   : > { %9205 = vmatmul.mubr.msk.f32.gmra.mrb[22].mxu0 %vm292_vm0, %v10649_v63  ;;  %9370 = vmatpush3.msra.mxu1 %v3837_v53 }
 0x1c2   : > { %9207 = vmatprep.mubr.msk.f32.mxu0 %vm292_vm0, %v10652_v0  ;;  %9419 = vmatprep.subr.mxu1 %v11314_v54 }
 0x1c5   : > { %9208 = vmatmul.mubr.msk.f32.gmra.mrb[24].mxu0 %vm292_vm0, %v10659_v1 }
 0x1c6   : > { %9210 = vmatprep.mubr.msk.f32.mxu0 %vm292_vm0, %v10662_v2 }
 0x1c9   : > { %9211 = vmatmul.mubr.msk.f32.gmra.mrb[26].mxu0 %vm292_vm0, %v10669_v3 }
 0x1ca   : > { %9213 = vmatprep.mubr.msk.f32.mxu0 %vm292_vm0, %v10897_v34 }
 0x1cd   : > { %9214 = vmatmul.mubr.msk.f32.gmra.mrb[28].mxu0 %vm292_vm0, %v10904_v37 }
 0x1ce   : > { %9216 = vmatprep.mubr.msk.f32.mxu0 %vm292_vm0, %v7777_v40 }
 0x1d1   : > { %9217 = vmatmul.mubr.msk.f32.gmra.mrb[30].mxu0 %vm292_vm0, %v7778_v41 }
 0x1d2   : > { %9221 = vmatprep.mubr.msk.f32.mxu0 %vm292_vm0, %v10370_v7  ;;  %v12486_v7 = vld [vmem:[#allocation3_spill] sm:$0xff] }
 0x1d5   : > { %9222 = vmatmul.mubr.msk.f32.vlgmr.msra.gmra.mrb[0].mxu0 %vm292_vm0, %v10378_v8  ;;  %v12487_v8 = vld [vmem:[#allocation4_spill] sm:$0xff] }
 0x1d6   : > { %9270 = vmatpush3.msra.mxu0 %v7909_v38  ;;  %9224 = vmatprep.mubr.msk.f32.mxu0 %vm292_vm0, %v10381_v9  ;;  %v12488_v9 = vld [vmem:[#allocation5_spill] sm:$0xff] }
 0x1d9   : > { %9225 = vmatmul.mubr.msk.f32.gmra.mrb[2].mxu0 %vm292_vm0, %v10388_v10  ;;  %v12489_v10 = vld [vmem:[#allocation6_spill] sm:$0xff] }
 0x1da   : > { %9227 = vmatprep.mubr.msk.f32.mxu0 %vm292_vm0, %v10391_v11  ;;  %v12490_v11 = vld [vmem:[#allocation7_spill] sm:$0xff] }
 0x1dd   : > { %9228 = vmatmul.mubr.msk.f32.gmra.mrb[4].mxu0 %vm292_vm0, %v10398_v12  ;;  %v12491_v12 = vld [vmem:[#allocation8_spill] sm:$0xff] }
 0x1de   : > { %9230 = vmatprep.mubr.msk.f32.mxu0 %vm292_vm0, %v10401_v13  ;;  %v12492_v13 = vld [vmem:[#allocation9_spill] sm:$0xff] }
 0x1e1   : > { %9231 = vmatmul.mubr.msk.f32.gmra.mrb[6].mxu0 %vm292_vm0, %v10408_v14  ;;  %v12493_v14 = vld [vmem:[#allocation10_spill] sm:$0xff] }
 0x1e2   : > { %9233 = vmatprep.mubr.msk.f32.mxu0 %vm292_vm0, %v10411_v15  ;;  %v12494_v15 = vld [vmem:[#allocation37_spill] sm:$0xff] }
 0x1e5   : > { %9234 = vmatmul.mubr.msk.f32.gmra.mrb[8].mxu0 %vm292_vm0, %v10418_v16  ;;  %v7842_v16 = vld [vmem:[%s10350_s27 + $0x199] sm:$0xff] }
 0x1e6   : > { %9236 = vmatprep.mubr.msk.f32.mxu0 %vm292_vm0, %v10421_v17  ;;  %v12495_v17 = vld [vmem:[#allocation38_spill] sm:$0xff] }
 0x1e9   : > { %9237 = vmatmul.mubr.msk.f32.gmra.mrb[10].mxu0 %vm292_vm0, %v10428_v18  ;;  %v7843_v18 = vld [vmem:[%s10350_s27 + $0x1a1] sm:$0xff] }
 0x1ea   : > { %9239 = vmatprep.mubr.msk.f32.mxu0 %vm292_vm0, %v10431_v19  ;;  %v12496_v19 = vld [vmem:[#allocation13_spill] sm:$0xff] }
 0x1ed   : > { %9240 = vmatmul.mubr.msk.f32.gmra.mrb[12].mxu0 %vm292_vm0, %v10438_v20  ;;  %v12497_v20 = vld [vmem:[#allocation14_spill] sm:$0xff] }
 0x1ee   : > { %9242 = vmatprep.mubr.msk.f32.mxu0 %vm292_vm0, %v10441_v21  ;;  %v12498_v21 = vld [vmem:[#allocation15_spill] sm:$0xff] }
 0x1f1   : > { %9243 = vmatmul.mubr.msk.f32.gmra.mrb[14].mxu0 %vm292_vm0, %v10448_v22  ;;  %v12499_v22 = vld [vmem:[#allocation16_spill] sm:$0xff] }
 0x1f2   : > { %9245 = vmatprep.mubr.msk.f32.mxu0 %vm292_vm0, %v10451_v23  ;;  %v12500_v23 = vld [vmem:[#allocation17_spill] sm:$0xff] }
 0x1f5   : > { %9246 = vmatmul.mubr.msk.f32.gmra.mrb[16].mxu0 %vm292_vm0, %v10458_v24  ;;  %v12501_v24 = vld [vmem:[#allocation19_spill] sm:$0xff] }
 0x1f6   : > { %9248 = vmatprep.mubr.msk.f32.mxu0 %vm292_vm0, %v10461_v25  ;;  %v12502_v25 = vld [vmem:[#allocation20_spill] sm:$0xff] }
 0x1f9   : > { %9249 = vmatmul.mubr.msk.f32.gmra.mrb[18].mxu0 %vm292_vm0, %v10468_v26  ;;  %v12503_v26 = vld [vmem:[#allocation21_spill] sm:$0xff] }
 0x1fa   : > { %9251 = vmatprep.mubr.msk.f32.mxu0 %vm292_vm0, %v12486_v7 }
 0x1fd   : > { %9252 = vmatmul.mubr.msk.f32.gmra.mrb[20].mxu0 %vm292_vm0, %v12487_v8 }
 0x1fe   : > { %9254 = vmatprep.mubr.msk.f32.mxu0 %vm292_vm0, %v12488_v9 }
 0x201   : > { %9255 = vmatmul.mubr.msk.f32.gmra.mrb[22].mxu0 %vm292_vm0, %v12489_v10 }
 0x202   : > { %9257 = vmatprep.mubr.msk.f32.mxu0 %vm292_vm0, %v12490_v11 }
 0x205   : > { %9258 = vmatmul.mubr.msk.f32.gmra.mrb[24].mxu0 %vm292_vm0, %v12491_v12 }
 0x206   : > { %9260 = vmatprep.mubr.msk.f32.mxu0 %vm292_vm0, %v12492_v13 }
 0x209   : > { %9261 = vmatmul.mubr.msk.f32.gmra.mrb[26].mxu0 %vm292_vm0, %v12493_v14 }
 0x20a   : > { %9263 = vmatprep.mubr.msk.f32.mxu0 %vm292_vm0, %v12494_v15 }
 0x20d   : > { %9264 = vmatmul.mubr.msk.f32.gmra.mrb[28].mxu0 %vm292_vm0, %v12495_v17 }
 0x20e   : > { %9266 = vmatprep.mubr.msk.f32.mxu0 %vm292_vm0, %v7842_v16 }
 0x211   : > { %9267 = vmatmul.mubr.msk.f32.gmra.mrb[30].mxu0 %vm292_vm0, %v7843_v18 }
 0x212   : > { %9271 = vmatprep.mubr.msk.f32.mxu0 %vm292_vm0, %v12496_v19 }
 0x215   : > { %9272 = vmatmul.mubr.msk.f32.vlgmr.msra.gmra.mrb[0].mxu0 %vm292_vm0, %v12497_v20 }
 0x216   : > { %9274 = vmatprep.mubr.msk.f32.mxu0 %vm292_vm0, %v12498_v21 }
 0x219   : > { %9275 = vmatmul.mubr.msk.f32.gmra.mrb[2].mxu0 %vm292_vm0, %v12499_v22 }
 0x21a   : > { %9277 = vmatprep.mubr.msk.f32.mxu0 %vm292_vm0, %v12500_v23 }
 0x21d   : > { %9278 = vmatmul.mubr.msk.f32.gmra.mrb[4].mxu0 %vm292_vm0, %v12468_v28  ;;  %v12508_v28 = vld [vmem:[#allocation26_spill] sm:$0xff] }
 0x21e   : > { %9280 = vmatprep.mubr.msk.f32.mxu0 %vm292_vm0, %v12501_v24 }
 0x221   : > { %9281 = vmatmul.mubr.msk.f32.gmra.mrb[6].mxu0 %vm292_vm0, %v12502_v25 }
 0x222   : > { %9283 = vmatprep.mubr.msk.f32.mxu0 %vm292_vm0, %v12503_v26 }
 0x225   : > { %9284 = vmatmul.mubr.msk.f32.gmra.mrb[8].mxu0 %vm292_vm0, %v12504_v42 }
 0x226   : > { %9286 = vmatprep.mubr.msk.f32.mxu0 %vm292_vm0, %v12505_v43 }
 0x229   : > { %9287 = vmatmul.mubr.msk.f32.gmra.mrb[10].mxu0 %vm292_vm0, %v12506_v44 }
 0x22a   : > { %9289 = vmatprep.mubr.msk.f32.mxu0 %vm292_vm0, %v12507_v45 }
 0x22d   : > { %9290 = vmatmul.mubr.msk.f32.gmra.mrb[12].mxu0 %vm292_vm0, %v12508_v28 }
 0x22e   : > { %9292 = vmatprep.mubr.msk.f32.mxu0 %vm292_vm0, %v12509_v46 }
 0x231   : > { %9293 = vmatmul.mubr.msk.f32.gmra.mrb[14].mxu0 %vm292_vm0, %v12478_v27  ;;  %v12512_v27 = vld [vmem:[#allocation34_spill] sm:$0xff] }
 0x232   : > { %9295 = vmatprep.mubr.msk.f32.mxu0 %vm292_vm0, %v12510_v47 }
 0x235   : > { %9296 = vmatmul.mubr.msk.f32.gmra.mrb[16].mxu0 %vm292_vm0, %v12480_v30  ;;  %v7907_v30 = vld [vmem:[%s10350_s27 + $0x19a] sm:$0xff] }
 0x236   : > { %9298 = vmatprep.mubr.msk.f32.mxu0 %vm292_vm0, %v12481_v29  ;;  %v12513_v29 = vld [vmem:[#allocation36_spill] sm:$0xff] }
 0x239   : > { %9299 = vmatmul.mubr.msk.f32.gmra.mrb[18].mxu0 %vm292_vm0, %v12511_v48 }
 0x23a   : > { %9301 = vmatprep.mubr.msk.f32.mxu0 %vm292_vm0, %v12483_v39 }
 0x23d   : > { %9302 = vmatmul.mubr.msk.f32.gmra.mrb[20].mxu0 %vm292_vm0, %v10800_v32  ;;  %v7908_v32 = vld [vmem:[%s10350_s27 + $0x1a2] sm:$0xff] }
 0x23e   : > { %9304 = vmatprep.mubr.msk.f32.mxu0 %vm292_vm0, %v12512_v27 }
 0x241   : > { %9305 = vmatmul.mubr.msk.f32.gmra.mrb[22].mxu0 %vm292_vm0, %v10810_v5 }
 0x242   : > { %9307 = vmatprep.mubr.msk.f32.mxu0 %vm292_vm0, %v12485_v33 }
 0x245   : > { %9308 = vmatmul.mubr.msk.f32.gmra.mrb[24].mxu0 %vm292_vm0, %v10820_v35 }
 0x246   : > { %9310 = vmatprep.mubr.msk.f32.mxu0 %vm292_vm0, %v12513_v29 }
 0x249   : > { %9311 = vmatmul.mubr.msk.f32.gmra.mrb[26].mxu0 %vm292_vm0, %v10830_v36 }
 0x24a   : > { %9313 = vmatprep.mubr.msk.f32.mxu0 %vm292_vm0, %v11043_v31 }
 0x24d   : > { %9314 = vmatmul.mubr.msk.f32.gmra.mrb[28].mxu0 %vm292_vm0, %v11050_v4 }
 0x24e   : > { %9316 = vmatprep.mubr.msk.f32.mxu0 %vm292_vm0, %v7907_v30 }
 0x251   : > { %9317 = vmatmul.mubr.msk.f32.gmra.mrb[30].mxu0 %vm292_vm0, %v7908_v32 }
 0x2e8   : > { %v9273_v56 = vpop.f32.mrb[0].mxu0 }
 0x2e9   : > { %v3654_v57 = vadd.f32 %v9273_v56, %v11320_v55  ;;  %v3455_v58 = vpop.f32.mrb[1].mxu0 }
 0x2ea   : > { %v3653_v59 = vadd.f32 %v11320_v55, %v3455_v58 }
 0x2eb   : > { %v3686_v60 = vmax.f32 %v3654_v57, 0.0 }
 0x2ec   : > { %v3685_v61 = vmax.f32 %v3653_v59, 0.0  ;;  %v9276_v62 = vpop.f32.mrb[2].mxu0 }
 0x2ed   : > { %3774 = vst.msk [vmem:[#allocation2 + $0x21] sm:$0xff] %vm292_vm0, %v3686_v60  ;;  %v3656_v63 = vadd.f32 %v9276_v62, %v11320_v55  ;;  %v3465_v0 = vpop.f32.mrb[3].mxu0 }
 0x2ee   : > { %3773 = vst.msk [vmem:[#allocation2 + $0x19] sm:$0xff] %vm292_vm0, %v3685_v61  ;;  %v3655_v1 = vadd.f32 %v11320_v55, %v3465_v0 }
 0x2ef   : > { %v3688_v2 = vmax.f32 %v3656_v63, 0.0 }
 0x2f0   : > { %v3687_v3 = vmax.f32 %v3655_v1, 0.0  ;;  %v9279_v36 = vpop.f32.mrb[4].mxu0 }
 0x2f1   : > { %3776 = vst.msk [vmem:[#allocation2 + $0x39] sm:$0xff] %vm292_vm0, %v3688_v2  ;;  %v3658_v5 = vadd.f32 %v9279_v36, %v11320_v55  ;;  %v3475_v35 = vpop.f32.mrb[5].mxu0 }
 0x2f2   : > { %3775 = vst.msk [vmem:[#allocation2 + $0x31] sm:$0xff] %vm292_vm0, %v3687_v3  ;;  %v3657_v38 = vadd.f32 %v11320_v55, %v3475_v35 }
 0x2f3   : > { %v3690_v34 = vmax.f32 %v3658_v5, 0.0 }
 0x2f4   : > { %v3689_v37 = vmax.f32 %v3657_v38, 0.0  ;;  %v9282_v6 = vpop.f32.mrb[6].mxu0  ;;  %v11340_v40 = vld [vmem:[#allocation2 + $0x21] sm:$0xff] }
 0x2f5   : > { %3778 = vst.msk [vmem:[#allocation2 + $0x51] sm:$0xff] %vm292_vm0, %v3690_v34  ;;  %v3660_v33 = vadd.f32 %v9282_v6, %v11320_v55  ;;  %v3485_v31 = vpop.f32.mrb[7].mxu0  ;;  %v11334_v39 = vld [vmem:[#allocation2 + $0x19] sm:$0xff] }
 0x2f6   : > { %3777 = vst.msk [vmem:[#allocation2 + $0x49] sm:$0xff] %vm292_vm0, %v3689_v37  ;;  %v3659_v4 = vadd.f32 %v11320_v55, %v3485_v31  ;;  %9324 = vmatprep.mubr.msk.f32.mxu1 %vm292_vm0, %v11334_v39 }
 0x2f7   : > { %v3692_v41 = vmax.f32 %v3660_v33, 0.0  ;;  %9325 = vmatmul.mubr.msk.f32.gmra.mrb[2].mxu1 %vm292_vm0, %v11340_v40 }
 0x2f8   : > { %v3691_v7 = vmax.f32 %v3659_v4, 0.0  ;;  %v9285_v8 = vpop.f32.mrb[8].mxu0  ;;  %v11352_v13 = vld [vmem:[#allocation2 + $0x39] sm:$0xff] }
 0x2f9   : > { %3780 = vst.msk [vmem:[#allocation2 + $0x69] sm:$0xff] %vm292_vm0, %v3692_v41  ;;  %v3662_v9 = vadd.f32 %v9285_v8, %v11320_v55  ;;  %v3495_v10 = vpop.f32.mrb[9].mxu0  ;;  %v11346_v11 = vld [vmem:[#allocation2 + $0x31] sm:$0xff] }
 0x2fa   : > { %3779 = vst.msk [vmem:[#allocation2 + $0x61] sm:$0xff] %vm292_vm0, %v3691_v7  ;;  %v3661_v12 = vadd.f32 %v11320_v55, %v3495_v10  ;;  %9327 = vmatprep.mubr.msk.f32.mxu1 %vm292_vm0, %v11346_v11 }
 0x2fb   : > { %v3694_v14 = vmax.f32 %v3662_v9, 0.0  ;;  %9328 = vmatmul.mubr.msk.f32.gmra.mrb[4].mxu1 %vm292_vm0, %v11352_v13 }
 0x2fc   : > { %v3693_v15 = vmax.f32 %v3661_v12, 0.0  ;;  %v9288_v16 = vpop.f32.mrb[10].mxu0  ;;  %v11364_v21 = vld [vmem:[#allocation2 + $0x51] sm:$0xff] }
 0x2fd   : > { %3782 = vst.msk [vmem:[#allocation2 + $0x81] sm:$0xff] %vm292_vm0, %v3694_v14  ;;  %v3664_v17 = vadd.f32 %v9288_v16, %v11320_v55  ;;  %v3505_v18 = vpop.f32.mrb[11].mxu0  ;;  %v11358_v19 = vld [vmem:[#allocation2 + $0x49] sm:$0xff] }
 0x2fe   : > { %3781 = vst.msk [vmem:[#allocation2 + $0x79] sm:$0xff] %vm292_vm0, %v3693_v15  ;;  %v3663_v20 = vadd.f32 %v11320_v55, %v3505_v18  ;;  %9330 = vmatprep.mubr.msk.f32.mxu1 %vm292_vm0, %v11358_v19 }
 0x2ff   : > { %v3696_v22 = vmax.f32 %v3664_v17, 0.0  ;;  %9331 = vmatmul.mubr.msk.f32.gmra.mrb[6].mxu1 %vm292_vm0, %v11364_v21 }
 0x300   : > { %v3695_v23 = vmax.f32 %v3663_v20, 0.0  ;;  %v9291_v24 = vpop.f32.mrb[12].mxu0  ;;  %v11376_v44 = vld [vmem:[#allocation2 + $0x69] sm:$0xff] }
 0x301   : > { %3784 = vst.msk [vmem:[#allocation2 + $0x99] sm:$0xff] %vm292_vm0, %v3696_v22  ;;  %v3666_v25 = vadd.f32 %v9291_v24, %v11320_v55  ;;  %v3515_v26 = vpop.f32.mrb[13].mxu0  ;;  %v11370_v42 = vld [vmem:[#allocation2 + $0x61] sm:$0xff] }
 0x302   : > { %3783 = vst.msk [vmem:[#allocation2 + $0x91] sm:$0xff] %vm292_vm0, %v3695_v23  ;;  %v3665_v43 = vadd.f32 %v11320_v55, %v3515_v26  ;;  %9333 = vmatprep.mubr.msk.f32.mxu1 %vm292_vm0, %v11370_v42 }
 0x303   : > { %v3698_v45 = vmax.f32 %v3666_v25, 0.0  ;;  %9334 = vmatmul.mubr.msk.f32.gmra.mrb[8].mxu1 %vm292_vm0, %v11376_v44 }
 0x304   : > { %v3697_v28 = vmax.f32 %v3665_v43, 0.0  ;;  %v9294_v46 = vpop.f32.mrb[14].mxu0  ;;  %v11388_v30 = vld [vmem:[#allocation2 + $0x81] sm:$0xff] }
 0x305   : > { %3786 = vst.msk [vmem:[#allocation2 + $0xb1] sm:$0xff] %vm292_vm0, %v3698_v45  ;;  %v3668_v47 = vadd.f32 %v9294_v46, %v11320_v55  ;;  %v3525_v48 = vpop.f32.mrb[15].mxu0  ;;  %v11382_v27 = vld [vmem:[#allocation2 + $0x79] sm:$0xff] }
 0x306   : > { %3785 = vst.msk [vmem:[#allocation2 + $0xa9] sm:$0xff] %vm292_vm0, %v3697_v28  ;;  %v3667_v29 = vadd.f32 %v11320_v55, %v3525_v48  ;;  %9336 = vmatprep.mubr.msk.f32.mxu1 %vm292_vm0, %v11382_v27 }
 0x307   : > { %v3700_v32 = vmax.f32 %v3668_v47, 0.0  ;;  %9337 = vmatmul.mubr.msk.f32.gmra.mrb[10].mxu1 %vm292_vm0, %v11388_v30 }
 0x308   : > { %v3699_v49 = vmax.f32 %v3667_v29, 0.0  ;;  %v9297_v50 = vpop.f32.mrb[16].mxu0  ;;  %v11400_v57 = vld [vmem:[#allocation2 + $0x99] sm:$0xff] }
 0x309   : > { %3788 = vst.msk [vmem:[#allocation2 + $0xc9] sm:$0xff] %vm292_vm0, %v3700_v32  ;;  %v3670_v51 = vadd.f32 %v9297_v50, %v11320_v55  ;;  %v3535_v52 = vpop.f32.mrb[17].mxu0  ;;  %v11394_v53 = vld [vmem:[#allocation2 + $0x91] sm:$0xff] }
 0x30a   : > { %3787 = vst.msk [vmem:[#allocation2 + $0xc1] sm:$0xff] %vm292_vm0, %v3699_v49  ;;  %v3669_v56 = vadd.f32 %v11320_v55, %v3535_v52  ;;  %9339 = vmatprep.mubr.msk.f32.mxu1 %vm292_vm0, %v11394_v53 }
 0x30b   : > { %v3702_v58 = vmax.f32 %v3670_v51, 0.0  ;;  %9340 = vmatmul.mubr.msk.f32.gmra.mrb[12].mxu1 %vm292_vm0, %v11400_v57 }
 0x30c   : > { %v3701_v59 = vmax.f32 %v3669_v56, 0.0  ;;  %v9300_v60 = vpop.f32.mrb[18].mxu0  ;;  %v11412_v1 = vld [vmem:[#allocation2 + $0xb1] sm:$0xff] }
 0x30d   : > { %3790 = vst.msk [vmem:[#allocation2 + $0xe1] sm:$0xff] %vm292_vm0, %v3702_v58  ;;  %v3672_v61 = vadd.f32 %v9300_v60, %v11320_v55  ;;  %v3545_v62 = vpop.f32.mrb[19].mxu0  ;;  %v11406_v63 = vld [vmem:[#allocation2 + $0xa9] sm:$0xff] }
 0x30e   : > { %3789 = vst.msk [vmem:[#allocation2 + $0xd9] sm:$0xff] %vm292_vm0, %v3701_v59  ;;  %v3671_v0 = vadd.f32 %v11320_v55, %v3545_v62  ;;  %9342 = vmatprep.mubr.msk.f32.mxu1 %vm292_vm0, %v11406_v63 }
 0x30f   : > { %v3704_v2 = vmax.f32 %v3672_v61, 0.0  ;;  %9343 = vmatmul.mubr.msk.f32.gmra.mrb[14].mxu1 %vm292_vm0, %v11412_v1 }
 0x310   : > { %v3703_v3 = vmax.f32 %v3671_v0, 0.0  ;;  %v9303_v36 = vpop.f32.mrb[20].mxu0  ;;  %v11424_v37 = vld [vmem:[#allocation2 + $0xc9] sm:$0xff] }
 0x311   : > { %3792 = vst.msk [vmem:[#allocation2 + $0xf9] sm:$0xff] %vm292_vm0, %v3704_v2  ;;  %v3674_v5 = vadd.f32 %v9303_v36, %v11320_v55  ;;  %v3555_v35 = vpop.f32.mrb[21].mxu0  ;;  %v11418_v38 = vld [vmem:[#allocation2 + $0xc1] sm:$0xff] }
 0x312   : > { %3791 = vst.msk [vmem:[#allocation2 + $0xf1] sm:$0xff] %vm292_vm0, %v3703_v3  ;;  %v3673_v34 = vadd.f32 %v11320_v55, %v3555_v35  ;;  %9345 = vmatprep.mubr.msk.f32.mxu1 %vm292_vm0, %v11418_v38  ;;  %v3805_v35 = vld [vmem:[#allocation2] sm:$0xff] }
 0x313   : > { %v3706_v6 = vmax.f32 %v3674_v5, 0.0  ;;  %9346 = vmatmul.mubr.msk.f32.gmra.mrb[16].mxu1 %vm292_vm0, %v11424_v37 }
 0x314   : > { %v3705_v33 = vmax.f32 %v3673_v34, 0.0  ;;  %v9306_v31 = vpop.f32.mrb[22].mxu0  ;;  %v11436_v9 = vld [vmem:[#allocation2 + $0xe1] sm:$0xff] }
 0x315   : > { %3794 = vst.msk [vmem:[#allocation2 + $0x111] sm:$0xff] %vm292_vm0, %v3706_v6  ;;  %v3676_v4 = vadd.f32 %v9306_v31, %v11320_v55  ;;  %v3565_v41 = vpop.f32.mrb[23].mxu0  ;;  %v11430_v7 = vld [vmem:[#allocation2 + $0xd9] sm:$0xff]  ;;  %v3806_v6 = vld [vmem:[#allocation2 + $0x8] sm:$0xff] }
 0x316   : > { %3793 = vst.msk [vmem:[#allocation2 + $0x109] sm:$0xff] %vm292_vm0, %v3705_v33  ;;  %v3675_v8 = vadd.f32 %v11320_v55, %v3565_v41  ;;  %9348 = vmatprep.mubr.msk.f32.mxu1 %vm292_vm0, %v11430_v7  ;;  %v11510_v33 = vld [vmem:[%s12302_s3 + $0x18] sm:$0xff]  ;;  %v11523_v41 = vld [vmem:[#allocation2 + $0x30] sm:$0xff] }
 0x317   : > { %v3708_v10 = vmax.f32 %v3676_v4, 0.0  ;;  %9349 = vmatmul.mubr.msk.f32.gmra.mrb[18].mxu1 %vm292_vm0, %v11436_v9  ;;  %v11513_v31 = vld [vmem:[#allocation2 + $0x18] sm:$0xff]  ;;  %v11519_v4 = vld [vmem:[#allocation2 + $0x20] sm:$0xff] }
 0x318   : > { %v3707_v12 = vmax.f32 %v3675_v8, 0.0  ;;  %v9309_v14 = vpop.f32.mrb[24].mxu0  ;;  %v11448_v20 = vld [vmem:[#allocation2 + $0xf9] sm:$0xff] }
 0x319   : > { %3796 = vst.msk [vmem:[#allocation2 + $0x129] sm:$0xff] %vm292_vm0, %v3708_v10  ;;  %v3678_v15 = vadd.f32 %v9309_v14, %v11320_v55  ;;  %v3575_v16 = vpop.f32.mrb[25].mxu0  ;;  %v11442_v17 = vld [vmem:[#allocation2 + $0xf1] sm:$0xff]  ;;  %v11543_v14 = vld [vmem:[#allocation2 + $0x68] sm:$0xff] }
 0x31a   : > { %3795 = vst.msk [vmem:[#allocation2 + $0x121] sm:$0xff] %vm292_vm0, %v3707_v12  ;;  %v3677_v18 = vadd.f32 %v11320_v55, %v3575_v16  ;;  %9351 = vmatprep.mubr.msk.f32.mxu1 %vm292_vm0, %v11442_v17  ;;  %v11527_v8 = vld [vmem:[#allocation2 + $0x38] sm:$0xff]  ;;  %v11535_v10 = vld [vmem:[#allocation2 + $0x50] sm:$0xff]  ;;  %v11539_v12 = vld [vmem:[#allocation2 + $0x60] sm:$0xff] }
 0x31b   : > { %v3710_v22 = vmax.f32 %v3678_v15, 0.0  ;;  %9352 = vmatmul.mubr.msk.f32.gmra.mrb[20].mxu1 %vm292_vm0, %v11448_v20  ;;  %v11547_v15 = vld [vmem:[#allocation2 + $0x78] sm:$0xff]  ;;  %v11551_v16 = vld [vmem:[#allocation2 + $0x80] sm:$0xff] }
 0x31c   : > { %v3709_v23 = vmax.f32 %v3677_v18, 0.0  ;;  %v9312_v24 = vpop.f32.mrb[26].mxu0  ;;  %v11460_v28 = vld [vmem:[#allocation2 + $0x111] sm:$0xff] }
 0x31d   : > { %3798 = vst.msk [vmem:[#allocation2 + $0x141] sm:$0xff] %vm292_vm0, %v3710_v22  ;;  %v3680_v25 = vadd.f32 %v9312_v24, %v11320_v55  ;;  %v3585_v26 = vpop.f32.mrb[27].mxu0  ;;  %v11454_v43 = vld [vmem:[#allocation2 + $0x109] sm:$0xff]  ;;  %v11559_v22 = vld [vmem:[#allocation2 + $0x98] sm:$0xff] }
 0x31e   : > { %3797 = vst.msk [vmem:[#allocation2 + $0x139] sm:$0xff] %vm292_vm0, %v3709_v23  ;;  %v3679_v45 = vadd.f32 %v11320_v55, %v3585_v26  ;;  %9354 = vmatprep.mubr.msk.f32.mxu1 %vm292_vm0, %v11454_v43  ;;  %v11555_v18 = vld [vmem:[#allocation2 + $0x90] sm:$0xff]  ;;  %v11563_v23 = vld [vmem:[#allocation2 + $0xa8] sm:$0xff] }
 0x31f   : > { %v3712_v46 = vmax.f32 %v3680_v25, 0.0  ;;  %9355 = vmatmul.mubr.msk.f32.gmra.mrb[22].mxu1 %vm292_vm0, %v11460_v28  ;;  %v11567_v24 = vld [vmem:[#allocation2 + $0xb0] sm:$0xff]  ;;  %v11571_v25 = vld [vmem:[#allocation2 + $0xc0] sm:$0xff]  ;;  %v11575_v26 = vld [vmem:[#allocation2 + $0xc8] sm:$0xff] }
 0x320   : > { %v3711_v47 = vmax.f32 %v3679_v45, 0.0  ;;  %v9315_v48 = vpop.f32.mrb[28].mxu0  ;;  %v11472_v51 = vld [vmem:[#allocation2 + $0x129] sm:$0xff]  ;;  %v11579_v45 = vld [vmem:[#allocation2 + $0xd8] sm:$0xff] }
 0x321   : > { %3800 = vst.msk [vmem:[#allocation2 + $0x159] sm:$0xff] %vm292_vm0, %v3712_v46  ;;  %v3682_v29 = vadd.f32 %v9315_v48, %v11320_v55  ;;  %v3595_v32 = vpop.f32.mrb[29].mxu0  ;;  %v11466_v49 = vld [vmem:[#allocation2 + $0x121] sm:$0xff]  ;;  %v11591_v48 = vld [vmem:[#allocation2 + $0xf8] sm:$0xff] }
 0x322   : > { %3799 = vst.msk [vmem:[#allocation2 + $0x151] sm:$0xff] %vm292_vm0, %v3711_v47  ;;  %v3681_v50 = vadd.f32 %v11320_v55, %v3595_v32  ;;  %9357 = vmatprep.mubr.msk.f32.mxu1 %vm292_vm0, %v11466_v49  ;;  %v11583_v46 = vld [vmem:[#allocation2 + $0xe0] sm:$0xff]  ;;  %v11587_v47 = vld [vmem:[#allocation2 + $0xf0] sm:$0xff] }
 0x323   : > { %v3714_v52 = vmax.f32 %v3682_v29, 0.0  ;;  %9358 = vmatmul.mubr.msk.f32.gmra.mrb[24].mxu1 %vm292_vm0, %v11472_v51  ;;  %v11595_v29 = vld [vmem:[#allocation2 + $0x108] sm:$0xff]  ;;  %v11599_v32 = vld [vmem:[#allocation2 + $0x110] sm:$0xff] }
 0x324   : > { %v3713_v56 = vmax.f32 %v3681_v50, 0.0  ;;  %v9318_v58 = vpop.f32.mrb[30].mxu0  ;;  %v11484_v0 = vld [vmem:[#allocation2 + $0x141] sm:$0xff] }
 0x325   : > { %3802 = vst.msk [vmem:[#allocation2 + $0x171] sm:$0xff] %vm292_vm0, %v3714_v52  ;;  %v3684_v59 = vadd.f32 %v9318_v58, %v11320_v55  ;;  %v3605_v60 = vpop.f32.mrb[31].mxu0  ;;  %v11478_v61 = vld [vmem:[#allocation2 + $0x139] sm:$0xff]  ;;  %v11607_v52 = vld [vmem:[#allocation2 + $0x128] sm:$0xff] }
 0x326   : > { %3801 = vst.msk [vmem:[#allocation2 + $0x169] sm:$0xff] %vm292_vm0, %v3713_v56  ;;  %v3683_v62 = vadd.f32 %v11320_v55, %v3605_v60  ;;  %9360 = vmatprep.mubr.msk.f32.mxu1 %vm292_vm0, %v11478_v61  ;;  %v11603_v50 = vld [vmem:[#allocation2 + $0x120] sm:$0xff]  ;;  %v11611_v56 = vld [vmem:[#allocation2 + $0x138] sm:$0xff] }
 0x327   : > { %v3716_v2 = vmax.f32 %v3684_v59, 0.0  ;;  %9361 = vmatmul.mubr.msk.f32.gmra.mrb[26].mxu1 %vm292_vm0, %v11484_v0  ;;  %v11615_v58 = vld [vmem:[#allocation2 + $0x140] sm:$0xff] }
 0x328   : > { %v3715_v3 = vmax.f32 %v3683_v62, 0.0  ;;  %v11494_v55 = vld [vmem:[#allocation2 + $0x159] sm:$0xff] }
 0x329   : > { %3804 = vst.msk [vmem:[#allocation2 + $0x189] sm:$0xff] %vm292_vm0, %v3716_v2  ;;  %v11489_v36 = vld [vmem:[#allocation2 + $0x151] sm:$0xff]  ;;  %v4514_v2 = vld [vmem:[#allocation2 + $0x2] sm:$0xff] }
 0x32a   : > { %3803 = vst.msk [vmem:[#allocation2 + $0x181] sm:$0xff] %vm292_vm0, %v3715_v3  ;;  %9363 = vmatprep.mubr.msk.f32.mxu1 %vm292_vm0, %v11489_v36  ;;  %v11619_v59 = vld [vmem:[#allocation2 + $0x150] sm:$0xff]  ;;  %v11623_v60 = vld [vmem:[#allocation2 + $0x158] sm:$0xff] }
 0x32b   : > { %9364 = vmatmul.mubr.msk.f32.gmra.mrb[28].mxu1 %vm292_vm0, %v11494_v55 }
 0x32c   : > { %v11502_v34 = vld [vmem:[#allocation2 + $0x171] sm:$0xff] }
 0x32d   : > { %v11498_v5 = vld [vmem:[#allocation2 + $0x169] sm:$0xff]  ;;  %12515 = vst [vmem:[#allocation12_spill] sm:$0xff] %v11502_v34 }
 0x32e   : > { %12514 = vst [vmem:[#allocation11_spill] sm:$0xff] %v11498_v5  ;;  %9366 = vmatprep.mubr.msk.f32.mxu1 %vm292_vm0, %v11498_v5  ;;  %v11627_v62 = vld [vmem:[#allocation2 + $0x168] sm:$0xff]  ;;  %v11631_v3 = vld [vmem:[#allocation2 + $0x170] sm:$0xff] }
 0x32f   : > { %9367 = vmatmul.mubr.msk.f32.gmra.mrb[30].mxu1 %vm292_vm0, %v11502_v34  ;;  %v11642_v34 = vld [vmem:[#allocation2 + $0x1a] sm:$0xff]  ;;  %v11648_v5 = vld [vmem:[#allocation2 + $0x22] sm:$0xff] }
 0x330   : > { %9371 = vmatprep.mubr.msk.f32.mxu1 %vm292_vm0, %v3805_v35  ;;  %v4515_v35 = vld [vmem:[#allocation2 + $0xa] sm:$0xff]  ;;  %12516 = vst [vmem:[#allocation18_spill] sm:$0xff] %v11642_v34  ;;  %12517 = vst [vmem:[#allocation28_spill] sm:$0xff] %v11648_v5 }
 0x333   : > { %9372 = vmatmul.mubr.msk.f32.vlgmr.msra.gmra.mrb[0].mxu1 %vm292_vm0, %v3806_v6  ;;  %v11639_v6 = vld [vmem:[%s12302_s3 + $0x20] sm:$0xff] }
 0x334   : > { %9420 = vmatpush3.msra.mxu1 %v11314_v54  ;;  %9374 = vmatprep.mubr.msk.f32.mxu1 %vm292_vm0, %v11513_v31  ;;  %v11531_v54 = vld [vmem:[#allocation2 + $0x48] sm:$0xff] }
 0x335   : > { %9469 = vmatprep.subr.mxu1 %v11510_v33 }
 0x337   : > { %9375 = vmatmul.mubr.msk.f32.gmra.mrb[2].mxu1 %vm292_vm0, %v11519_v4 }
 0x338   : > { %9377 = vmatprep.mubr.msk.f32.mxu1 %vm292_vm0, %v11523_v41 }
 0x33b   : > { %9378 = vmatmul.mubr.msk.f32.gmra.mrb[4].mxu1 %vm292_vm0, %v11527_v8 }
 0x33c   : > { %9380 = vmatprep.mubr.msk.f32.mxu1 %vm292_vm0, %v11531_v54 }
 0x33f   : > { %9381 = vmatmul.mubr.msk.f32.gmra.mrb[6].mxu1 %vm292_vm0, %v11535_v10 }
 0x340   : > { %9383 = vmatprep.mubr.msk.f32.mxu1 %vm292_vm0, %v11539_v12 }
 0x343   : > { %9384 = vmatmul.mubr.msk.f32.gmra.mrb[8].mxu1 %vm292_vm0, %v11543_v14 }
 0x344   : > { %9386 = vmatprep.mubr.msk.f32.mxu1 %vm292_vm0, %v11547_v15 }
 0x347   : > { %9387 = vmatmul.mubr.msk.f32.gmra.mrb[10].mxu1 %vm292_vm0, %v11551_v16 }
 0x348   : > { %9389 = vmatprep.mubr.msk.f32.mxu1 %vm292_vm0, %v11555_v18 }
 0x34b   : > { %9390 = vmatmul.mubr.msk.f32.gmra.mrb[12].mxu1 %vm292_vm0, %v11559_v22 }
 0x34c   : > { %9392 = vmatprep.mubr.msk.f32.mxu1 %vm292_vm0, %v11563_v23 }
 0x34f   : > { %9393 = vmatmul.mubr.msk.f32.gmra.mrb[14].mxu1 %vm292_vm0, %v11567_v24 }
 0x350   : > { %9395 = vmatprep.mubr.msk.f32.mxu1 %vm292_vm0, %v11571_v25 }
 0x353   : > { %9396 = vmatmul.mubr.msk.f32.gmra.mrb[16].mxu1 %vm292_vm0, %v11575_v26 }
 0x354   : > { %9398 = vmatprep.mubr.msk.f32.mxu1 %vm292_vm0, %v11579_v45 }
 0x357   : > { %9399 = vmatmul.mubr.msk.f32.gmra.mrb[18].mxu1 %vm292_vm0, %v11583_v46 }
 0x358   : > { %9401 = vmatprep.mubr.msk.f32.mxu1 %vm292_vm0, %v11587_v47 }
 0x35b   : > { %9402 = vmatmul.mubr.msk.f32.gmra.mrb[20].mxu1 %vm292_vm0, %v11591_v48 }
 0x35c   : > { %9404 = vmatprep.mubr.msk.f32.mxu1 %vm292_vm0, %v11595_v29 }
 0x35f   : > { %9405 = vmatmul.mubr.msk.f32.gmra.mrb[22].mxu1 %vm292_vm0, %v11599_v32 }
 0x360   : > { %9407 = vmatprep.mubr.msk.f32.mxu1 %vm292_vm0, %v11603_v50 }
 0x363   : > { %9408 = vmatmul.mubr.msk.f32.gmra.mrb[24].mxu1 %vm292_vm0, %v11607_v52 }
 0x364   : > { %9410 = vmatprep.mubr.msk.f32.mxu1 %vm292_vm0, %v11611_v56 }
 0x367   : > { %9411 = vmatmul.mubr.msk.f32.gmra.mrb[26].mxu1 %vm292_vm0, %v11615_v58 }
 0x368   : > { %9413 = vmatprep.mubr.msk.f32.mxu1 %vm292_vm0, %v11619_v59 }
 0x36b   : > { %9414 = vmatmul.mubr.msk.f32.gmra.mrb[28].mxu1 %vm292_vm0, %v11623_v60 }
 0x36c   : > { %9416 = vmatprep.mubr.msk.f32.mxu1 %vm292_vm0, %v11627_v62 }
 0x36f   : > { %9417 = vmatmul.mubr.msk.f32.gmra.mrb[30].mxu1 %vm292_vm0, %v11631_v3 }
 0x370   : > { %9421 = vmatprep.mubr.msk.f32.mxu1 %vm292_vm0, %v4514_v2  ;;  %v11652_v2 = vld [vmem:[#allocation2 + $0x32] sm:$0xff] }
 0x371   : > { %12518 = vst [vmem:[#allocation30_spill] sm:$0xff] %v11652_v2 }
 0x373   : > { %9422 = vmatmul.mubr.msk.f32.vlgmr.msra.gmra.mrb[0].mxu1 %vm292_vm0, %v4515_v35  ;;  %v11656_v35 = vld [vmem:[#allocation2 + $0x3a] sm:$0xff] }
 0x374   : > { %9470 = vmatpush3.msra.mxu1 %v11510_v33  ;;  %9424 = vmatprep.mubr.msk.f32.mxu1 %vm292_vm0, %v11642_v34  ;;  %12519 = vst [vmem:[#allocation31_spill] sm:$0xff] %v11656_v35  ;;  %v11660_v33 = vld [vmem:[#allocation2 + $0x4a] sm:$0xff]  ;;  %v11664_v34 = vld [vmem:[#allocation2 + $0x52] sm:$0xff] }
 0x375   : > { %9519 = vmatprep.subr.mxu1 %v11639_v6  ;;  %12520 = vst [vmem:[#allocation33_spill] sm:$0xff] %v11660_v33  ;;  %12521 = vst [vmem:[#allocation35_spill] sm:$0xff] %v11664_v34 }
 0x377   : > { %9425 = vmatmul.mubr.msk.f32.gmra.mrb[2].mxu1 %vm292_vm0, %v11648_v5  ;;  %v11668_v5 = vld [vmem:[#allocation2 + $0x62] sm:$0xff] }
 0x378   : > { %9427 = vmatprep.mubr.msk.f32.mxu1 %vm292_vm0, %v11652_v2  ;;  %12522 = vst [vmem:[#allocation3_spill] sm:$0xff] %v11668_v5  ;;  %v11672_v2 = vld [vmem:[#allocation2 + $0x6a] sm:$0xff] }
 0x379   : > { %12523 = vst [vmem:[#allocation4_spill] sm:$0xff] %v11672_v2 }
 0x37b   : > { %9428 = vmatmul.mubr.msk.f32.gmra.mrb[4].mxu1 %vm292_vm0, %v11656_v35  ;;  %v11676_v35 = vld [vmem:[#allocation2 + $0x7a] sm:$0xff] }
 0x37c   : > { %9430 = vmatprep.mubr.msk.f32.mxu1 %vm292_vm0, %v11660_v33  ;;  %12524 = vst [vmem:[#allocation5_spill] sm:$0xff] %v11676_v35  ;;  %v11680_v33 = vld [vmem:[#allocation2 + $0x82] sm:$0xff] }
 0x37d   : > { %12525 = vst [vmem:[#allocation6_spill] sm:$0xff] %v11680_v33 }
 0x37f   : > { %9431 = vmatmul.mubr.msk.f32.gmra.mrb[6].mxu1 %vm292_vm0, %v11664_v34  ;;  %v11684_v34 = vld [vmem:[#allocation2 + $0x92] sm:$0xff] }
 0x380   : > { %9433 = vmatprep.mubr.msk.f32.mxu1 %vm292_vm0, %v11668_v5  ;;  %12526 = vst [vmem:[#allocation7_spill] sm:$0xff] %v11684_v34  ;;  %v11688_v5 = vld [vmem:[#allocation2 + $0x9a] sm:$0xff] }
 0x381   : > { %12527 = vst [vmem:[#allocation8_spill] sm:$0xff] %v11688_v5 }
 0x383   : > { %9434 = vmatmul.mubr.msk.f32.gmra.mrb[8].mxu1 %vm292_vm0, %v11672_v2  ;;  %v11692_v2 = vld [vmem:[#allocation2 + $0xaa] sm:$0xff] }
 0x384   : > { %9436 = vmatprep.mubr.msk.f32.mxu1 %vm292_vm0, %v11676_v35  ;;  %12528 = vst [vmem:[#allocation9_spill] sm:$0xff] %v11692_v2  ;;  %v11696_v35 = vld [vmem:[#allocation2 + $0xb2] sm:$0xff] }
 0x385   : > { %12529 = vst [vmem:[#allocation10_spill] sm:$0xff] %v11696_v35 }
 0x387   : > { %9437 = vmatmul.mubr.msk.f32.gmra.mrb[10].mxu1 %vm292_vm0, %v11680_v33  ;;  %v11700_v33 = vld [vmem:[#allocation2 + $0xc2] sm:$0xff] }
 0x388   : > { %9439 = vmatprep.mubr.msk.f32.mxu1 %vm292_vm0, %v11684_v34  ;;  %12530 = vst [vmem:[#allocation37_spill] sm:$0xff] %v11700_v33  ;;  %v11704_v34 = vld [vmem:[#allocation2 + $0xca] sm:$0xff] }
 0x389   : > { %12531 = vst [vmem:[#allocation38_spill] sm:$0xff] %v11704_v34 }
 0x38b   : > { %9440 = vmatmul.mubr.msk.f32.gmra.mrb[12].mxu1 %vm292_vm0, %v11688_v5  ;;  %v11708_v5 = vld [vmem:[#allocation2 + $0xda] sm:$0xff] }
 0x38c   : > { %9442 = vmatprep.mubr.msk.f32.mxu1 %vm292_vm0, %v11692_v2  ;;  %12532 = vst [vmem:[#allocation13_spill] sm:$0xff] %v11708_v5  ;;  %v11712_v2 = vld [vmem:[#allocation2 + $0xe2] sm:$0xff] }
 0x38d   : > { %12533 = vst [vmem:[#allocation14_spill] sm:$0xff] %v11712_v2 }
 0x38f   : > { %9443 = vmatmul.mubr.msk.f32.gmra.mrb[14].mxu1 %vm292_vm0, %v11696_v35  ;;  %v11716_v35 = vld [vmem:[#allocation2 + $0xf2] sm:$0xff] }
 0x390   : > { %9445 = vmatprep.mubr.msk.f32.mxu1 %vm292_vm0, %v11700_v33  ;;  %12534 = vst [vmem:[#allocation15_spill] sm:$0xff] %v11716_v35  ;;  %v11720_v33 = vld [vmem:[#allocation2 + $0xfa] sm:$0xff] }
 0x391   : > { %12535 = vst [vmem:[#allocation16_spill] sm:$0xff] %v11720_v33 }
 0x393   : > { %9446 = vmatmul.mubr.msk.f32.gmra.mrb[16].mxu1 %vm292_vm0, %v11704_v34  ;;  %v11724_v34 = vld [vmem:[#allocation2 + $0x10a] sm:$0xff] }
 0x394   : > { %9448 = vmatprep.mubr.msk.f32.mxu1 %vm292_vm0, %v11708_v5  ;;  %12536 = vst [vmem:[#allocation17_spill] sm:$0xff] %v11724_v34  ;;  %v11728_v5 = vld [vmem:[#allocation2 + $0x112] sm:$0xff] }
 0x395   : > { %12537 = vst [vmem:[#allocation19_spill] sm:$0xff] %v11728_v5 }
 0x397   : > { %9449 = vmatmul.mubr.msk.f32.gmra.mrb[18].mxu1 %vm292_vm0, %v11712_v2  ;;  %v11732_v2 = vld [vmem:[#allocation2 + $0x122] sm:$0xff] }
 0x398   : > { %9451 = vmatprep.mubr.msk.f32.mxu1 %vm292_vm0, %v11716_v35  ;;  %12538 = vst [vmem:[#allocation20_spill] sm:$0xff] %v11732_v2  ;;  %v11736_v35 = vld [vmem:[#allocation2 + $0x12a] sm:$0xff] }
 0x399   : > { %12539 = vst [vmem:[#allocation21_spill] sm:$0xff] %v11736_v35 }
 0x39b   : > { %9452 = vmatmul.mubr.msk.f32.gmra.mrb[20].mxu1 %vm292_vm0, %v11720_v33  ;;  %v11740_v33 = vld [vmem:[#allocation2 + $0x13a] sm:$0xff] }
 0x39c   : > { %9454 = vmatprep.mubr.msk.f32.mxu1 %vm292_vm0, %v11724_v34  ;;  %12540 = vst [vmem:[#allocation22_spill] sm:$0xff] %v11740_v33  ;;  %v11744_v34 = vld [vmem:[#allocation2 + $0x142] sm:$0xff] }
 0x39f   : > { %9455 = vmatmul.mubr.msk.f32.gmra.mrb[22].mxu1 %vm292_vm0, %v11728_v5  ;;  %v11748_v5 = vld [vmem:[#allocation2 + $0x152] sm:$0xff] }
 0x3a0   : > { %9457 = vmatprep.mubr.msk.f32.mxu1 %vm292_vm0, %v11732_v2  ;;  %12541 = vst [vmem:[#allocation23_spill] sm:$0xff] %v11748_v5  ;;  %v11752_v2 = vld [vmem:[#allocation2 + $0x15a] sm:$0xff] }
 0x3a3   : > { %9458 = vmatmul.mubr.msk.f32.gmra.mrb[24].mxu1 %vm292_vm0, %v11736_v35  ;;  %v11756_v35 = vld [vmem:[#allocation2 + $0x16a] sm:$0xff] }
 0x3a4   : > { %9460 = vmatprep.mubr.msk.f32.mxu1 %vm292_vm0, %v11740_v33  ;;  %12542 = vst [vmem:[#allocation24_spill] sm:$0xff] %v11756_v35  ;;  %v11760_v33 = vld [vmem:[#allocation2 + $0x172] sm:$0xff] }
 0x3a7   : > { %9461 = vmatmul.mubr.msk.f32.gmra.mrb[26].mxu1 %vm292_vm0, %v11744_v34 }
 0x3a8   : > { %9463 = vmatprep.mubr.msk.f32.mxu1 %vm292_vm0, %v11748_v5  ;;  %v8107_v5 = vld [vmem:[%s12302_s3 + $0x28] sm:$0xff] }
 0x3ab   : > { %9464 = vmatmul.mubr.msk.f32.gmra.mrb[28].mxu1 %vm292_vm0, %v11752_v2 }
 0x3ac   : > { %9466 = vmatprep.mubr.msk.f32.mxu1 %vm292_vm0, %v11756_v35 }
 0x3af   : > { %9467 = vmatmul.mubr.msk.f32.gmra.mrb[30].mxu1 %vm292_vm0, %v11760_v33 }
 0x3b0   : > { %9471 = vmatprep.mubr.msk.f32.mxu1 %vm292_vm0, %v11513_v31  ;;  %v11828_v31 = vld [vmem:[#allocation2 + $0x180] sm:$0xff] }
 0x3b3   : > { %9472 = vmatmul.mubr.msk.f32.vlgmr.msra.gmra.mrb[0].mxu1 %vm292_vm0, %v11519_v4  ;;  %v11832_v4 = vld [vmem:[#allocation2 + $0x188] sm:$0xff] }
 0x3b4   : > { %9520 = vmatpush3.msra.mxu1 %v11639_v6  ;;  %9474 = vmatprep.mubr.msk.f32.mxu1 %vm292_vm0, %v11523_v41  ;;  %v8140_v6 = vld [vmem:[%s12302_s3 + $0x30] sm:$0xff] }
 0x3b5   : > { %9569 = vmatprep.subr.mxu1 %v8107_v5 }
 0x3b7   : > { %9475 = vmatmul.mubr.msk.f32.gmra.mrb[2].mxu1 %vm292_vm0, %v11527_v8 }
 0x3b8   : > { %9477 = vmatprep.mubr.msk.f32.mxu1 %vm292_vm0, %v11531_v54 }
 0x3bb   : > { %9478 = vmatmul.mubr.msk.f32.gmra.mrb[4].mxu1 %vm292_vm0, %v11535_v10 }
 0x3bc   : > { %9480 = vmatprep.mubr.msk.f32.mxu1 %vm292_vm0, %v11539_v12 }
 0x3bf   : > { %9481 = vmatmul.mubr.msk.f32.gmra.mrb[6].mxu1 %vm292_vm0, %v11543_v14 }
 0x3c0   : > { %9483 = vmatprep.mubr.msk.f32.mxu1 %vm292_vm0, %v11547_v15 }
 0x3c3   : > { %9484 = vmatmul.mubr.msk.f32.gmra.mrb[8].mxu1 %vm292_vm0, %v11551_v16 }
 0x3c4   : > { %9486 = vmatprep.mubr.msk.f32.mxu1 %vm292_vm0, %v11555_v18 }
 0x3c7   : > { %9487 = vmatmul.mubr.msk.f32.gmra.mrb[10].mxu1 %vm292_vm0, %v11559_v22 }
 0x3c8   : > { %9489 = vmatprep.mubr.msk.f32.mxu1 %vm292_vm0, %v11563_v23 }
 0x3cb   : > { %9490 = vmatmul.mubr.msk.f32.gmra.mrb[12].mxu1 %vm292_vm0, %v11567_v24 }
 0x3cc   : > { %9492 = vmatprep.mubr.msk.f32.mxu1 %vm292_vm0, %v11571_v25 }
 0x3cf   : > { %9493 = vmatmul.mubr.msk.f32.gmra.mrb[14].mxu1 %vm292_vm0, %v11575_v26 }
 0x3d0   : > { %9495 = vmatprep.mubr.msk.f32.mxu1 %vm292_vm0, %v11579_v45 }
 0x3d3   : > { %9496 = vmatmul.mubr.msk.f32.gmra.mrb[16].mxu1 %vm292_vm0, %v11583_v46 }
 0x3d4   : > { %9498 = vmatprep.mubr.msk.f32.mxu1 %vm292_vm0, %v11587_v47 }
 0x3d7   : > { %9499 = vmatmul.mubr.msk.f32.gmra.mrb[18].mxu1 %vm292_vm0, %v11591_v48 }
 0x3d8   : > { %9501 = vmatprep.mubr.msk.f32.mxu1 %vm292_vm0, %v11595_v29 }
 0x3db   : > { %9502 = vmatmul.mubr.msk.f32.gmra.mrb[20].mxu1 %vm292_vm0, %v11599_v32 }
 0x3dc   : > { %9504 = vmatprep.mubr.msk.f32.mxu1 %vm292_vm0, %v11603_v50 }
 0x3df   : > { %9505 = vmatmul.mubr.msk.f32.gmra.mrb[22].mxu1 %vm292_vm0, %v11607_v52 }
 0x3e0   : > { %9507 = vmatprep.mubr.msk.f32.mxu1 %vm292_vm0, %v11611_v56 }
 0x3e3   : > { %9508 = vmatmul.mubr.msk.f32.gmra.mrb[24].mxu1 %vm292_vm0, %v11615_v58 }
 0x3e4   : > { %9510 = vmatprep.mubr.msk.f32.mxu1 %vm292_vm0, %v11619_v59 }
 0x3e7   : > { %9511 = vmatmul.mubr.msk.f32.gmra.mrb[26].mxu1 %vm292_vm0, %v11623_v60 }
 0x3e8   : > { %9513 = vmatprep.mubr.msk.f32.mxu1 %vm292_vm0, %v11627_v62 }
 0x3eb   : > { %9514 = vmatmul.mubr.msk.f32.gmra.mrb[28].mxu1 %vm292_vm0, %v11631_v3 }
 0x3ec   : > { %9516 = vmatprep.mubr.msk.f32.mxu1 %vm292_vm0, %v11828_v31 }
 0x3ef   : > { %9517 = vmatmul.mubr.msk.f32.gmra.mrb[30].mxu1 %vm292_vm0, %v11832_v4 }
 0x3f0   : > { %9521 = vmatprep.mubr.msk.f32.mxu1 %vm292_vm0, %v11334_v39  ;;  %v12543_v39 = vld [vmem:[#allocation11_spill] sm:$0xff] }
 0x3f3   : > { %9522 = vmatmul.mubr.msk.f32.vlgmr.msra.gmra.mrb[0].mxu1 %vm292_vm0, %v11340_v40  ;;  %v12544_v40 = vld [vmem:[#allocation12_spill] sm:$0xff] }
 0x3f4   : > { %9570 = vmatpush3.msra.mxu1 %v8107_v5  ;;  %9524 = vmatprep.mubr.msk.f32.mxu1 %vm292_vm0, %v11346_v11  ;;  %v11899_v11 = vld [vmem:[#allocation2 + $0x181] sm:$0xff]  ;;  %v12552_v5 = vld [vmem:[#allocation4_spill] sm:$0xff] }
 0x3f5   : > { %9619 = vmatprep.subr.mxu1 %v8140_v6 }
 0x3f7   : > { %9525 = vmatmul.mubr.msk.f32.gmra.mrb[2].mxu1 %vm292_vm0, %v11352_v13  ;;  %v11903_v13 = vld [vmem:[#allocation2 + $0x189] sm:$0xff] }
 0x3f8   : > { %9527 = vmatprep.mubr.msk.f32.mxu1 %vm292_vm0, %v11358_v19  ;;  %v12545_v19 = vld [vmem:[#allocation18_spill] sm:$0xff] }
 0x3fb   : > { %9528 = vmatmul.mubr.msk.f32.gmra.mrb[4].mxu1 %vm292_vm0, %v11364_v21  ;;  %v8173_v21 = vld [vmem:[%s12302_s3 + $0x38] sm:$0xff] }
 0x3fc   : > { %9530 = vmatprep.mubr.msk.f32.mxu1 %vm292_vm0, %v11370_v42  ;;  %v12546_v42 = vld [vmem:[#allocation28_spill] sm:$0xff] }
 0x3ff   : > { %9531 = vmatmul.mubr.msk.f32.gmra.mrb[6].mxu1 %vm292_vm0, %v11376_v44  ;;  %v12547_v44 = vld [vmem:[#allocation30_spill] sm:$0xff] }
 0x400   : > { %9533 = vmatprep.mubr.msk.f32.mxu1 %vm292_vm0, %v11382_v27  ;;  %v12548_v27 = vld [vmem:[#allocation31_spill] sm:$0xff] }
 0x403   : > { %9534 = vmatmul.mubr.msk.f32.gmra.mrb[8].mxu1 %vm292_vm0, %v11388_v30  ;;  %v12549_v30 = vld [vmem:[#allocation33_spill] sm:$0xff] }
 0x404   : > { %9536 = vmatprep.mubr.msk.f32.mxu1 %vm292_vm0, %v11394_v53  ;;  %v12550_v53 = vld [vmem:[#allocation35_spill] sm:$0xff] }
 0x407   : > { %9537 = vmatmul.mubr.msk.f32.gmra.mrb[10].mxu1 %vm292_vm0, %v11400_v57  ;;  %v12551_v57 = vld [vmem:[#allocation3_spill] sm:$0xff] }
 0x408   : > { %9539 = vmatprep.mubr.msk.f32.mxu1 %vm292_vm0, %v11406_v63 }
 0x40b   : > { %9540 = vmatmul.mubr.msk.f32.gmra.mrb[12].mxu1 %vm292_vm0, %v11412_v1 }
 0x40c   : > { %9542 = vmatprep.mubr.msk.f32.mxu1 %vm292_vm0, %v11418_v38 }
 0x40f   : > { %9543 = vmatmul.mubr.msk.f32.gmra.mrb[14].mxu1 %vm292_vm0, %v11424_v37 }
 0x410   : > { %9545 = vmatprep.mubr.msk.f32.mxu1 %vm292_vm0, %v11430_v7 }
 0x413   : > { %9546 = vmatmul.mubr.msk.f32.gmra.mrb[16].mxu1 %vm292_vm0, %v11436_v9 }
 0x414   : > { %9548 = vmatprep.mubr.msk.f32.mxu1 %vm292_vm0, %v11442_v17 }
 0x417   : > { %9549 = vmatmul.mubr.msk.f32.gmra.mrb[18].mxu1 %vm292_vm0, %v11448_v20 }
 0x418   : > { %9551 = vmatprep.mubr.msk.f32.mxu1 %vm292_vm0, %v11454_v43 }
 0x41b   : > { %9552 = vmatmul.mubr.msk.f32.gmra.mrb[20].mxu1 %vm292_vm0, %v11460_v28 }
 0x41c   : > { %9554 = vmatprep.mubr.msk.f32.mxu1 %vm292_vm0, %v11466_v49 }
 0x41f   : > { %9555 = vmatmul.mubr.msk.f32.gmra.mrb[22].mxu1 %vm292_vm0, %v11472_v51 }
 0x420   : > { %9557 = vmatprep.mubr.msk.f32.mxu1 %vm292_vm0, %v11478_v61 }
 0x423   : > { %9558 = vmatmul.mubr.msk.f32.gmra.mrb[24].mxu1 %vm292_vm0, %v11484_v0 }
 0x424   : > { %9560 = vmatprep.mubr.msk.f32.mxu1 %vm292_vm0, %v11489_v36 }
 0x427   : > { %9561 = vmatmul.mubr.msk.f32.gmra.mrb[26].mxu1 %vm292_vm0, %v11494_v55 }
 0x428   : > { %9563 = vmatprep.mubr.msk.f32.mxu1 %vm292_vm0, %v12543_v39 }
 0x42b   : > { %9564 = vmatmul.mubr.msk.f32.gmra.mrb[28].mxu1 %vm292_vm0, %v12544_v40 }
 0x42c   : > { %9566 = vmatprep.mubr.msk.f32.mxu1 %vm292_vm0, %v11899_v11 }
 0x42f   : > { %9567 = vmatmul.mubr.msk.f32.gmra.mrb[30].mxu1 %vm292_vm0, %v11903_v13 }
 0x430   : > { %9571 = vmatprep.mubr.msk.f32.mxu1 %vm292_vm0, %v12545_v19  ;;  %v12554_v19 = vld [vmem:[#allocation6_spill] sm:$0xff] }
 0x433   : > { %9572 = vmatmul.mubr.msk.f32.vlgmr.msra.gmra.mrb[0].mxu1 %vm292_vm0, %v12546_v42  ;;  %v12555_v42 = vld [vmem:[#allocation7_spill] sm:$0xff] }
 0x434   : > { %9620 = vmatpush3.msra.mxu1 %v8140_v6  ;;  %9574 = vmatprep.mubr.msk.f32.mxu1 %vm292_vm0, %v12547_v44  ;;  %v12553_v6 = vld [vmem:[#allocation5_spill] sm:$0xff] }
 0x435   : > { %9669 = vmatprep.subr.mxu1 %v8173_v21 }
 0x437   : > { %9575 = vmatmul.mubr.msk.f32.gmra.mrb[2].mxu1 %vm292_vm0, %v12548_v27  ;;  %v12556_v27 = vld [vmem:[#allocation8_spill] sm:$0xff] }
 0x438   : > { %9577 = vmatprep.mubr.msk.f32.mxu1 %vm292_vm0, %v12549_v30  ;;  %v12557_v30 = vld [vmem:[#allocation9_spill] sm:$0xff] }
 0x43b   : > { %9578 = vmatmul.mubr.msk.f32.gmra.mrb[4].mxu1 %vm292_vm0, %v12550_v53  ;;  %v12558_v53 = vld [vmem:[#allocation10_spill] sm:$0xff] }
 0x43c   : > { %9580 = vmatprep.mubr.msk.f32.mxu1 %vm292_vm0, %v12551_v57  ;;  %v12559_v57 = vld [vmem:[#allocation37_spill] sm:$0xff] }
 0x43f   : > { %9581 = vmatmul.mubr.msk.f32.gmra.mrb[6].mxu1 %vm292_vm0, %v12552_v5  ;;  %v12560_v5 = vld [vmem:[#allocation38_spill] sm:$0xff] }
 0x440   : > { %9583 = vmatprep.mubr.msk.f32.mxu1 %vm292_vm0, %v12553_v6  ;;  %v12561_v6 = vld [vmem:[#allocation13_spill] sm:$0xff] }
 0x443   : > { %9584 = vmatmul.mubr.msk.f32.gmra.mrb[8].mxu1 %vm292_vm0, %v12554_v19  ;;  %v12562_v19 = vld [vmem:[#allocation14_spill] sm:$0xff] }
 0x444   : > { %9586 = vmatprep.mubr.msk.f32.mxu1 %vm292_vm0, %v12555_v42  ;;  %v12563_v42 = vld [vmem:[#allocation15_spill] sm:$0xff] }
 0x447   : > { %9587 = vmatmul.mubr.msk.f32.gmra.mrb[10].mxu1 %vm292_vm0, %v12556_v27  ;;  %v12564_v27 = vld [vmem:[#allocation16_spill] sm:$0xff] }
 0x448   : > { %9589 = vmatprep.mubr.msk.f32.mxu1 %vm292_vm0, %v12557_v30  ;;  %v12565_v30 = vld [vmem:[#allocation17_spill] sm:$0xff] }
 0x44b   : > { %9590 = vmatmul.mubr.msk.f32.gmra.mrb[12].mxu1 %vm292_vm0, %v12558_v53  ;;  %v12566_v53 = vld [vmem:[#allocation19_spill] sm:$0xff] }
 0x44c   : > { %9592 = vmatprep.mubr.msk.f32.mxu1 %vm292_vm0, %v12559_v57  ;;  %v12567_v57 = vld [vmem:[#allocation20_spill] sm:$0xff] }
 0x44f   : > { %9593 = vmatmul.mubr.msk.f32.gmra.mrb[14].mxu1 %vm292_vm0, %v12560_v5  ;;  %v12568_v5 = vld [vmem:[#allocation21_spill] sm:$0xff] }
 0x450   : > { %9595 = vmatprep.mubr.msk.f32.mxu1 %vm292_vm0, %v12561_v6  ;;  %v12569_v6 = vld [vmem:[#allocation22_spill] sm:$0xff] }
 0x453   : > { %9596 = vmatmul.mubr.msk.f32.gmra.mrb[16].mxu1 %vm292_vm0, %v12562_v19 }
 0x454   : > { %9598 = vmatprep.mubr.msk.f32.mxu1 %vm292_vm0, %v12563_v42  ;;  %v12570_v42 = vld [vmem:[#allocation23_spill] sm:$0xff] }
 0x457   : > { %9599 = vmatmul.mubr.msk.f32.gmra.mrb[18].mxu1 %vm292_vm0, %v12564_v27 }
 0x458   : > { %9601 = vmatprep.mubr.msk.f32.mxu1 %vm292_vm0, %v12565_v30 }
 0x45b   : > { %9602 = vmatmul.mubr.msk.f32.gmra.mrb[20].mxu1 %vm292_vm0, %v12566_v53 }
 0x45c   : > { %9604 = vmatprep.mubr.msk.f32.mxu1 %vm292_vm0, %v12567_v57  ;;  %v11970_v57 = vld [vmem:[#allocation2 + $0x182] sm:$0xff] }
 0x45f   : > { %9605 = vmatmul.mubr.msk.f32.gmra.mrb[22].mxu1 %vm292_vm0, %v12568_v5 }
 0x460   : > { %9607 = vmatprep.mubr.msk.f32.mxu1 %vm292_vm0, %v12569_v6  ;;  %v11974_v6 = vld [vmem:[#allocation2 + $0x18a] sm:$0xff] }
 0x463   : > { %9608 = vmatmul.mubr.msk.f32.gmra.mrb[24].mxu1 %vm292_vm0, %v11744_v34 }
 0x464   : > { %9610 = vmatprep.mubr.msk.f32.mxu1 %vm292_vm0, %v12570_v42 }
 0x467   : > { %9611 = vmatmul.mubr.msk.f32.gmra.mrb[26].mxu1 %vm292_vm0, %v11752_v2 }
 0x468   : > { %9613 = vmatprep.mubr.msk.f32.mxu1 %vm292_vm0, %v11756_v35  ;;  %v8206_v35 = vld [vmem:[%s12302_s3 + $0x40] sm:$0xff] }
 0x46b   : > { %9614 = vmatmul.mubr.msk.f32.gmra.mrb[28].mxu1 %vm292_vm0, %v11760_v33 }
 0x46c   : > { %9616 = vmatprep.mubr.msk.f32.mxu1 %vm292_vm0, %v11970_v57 }
 0x46f   : > { %9617 = vmatmul.mubr.msk.f32.gmra.mrb[30].mxu1 %vm292_vm0, %v11974_v6 }
 0x470   : > { %9621 = vmatprep.mubr.msk.f32.mxu1 %vm292_vm0, %v11523_v41  ;;  %v6093_v41 = vld [vmem:[#allocation2 + $0x198] sm:$0xff] }
 0x473   : > { %9622 = vmatmul.mubr.msk.f32.vlgmr.msra.gmra.mrb[0].mxu1 %vm292_vm0, %v11527_v8  ;;  %v6094_v8 = vld [vmem:[#allocation2 + $0x1a0] sm:$0xff] }
 0x474   : > { %9670 = vmatpush3.msra.mxu1 %v8173_v21  ;;  %9624 = vmatprep.mubr.msk.f32.mxu1 %vm292_vm0, %v11531_v54  ;;  %v6450_v54 = vld [vmem:[#allocation2 + $0x31] sm:$0xff] }
 0x475   : > { %9719 = vmatprep.subr.mxu1 %v8206_v35  ;;  %v8244_v21 = vld [vmem:[%s10350_s27 + $0x51] sm:$0xff] }
 0x477   : > { %9625 = vmatmul.mubr.msk.f32.gmra.mrb[2].mxu1 %vm292_vm0, %v11535_v10  ;;  %v6451_v10 = vld [vmem:[#allocation2 + $0x39] sm:$0xff] }
 0x478   : > { %9627 = vmatprep.mubr.msk.f32.mxu1 %vm292_vm0, %v11539_v12  ;;  %v6452_v12 = vld [vmem:[#allocation2 + $0x49] sm:$0xff] }
 0x47b   : > { %9628 = vmatmul.mubr.msk.f32.gmra.mrb[4].mxu1 %vm292_vm0, %v11543_v14  ;;  %v6453_v14 = vld [vmem:[#allocation2 + $0x51] sm:$0xff] }
 0x47c   : > { %9630 = vmatprep.mubr.msk.f32.mxu1 %vm292_vm0, %v11547_v15  ;;  %v6454_v15 = vld [vmem:[#allocation2 + $0x61] sm:$0xff] }
 0x47f   : > { %9631 = vmatmul.mubr.msk.f32.gmra.mrb[6].mxu1 %vm292_vm0, %v11551_v16  ;;  %v6455_v16 = vld [vmem:[#allocation2 + $0x69] sm:$0xff] }
 0x480   : > { %9633 = vmatprep.mubr.msk.f32.mxu1 %vm292_vm0, %v11555_v18  ;;  %v6456_v18 = vld [vmem:[#allocation2 + $0x79] sm:$0xff] }
 0x483   : > { %9634 = vmatmul.mubr.msk.f32.gmra.mrb[8].mxu1 %vm292_vm0, %v11559_v22  ;;  %v6457_v22 = vld [vmem:[#allocation2 + $0x81] sm:$0xff] }
 0x484   : > { %9636 = vmatprep.mubr.msk.f32.mxu1 %vm292_vm0, %v11563_v23  ;;  %v6458_v23 = vld [vmem:[#allocation2 + $0x91] sm:$0xff] }
 0x487   : > { %9637 = vmatmul.mubr.msk.f32.gmra.mrb[10].mxu1 %vm292_vm0, %v11567_v24  ;;  %v6459_v24 = vld [vmem:[#allocation2 + $0x99] sm:$0xff] }
 0x488   : > { %9639 = vmatprep.mubr.msk.f32.mxu1 %vm292_vm0, %v11571_v25  ;;  %v12585_v25 = vld [vmem:[#allocation15_spill] sm:$0xff] }
 0x48b   : > { %9640 = vmatmul.mubr.msk.f32.gmra.mrb[12].mxu1 %vm292_vm0, %v11575_v26  ;;  %v12586_v26 = vld [vmem:[#allocation20_spill] sm:$0xff] }
 0x48c   : > { %9642 = vmatprep.mubr.msk.f32.mxu1 %vm292_vm0, %v11579_v45  ;;  %v12587_v45 = vld [vmem:[#allocation22_spill] sm:$0xff] }
 0x48f   : > { %9643 = vmatmul.mubr.msk.f32.gmra.mrb[14].mxu1 %vm292_vm0, %v11583_v46  ;;  %v12588_v46 = vld [vmem:[#allocation24_spill] sm:$0xff] }
 0x490   : > { %9645 = vmatprep.mubr.msk.f32.mxu1 %vm292_vm0, %v11587_v47  ;;  %v6867_v47 = vld [vmem:[#allocation2 + $0x19a] sm:$0xff] }
 0x493   : > { %9646 = vmatmul.mubr.msk.f32.gmra.mrb[16].mxu1 %vm292_vm0, %v11591_v48  ;;  %v12160_v48 = vld [vmem:[%s12303_s4] ss:$0 sm:$0xff] }
 0x494   : > { %9648 = vmatprep.mubr.msk.f32.mxu1 %vm292_vm0, %v11595_v29 }
 0x497   : > { %9649 = vmatmul.mubr.msk.f32.gmra.mrb[18].mxu1 %vm292_vm0, %v11599_v32  ;;  %v8240_v32 = vld [vmem:[%s10350_s27 + $0x21] sm:$0xff] }
 0x498   : > { %9651 = vmatprep.mubr.msk.f32.mxu1 %vm292_vm0, %v11603_v50 }
 0x49b   : > { %9652 = vmatmul.mubr.msk.f32.gmra.mrb[20].mxu1 %vm292_vm0, %v11607_v52 }
 0x49c   : > { %9654 = vmatprep.mubr.msk.f32.mxu1 %vm292_vm0, %v11611_v56  ;;  %v8239_v56 = vld [vmem:[%s10350_s27 + $0x19] sm:$0xff] }
 0x49f   : > { %9655 = vmatmul.mubr.msk.f32.gmra.mrb[22].mxu1 %vm292_vm0, %v11615_v58 }
 0x4a0   : > { %9657 = vmatprep.mubr.msk.f32.mxu1 %vm292_vm0, %v11619_v59 }
 0x4a3   : > { %9658 = vmatmul.mubr.msk.f32.gmra.mrb[24].mxu1 %vm292_vm0, %v11623_v60 }
 0x4a4   : > { %9660 = vmatprep.mubr.msk.f32.mxu1 %vm292_vm0, %v11627_v62 }
 0x4a7   : > { %9661 = vmatmul.mubr.msk.f32.gmra.mrb[26].mxu1 %vm292_vm0, %v11631_v3  ;;  %v8242_v3 = vld [vmem:[%s10350_s27 + $0x39] sm:$0xff] }
 0x4a8   : > { %9663 = vmatprep.mubr.msk.f32.mxu1 %vm292_vm0, %v11828_v31  ;;  %v8241_v31 = vld [vmem:[%s10350_s27 + $0x31] sm:$0xff] }
 0x4ab   : > { %9664 = vmatmul.mubr.msk.f32.gmra.mrb[28].mxu1 %vm292_vm0, %v11832_v4 }
 0x4ac   : > { %9666 = vmatprep.mubr.msk.f32.mxu1 %vm292_vm0, %v6093_v41  ;;  %v8246_v41 = vld [vmem:[%s10350_s27 + $0x69] sm:$0xff] }
 0x4af   : > { %9667 = vmatmul.mubr.msk.f32.gmra.mrb[30].mxu1 %vm292_vm0, %v6094_v8 }
 0x4b0   : > { %9671 = vmatprep.mubr.msk.f32.mxu1 %vm292_vm0, %v6450_v54 }
 0x4b3   : > { %9672 = vmatmul.mubr.msk.f32.vlgmr.msra.gmra.mrb[0].mxu1 %vm292_vm0, %v6451_v10 }
 0x4b4   : > { %9720 = vmatpush3.msra.mxu1 %v8206_v35  ;;  %9674 = vmatprep.mubr.msk.f32.mxu1 %vm292_vm0, %v6452_v12  ;;  %v8245_v12 = vld [vmem:[%s10350_s27 + $0x61] sm:$0xff] }
 0x4b7   : > { %9675 = vmatmul.mubr.msk.f32.gmra.mrb[2].mxu1 %vm292_vm0, %v6453_v14 }
 0x4b8   : > { %9677 = vmatprep.mubr.msk.f32.mxu1 %vm292_vm0, %v6454_v15 }
 0x4bb   : > { %9678 = vmatmul.mubr.msk.f32.gmra.mrb[4].mxu1 %vm292_vm0, %v6455_v16 }
 0x4bc   : > { %9680 = vmatprep.mubr.msk.f32.mxu1 %vm292_vm0, %v6456_v18 }
 0x4bf   : > { %9681 = vmatmul.mubr.msk.f32.gmra.mrb[6].mxu1 %vm292_vm0, %v6457_v22 }
 0x4c0   : > { %9683 = vmatprep.mubr.msk.f32.mxu1 %vm292_vm0, %v6458_v23  ;;  %v8248_v23 = vld [vmem:[%s10350_s27 + $0x81] sm:$0xff] }
 0x4c3   : > { %9684 = vmatmul.mubr.msk.f32.gmra.mrb[8].mxu1 %vm292_vm0, %v6459_v24 }
 0x4c4   : > { %9686 = vmatprep.mubr.msk.f32.mxu1 %vm292_vm0, %v11406_v63  ;;  %v6480_v63 = vld [vmem:[#allocation2 + $0x199] sm:$0xff] }
 0x4c7   : > { %9687 = vmatmul.mubr.msk.f32.gmra.mrb[10].mxu1 %vm292_vm0, %v11412_v1  ;;  %v6481_v1 = vld [vmem:[#allocation2 + $0x1a1] sm:$0xff] }
 0x4c8   : > { %9689 = vmatprep.mubr.msk.f32.mxu1 %vm292_vm0, %v11418_v38  ;;  %v12571_v38 = vld [vmem:[#allocation31_spill] sm:$0xff] }
 0x4cb   : > { %9690 = vmatmul.mubr.msk.f32.gmra.mrb[12].mxu1 %vm292_vm0, %v11424_v37  ;;  %v12572_v37 = vld [vmem:[#allocation33_spill] sm:$0xff] }
 0x4cc   : > { %9692 = vmatprep.mubr.msk.f32.mxu1 %vm292_vm0, %v11430_v7  ;;  %v12573_v7 = vld [vmem:[#allocation35_spill] sm:$0xff] }
 0x4cf   : > { %9693 = vmatmul.mubr.msk.f32.gmra.mrb[14].mxu1 %vm292_vm0, %v11436_v9  ;;  %v12574_v9 = vld [vmem:[#allocation3_spill] sm:$0xff] }
 0x4d0   : > { %9695 = vmatprep.mubr.msk.f32.mxu1 %vm292_vm0, %v11442_v17  ;;  %v12575_v17 = vld [vmem:[#allocation4_spill] sm:$0xff] }
 0x4d3   : > { %9696 = vmatmul.mubr.msk.f32.gmra.mrb[16].mxu1 %vm292_vm0, %v11448_v20  ;;  %v12576_v20 = vld [vmem:[#allocation5_spill] sm:$0xff] }
 0x4d4   : > { %9698 = vmatprep.mubr.msk.f32.mxu1 %vm292_vm0, %v11454_v43  ;;  %v12577_v43 = vld [vmem:[#allocation6_spill] sm:$0xff] }
 0x4d7   : > { %9699 = vmatmul.mubr.msk.f32.gmra.mrb[18].mxu1 %vm292_vm0, %v11460_v28  ;;  %v12578_v28 = vld [vmem:[#allocation7_spill] sm:$0xff] }
 0x4d8   : > { %9701 = vmatprep.mubr.msk.f32.mxu1 %vm292_vm0, %v11466_v49  ;;  %v12579_v49 = vld [vmem:[#allocation8_spill] sm:$0xff] }
 0x4db   : > { %9702 = vmatmul.mubr.msk.f32.gmra.mrb[20].mxu1 %vm292_vm0, %v11472_v51  ;;  %v12580_v51 = vld [vmem:[#allocation9_spill] sm:$0xff] }
 0x4dc   : > { %9704 = vmatprep.mubr.msk.f32.mxu1 %vm292_vm0, %v11478_v61  ;;  %v12581_v61 = vld [vmem:[#allocation10_spill] sm:$0xff] }
 0x4df   : > { %9705 = vmatmul.mubr.msk.f32.gmra.mrb[22].mxu1 %vm292_vm0, %v11484_v0  ;;  %v12582_v0 = vld [vmem:[#allocation37_spill] sm:$0xff] }
 0x4e0   : > { %9707 = vmatprep.mubr.msk.f32.mxu1 %vm292_vm0, %v11489_v36  ;;  %v12583_v36 = vld [vmem:[#allocation38_spill] sm:$0xff] }
 0x4e3   : > { %9708 = vmatmul.mubr.msk.f32.gmra.mrb[24].mxu1 %vm292_vm0, %v11494_v55  ;;  %v12584_v55 = vld [vmem:[#allocation13_spill] sm:$0xff] }
 0x4e4   : > { %9710 = vmatprep.mubr.msk.f32.mxu1 %vm292_vm0, %v12543_v39 }
 0x4e7   : > { %9711 = vmatmul.mubr.msk.f32.gmra.mrb[26].mxu1 %vm292_vm0, %v12544_v40 }
 0x4e8   : > { %9713 = vmatprep.mubr.msk.f32.mxu1 %vm292_vm0, %v11899_v11 }
 0x4eb   : > { %9714 = vmatmul.mubr.msk.f32.gmra.mrb[28].mxu1 %vm292_vm0, %v11903_v13 }
 0x4ec   : > { %9716 = vmatprep.mubr.msk.f32.mxu1 %vm292_vm0, %v6480_v63 }
 0x4ef   : > { %9717 = vmatmul.mubr.msk.f32.gmra.mrb[30].mxu1 %vm292_vm0, %v6481_v1 }
 0x4f0   : > { %9721 = vmatprep.mubr.msk.f32.mxu1 %vm292_vm0, %v12547_v44 }
 0x4f3   : > { %9722 = vmatmul.mubr.msk.f32.vlgmr.msra.gmra.mrb[0].mxu1 %vm292_vm0, %v12571_v38  ;;  %v8247_v38 = vld [vmem:[%s10350_s27 + $0x79] sm:$0xff] }
 0x4f4   : > { %9724 = vmatprep.mubr.msk.f32.mxu1 %vm292_vm0, %v12572_v37 }
 0x4f7   : > { %9725 = vmatmul.mubr.msk.f32.gmra.mrb[2].mxu1 %vm292_vm0, %v12573_v7 }
 0x4f8   : > { %9727 = vmatprep.mubr.msk.f32.mxu1 %vm292_vm0, %v12574_v9 }
 0x4fb   : > { %9728 = vmatmul.mubr.msk.f32.gmra.mrb[4].mxu1 %vm292_vm0, %v12575_v17 }
 0x4fc   : > { %9730 = vmatprep.mubr.msk.f32.mxu1 %vm292_vm0, %v12576_v20 }
 0x4ff   : > { %9731 = vmatmul.mubr.msk.f32.gmra.mrb[6].mxu1 %vm292_vm0, %v12577_v43  ;;  %v8250_v43 = vld [vmem:[%s10350_s27 + $0x99] sm:$0xff] }
 0x500   : > { %9733 = vmatprep.mubr.msk.f32.mxu1 %vm292_vm0, %v12578_v28 }
 0x503   : > { %9734 = vmatmul.mubr.msk.f32.gmra.mrb[8].mxu1 %vm292_vm0, %v12579_v49 }
 0x504   : > { %9736 = vmatprep.mubr.msk.f32.mxu1 %vm292_vm0, %v12580_v51 }
 0x507   : > { %9737 = vmatmul.mubr.msk.f32.gmra.mrb[10].mxu1 %vm292_vm0, %v12581_v61  ;;  %v8249_v61 = vld [vmem:[%s10350_s27 + $0x91] sm:$0xff] }
 0x508   : > { %9739 = vmatprep.mubr.msk.f32.mxu1 %vm292_vm0, %v12582_v0 }
 0x50b   : > { %9740 = vmatmul.mubr.msk.f32.gmra.mrb[12].mxu1 %vm292_vm0, %v12583_v36 }
 0x50c   : > { %9742 = vmatprep.mubr.msk.f32.mxu1 %vm292_vm0, %v12584_v55 }
 0x50f   : > { %9743 = vmatmul.mubr.msk.f32.gmra.mrb[14].mxu1 %vm292_vm0, %v12562_v19 }
 0x510   : > { %9745 = vmatprep.mubr.msk.f32.mxu1 %vm292_vm0, %v12585_v25 }
 0x513   : > { %9746 = vmatmul.mubr.msk.f32.gmra.mrb[16].mxu1 %vm292_vm0, %v12564_v27 }
 0x514   : > { %9748 = vmatprep.mubr.msk.f32.mxu1 %vm292_vm0, %v12565_v30 }
 0x517   : > { %9749 = vmatmul.mubr.msk.f32.gmra.mrb[18].mxu1 %vm292_vm0, %v12566_v53  ;;  %v8243_v53 = vld [vmem:[%s10350_s27 + $0x49] sm:$0xff] }
 0x518   : > { %9751 = vmatprep.mubr.msk.f32.mxu1 %vm292_vm0, %v12586_v26 }
 0x51b   : > { %9752 = vmatmul.mubr.msk.f32.gmra.mrb[20].mxu1 %vm292_vm0, %v12568_v5 }
 0x51c   : > { %9754 = vmatprep.mubr.msk.f32.mxu1 %vm292_vm0, %v12587_v45  ;;  %v8252_v45 = vld [vmem:[%s10350_s27 + $0xb1] sm:$0xff] }
 0x51f   : > { %9755 = vmatmul.mubr.msk.f32.gmra.mrb[22].mxu1 %vm292_vm0, %v11744_v34  ;;  %v6868_v34 = vld [vmem:[#allocation2 + $0x1a2] sm:$0xff] }
 0x520   : > { %9757 = vmatprep.mubr.msk.f32.mxu1 %vm292_vm0, %v12570_v42 }
 0x523   : > { %9758 = vmatmul.mubr.msk.f32.gmra.mrb[24].mxu1 %vm292_vm0, %v11752_v2 }
 0x524   : > { %9760 = vmatprep.mubr.msk.f32.mxu1 %vm292_vm0, %v12588_v46 }
 0x527   : > { %9761 = vmatmul.mubr.msk.f32.gmra.mrb[26].mxu1 %vm292_vm0, %v11760_v33 }
 0x528   : > { %9763 = vmatprep.mubr.msk.f32.mxu1 %vm292_vm0, %v11970_v57 }
 0x52b   : > { %9764 = vmatmul.mubr.msk.f32.gmra.mrb[28].mxu1 %vm292_vm0, %v11974_v6 }
 0x52c   : > { %9766 = vmatprep.mubr.msk.f32.mxu1 %vm292_vm0, %v6867_v47 }
 0x52f   : > { %9767 = vmatmul.mubr.msk.f32.gmra.mrb[30].mxu1 %vm292_vm0, %v6868_v34 }
 0x5c6   : > { %v9723_v29 = vpop.f32.mrb[0].mxu1 }
 0x5c7   : > { %v7264_v50 = vadd.f32 %v9723_v29, %v12160_v48  ;;  %v7033_v52 = vpop.f32.mrb[1].mxu1  ;;  %v8251_v29 = vld [vmem:[%s10350_s27 + $0xa9] sm:$0xff] }
 0x5c8   : > { %v7263_v58 = vadd.f32 %v12160_v48, %v7033_v52 }
 0x5c9   : > { %v7296_v59 = vadd.f32 %v8240_v32, %v7264_v50 }
 0x5ca   : > { %v7295_v60 = vadd.f32 %v8239_v56, %v7263_v58  ;;  %v9726_v62 = vpop.f32.mrb[2].mxu1 }
 0x5cb   : > { %v7328_v2 = vmax.f32 %v7296_v59, 0.0  ;;  %v7266_v35 = vadd.f32 %v9726_v62, %v12160_v48  ;;  %v7043_v33 = vpop.f32.mrb[3].mxu1  ;;  %v8254_v59 = vld [vmem:[%s10350_s27 + $0xc9] sm:$0xff] }
 0x5cc   : > { %v7327_v4 = vmax.f32 %v7295_v60, 0.0  ;;  %v7265_v39 = vadd.f32 %v12160_v48, %v7043_v33 }
 0x5cd   : > { %7360 = vst.msk [vmem:[%s12170_s22 + $0x8] sm:$0xff] %vm292_vm0, %v7328_v2  ;;  %v7298_v40 = vadd.f32 %v8242_v3, %v7266_v35  ;;  %v8253_v2 = vld [vmem:[%s10350_s27 + $0xc1] sm:$0xff] }
 0x5ce   : > { %7359 = vst.msk [vmem:[%s12170_s22] sm:$0xff] %vm292_vm0, %v7327_v4  ;;  %v7297_v11 = vadd.f32 %v8241_v31, %v7265_v39  ;;  %v9729_v13 = vpop.f32.mrb[4].mxu1 }
 0x5cf   : > { %v7330_v44 = vmax.f32 %v7298_v40, 0.0  ;;  %v7268_v27 = vadd.f32 %v9729_v13, %v12160_v48  ;;  %v7053_v30 = vpop.f32.mrb[5].mxu1  ;;  %v8256_v40 = vld [vmem:[%s10350_s27 + $0xe1] sm:$0xff] }
 0x5d0   : > { %v7329_v57 = vmax.f32 %v7297_v11, 0.0  ;;  %v7267_v5 = vadd.f32 %v12160_v48, %v7053_v30 }
 0x5d1   : > { %7362 = vst.msk [vmem:[%s12170_s22 + $0x18] sm:$0xff] %vm292_vm0, %v7330_v44  ;;  %v7300_v6 = vadd.f32 %v8244_v21, %v7268_v27  ;;  %v8255_v44 = vld [vmem:[%s10350_s27 + $0xd9] sm:$0xff] }
 0x5d2   : > { %7361 = vst.msk [vmem:[%s12170_s22 + $0x10] sm:$0xff] %vm292_vm0, %v7329_v57  ;;  %v7299_v19 = vadd.f32 %v8243_v53, %v7267_v5  ;;  %v9732_v42 = vpop.f32.mrb[6].mxu1 }
 0x5d3   : > { %v7332_v8 = vmax.f32 %v7300_v6, 0.0  ;;  %v7270_v54 = vadd.f32 %v9732_v42, %v12160_v48  ;;  %v7063_v10 = vpop.f32.mrb[7].mxu1  ;;  %v8258_v6 = vld [vmem:[%s10350_s27 + $0xf9] sm:$0xff] }
 0x5d4   : > { %v7331_v14 = vmax.f32 %v7299_v19, 0.0  ;;  %v7269_v15 = vadd.f32 %v12160_v48, %v7063_v10 }
 0x5d5   : > { %7364 = vst.msk [vmem:[%s12170_s22 + $0x28] sm:$0xff] %vm292_vm0, %v7332_v8  ;;  %v7302_v16 = vadd.f32 %v8246_v41, %v7270_v54  ;;  %v8257_v8 = vld [vmem:[%s10350_s27 + $0xf1] sm:$0xff] }
 0x5d6   : > { %7363 = vst.msk [vmem:[%s12170_s22 + $0x20] sm:$0xff] %vm292_vm0, %v7331_v14  ;;  %v7301_v18 = vadd.f32 %v8245_v12, %v7269_v15  ;;  %v9735_v22 = vpop.f32.mrb[8].mxu1 }
 0x5d7   : > { %v7334_v24 = vmax.f32 %v7302_v16, 0.0  ;;  %v7272_v63 = vadd.f32 %v9735_v22, %v12160_v48  ;;  %v7073_v1 = vpop.f32.mrb[9].mxu1  ;;  %v8260_v16 = vld [vmem:[%s10350_s27 + $0x111] sm:$0xff] }
 0x5d8   : > { %v7333_v37 = vmax.f32 %v7301_v18, 0.0  ;;  %v7271_v7 = vadd.f32 %v12160_v48, %v7073_v1 }
 0x5d9   : > { %7366 = vst.msk [vmem:[%s12170_s22 + $0x38] sm:$0xff] %vm292_vm0, %v7334_v24  ;;  %v7304_v9 = vadd.f32 %v8248_v23, %v7272_v63  ;;  %v8259_v24 = vld [vmem:[%s10350_s27 + $0x109] sm:$0xff] }
 0x5da   : > { %7365 = vst.msk [vmem:[%s12170_s22 + $0x30] sm:$0xff] %vm292_vm0, %v7333_v37  ;;  %v7303_v17 = vadd.f32 %v8247_v38, %v7271_v7  ;;  %v9738_v20 = vpop.f32.mrb[10].mxu1 }
 0x5db   : > { %v7336_v28 = vmax.f32 %v7304_v9, 0.0  ;;  %v7274_v49 = vadd.f32 %v9738_v20, %v12160_v48  ;;  %v7083_v51 = vpop.f32.mrb[11].mxu1  ;;  %v8262_v9 = vld [vmem:[%s10350_s27 + $0x129] sm:$0xff] }
 0x5dc   : > { %v7335_v0 = vmax.f32 %v7303_v17, 0.0  ;;  %v7273_v36 = vadd.f32 %v12160_v48, %v7083_v51 }
 0x5dd   : > { %7368 = vst.msk [vmem:[%s12170_s22 + $0x48] sm:$0xff] %vm292_vm0, %v7336_v28  ;;  %v7306_v55 = vadd.f32 %v8250_v43, %v7274_v49  ;;  %v8261_v28 = vld [vmem:[%s10350_s27 + $0x121] sm:$0xff] }
 0x5de   : > { %7367 = vst.msk [vmem:[%s12170_s22 + $0x40] sm:$0xff] %vm292_vm0, %v7335_v0  ;;  %v7305_v25 = vadd.f32 %v8249_v61, %v7273_v36  ;;  %v9741_v26 = vpop.f32.mrb[12].mxu1 }
 0x5df   : > { %v7338_v46 = vmax.f32 %v7306_v55, 0.0  ;;  %v7276_v47 = vadd.f32 %v9741_v26, %v12160_v48  ;;  %v7093_v34 = vpop.f32.mrb[13].mxu1  ;;  %v8264_v55 = vld [vmem:[%s10350_s27 + $0x141] sm:$0xff] }
 0x5e0   : > { %v7337_v32 = vmax.f32 %v7305_v25, 0.0  ;;  %v7275_v50 = vadd.f32 %v12160_v48, %v7093_v34 }
 0x5e1   : > { %7370 = vst.msk [vmem:[%s12170_s22 + $0x58] sm:$0xff] %vm292_vm0, %v7338_v46  ;;  %v7308_v52 = vadd.f32 %v8252_v45, %v7276_v47  ;;  %v8263_v46 = vld [vmem:[%s10350_s27 + $0x139] sm:$0xff] }
 0x5e2   : > { %7369 = vst.msk [vmem:[%s12170_s22 + $0x50] sm:$0xff] %vm292_vm0, %v7337_v32  ;;  %v7307_v56 = vadd.f32 %v8251_v29, %v7275_v50  ;;  %v9744_v58 = vpop.f32.mrb[14].mxu1 }
 0x5e3   : > { %v7340_v60 = vmax.f32 %v7308_v52, 0.0  ;;  %v7278_v62 = vadd.f32 %v9744_v58, %v12160_v48  ;;  %v7103_v3 = vpop.f32.mrb[15].mxu1  ;;  %v8266_v52 = vld [vmem:[%s10350_s27 + $0x159] sm:$0xff] }
 0x5e4   : > { %v7339_v35 = vmax.f32 %v7307_v56, 0.0  ;;  %v7277_v33 = vadd.f32 %v12160_v48, %v7103_v3 }
 0x5e5   : > { %7372 = vst.msk [vmem:[%s12170_s22 + $0x68] sm:$0xff] %vm292_vm0, %v7340_v60  ;;  %v7310_v31 = vadd.f32 %v8254_v59, %v7278_v62  ;;  %v8265_v60 = vld [vmem:[%s10350_s27 + $0x151] sm:$0xff] }
 0x5e6   : > { %7371 = vst.msk [vmem:[%s12170_s22 + $0x60] sm:$0xff] %vm292_vm0, %v7339_v35  ;;  %v7309_v4 = vadd.f32 %v8253_v2, %v7277_v33  ;;  %v9747_v39 = vpop.f32.mrb[16].mxu1 }
 0x5e7   : > { %v7342_v11 = vmax.f32 %v7310_v31, 0.0  ;;  %v7280_v13 = vadd.f32 %v9747_v39, %v12160_v48  ;;  %v7113_v21 = vpop.f32.mrb[17].mxu1  ;;  %v8268_v31 = vld [vmem:[%s10350_s27 + $0x171] sm:$0xff] }
 0x5e8   : > { %v7341_v27 = vmax.f32 %v7309_v4, 0.0  ;;  %v7279_v30 = vadd.f32 %v12160_v48, %v7113_v21 }
 0x5e9   : > { %7374 = vst.msk [vmem:[%s12170_s22 + $0x78] sm:$0xff] %vm292_vm0, %v7342_v11  ;;  %v7312_v53 = vadd.f32 %v8256_v40, %v7280_v13  ;;  %v8267_v11 = vld [vmem:[%s10350_s27 + $0x169] sm:$0xff] }
 0x5ea   : > { %7373 = vst.msk [vmem:[%s12170_s22 + $0x70] sm:$0xff] %vm292_vm0, %v7341_v27  ;;  %v7311_v57 = vadd.f32 %v8255_v44, %v7279_v30  ;;  %v9750_v5 = vpop.f32.mrb[18].mxu1 }
 0x5eb   : > { %v7344_v19 = vmax.f32 %v7312_v53, 0.0  ;;  %v7282_v42 = vadd.f32 %v9750_v5, %v12160_v48  ;;  %v7123_v41 = vpop.f32.mrb[19].mxu1  ;;  %v8270_v53 = vld [vmem:[%s10350_s27 + $0x189] sm:$0xff] }
 0x5ec   : > { %v7343_v54 = vmax.f32 %v7311_v57, 0.0  ;;  %v7281_v10 = vadd.f32 %v12160_v48, %v7123_v41 }
 0x5ed   : > { %7376 = vst.msk [vmem:[%s12170_s22 + $0x88] sm:$0xff] %vm292_vm0, %v7344_v19  ;;  %v7314_v12 = vadd.f32 %v8258_v6, %v7282_v42  ;;  %v8269_v19 = vld [vmem:[%s10350_s27 + $0x181] sm:$0xff] }
 0x5ee   : > { %7375 = vst.msk [vmem:[%s12170_s22 + $0x80] sm:$0xff] %vm292_vm0, %v7343_v54  ;;  %v7313_v14 = vadd.f32 %v8257_v8, %v7281_v10  ;;  %v9753_v15 = vpop.f32.mrb[20].mxu1 }
 0x5ef   : > { %v7346_v18 = vmax.f32 %v7314_v12, 0.0  ;;  %v7284_v22 = vadd.f32 %v9753_v15, %v12160_v48  ;;  %v7133_v23 = vpop.f32.mrb[21].mxu1 }
 0x5f0   : > { %v7345_v63 = vmax.f32 %v7313_v14, 0.0  ;;  %v7283_v1 = vadd.f32 %v12160_v48, %v7133_v23 }
 0x5f1   : > { %7378 = vst.msk [vmem:[%s12170_s22 + $0x98] sm:$0xff] %vm292_vm0, %v7346_v18  ;;  %v7316_v38 = vadd.f32 %v8260_v16, %v7284_v22 }
 0x5f2   : > { %7377 = vst.msk [vmem:[%s12170_s22 + $0x90] sm:$0xff] %vm292_vm0, %v7345_v63  ;;  %v7315_v37 = vadd.f32 %v8259_v24, %v7283_v1  ;;  %v9756_v7 = vpop.f32.mrb[22].mxu1 }
 0x5f3   : > { %v7348_v17 = vmax.f32 %v7316_v38, 0.0  ;;  %v7286_v20 = vadd.f32 %v9756_v7, %v12160_v48  ;;  %v7143_v43 = vpop.f32.mrb[23].mxu1 }
 0x5f4   : > { %v7347_v49 = vmax.f32 %v7315_v37, 0.0  ;;  %v7285_v51 = vadd.f32 %v12160_v48, %v7143_v43 }
 0x5f5   : > { %7380 = vst.msk [vmem:[%s12170_s22 + $0xa8] sm:$0xff] %vm292_vm0, %v7348_v17  ;;  %v7318_v61 = vadd.f32 %v8262_v9, %v7286_v20 }
 0x5f6   : > { %7379 = vst.msk [vmem:[%s12170_s22 + $0xa0] sm:$0xff] %vm292_vm0, %v7347_v49  ;;  %v7317_v0 = vadd.f32 %v8261_v28, %v7285_v51  ;;  %v9759_v36 = vpop.f32.mrb[24].mxu1 }
 0x5f7   : > { %v7350_v25 = vmax.f32 %v7318_v61, 0.0  ;;  %v7288_v26 = vadd.f32 %v9759_v36, %v12160_v48  ;;  %v7153_v45 = vpop.f32.mrb[25].mxu1 }
 0x5f8   : > { %v7349_v47 = vmax.f32 %v7317_v0, 0.0  ;;  %v7287_v34 = vadd.f32 %v12160_v48, %v7153_v45 }
 0x5f9   : > { %7382 = vst.msk [vmem:[%s12170_s22 + $0xb8] sm:$0xff] %vm292_vm0, %v7350_v25  ;;  %v7320_v29 = vadd.f32 %v8264_v55, %v7288_v26 }
 0x5fa   : > { %7381 = vst.msk [vmem:[%s12170_s22 + $0xb0] sm:$0xff] %vm292_vm0, %v7349_v47  ;;  %v7319_v32 = vadd.f32 %v8263_v46, %v7287_v34  ;;  %v9762_v50 = vpop.f32.mrb[26].mxu1 }
 0x5fb   : > { %v7352_v56 = vmax.f32 %v7320_v29, 0.0  ;;  %v7290_v58 = vadd.f32 %v9762_v50, %v12160_v48  ;;  %v7163_v59 = vpop.f32.mrb[27].mxu1 }
 0x5fc   : > { %v7351_v62 = vmax.f32 %v7319_v32, 0.0  ;;  %v7289_v3 = vadd.f32 %v12160_v48, %v7163_v59 }
 0x5fd   : > { %7384 = vst.msk [vmem:[%s12170_s22 + $0xc8] sm:$0xff] %vm292_vm0, %v7352_v56  ;;  %v7322_v2 = vadd.f32 %v8266_v52, %v7290_v58 }
 0x5fe   : > { %7383 = vst.msk [vmem:[%s12170_s22 + $0xc0] sm:$0xff] %vm292_vm0, %v7351_v62  ;;  %v7321_v35 = vadd.f32 %v8265_v60, %v7289_v3  ;;  %v9765_v33 = vpop.f32.mrb[28].mxu1 }
 0x5ff   : > { %v7354_v4 = vmax.f32 %v7322_v2, 0.0  ;;  %v7292_v39 = vadd.f32 %v9765_v33, %v12160_v48  ;;  %v7173_v40 = vpop.f32.mrb[29].mxu1 }
 0x600   : > { %v7353_v13 = vmax.f32 %v7321_v35, 0.0  ;;  %v7291_v21 = vadd.f32 %v12160_v48, %v7173_v40 }
 0x601   : > { %7386 = vst.msk [vmem:[%s12170_s22 + $0xd8] sm:$0xff] %vm292_vm0, %v7354_v4  ;;  %v7324_v44 = vadd.f32 %v8268_v31, %v7292_v39 }
 0x602   : > { %7385 = vst.msk [vmem:[%s12170_s22 + $0xd0] sm:$0xff] %vm292_vm0, %v7353_v13  ;;  %v7323_v27 = vadd.f32 %v8267_v11, %v7291_v21  ;;  %v9768_v30 = vpop.f32.mrb[30].mxu1 }
 0x603   : > { %v7356_v57 = vmax.f32 %v7324_v44, 0.0  ;;  %v7294_v5 = vadd.f32 %v9768_v30, %v12160_v48  ;;  %v7183_v6 = vpop.f32.mrb[31].mxu1 }
 0x604   : > { %v7355_v42 = vmax.f32 %v7323_v27, 0.0  ;;  %v7293_v41 = vadd.f32 %v12160_v48, %v7183_v6 }
 0x605   : > { %7388 = vst.msk [vmem:[%s12170_s22 + $0xe8] sm:$0xff] %vm292_vm0, %v7356_v57  ;;  %v7326_v8 = vadd.f32 %v8270_v53, %v7294_v5 }
 0x606   : > { %7387 = vst.msk [vmem:[%s12170_s22 + $0xe0] sm:$0xff] %vm292_vm0, %v7355_v42  ;;  %v7325_v54 = vadd.f32 %v8269_v19, %v7293_v41 }
 0x607   : > { %v7358_v10 = vmax.f32 %v7326_v8, 0.0 }
 0x608   : > { %v7357_v12 = vmax.f32 %v7325_v54, 0.0 }
 0x609   : > { %7390 = vst.msk [vmem:[%s12170_s22 + $0xf8] sm:$0xff] %vm292_vm0, %v7358_v10 }
 0x60a   : > { %7389 = vst.msk [vmem:[%s12170_s22 + $0xf0] sm:$0xff] %vm292_vm0, %v7357_v12 }
 0x60b PF: > { %s15_s18 = sadd.s32 1, %s10297_s18  }
 0x60c   : > { %p12_p4 = scmp.ge.s32.totalorder %s15_s18, 4  }
 0x60e   :  { %14 = sbr.rel (!%p12_p4) target bundleno = 1 (0x1), region = 90 }

</bundles_post_ra>
